<compile_context>
chip_gen: v7x
topology: tpu7x:2x2x1
jax: 0.10.0
libtpu: 0.0.40
codegen_flags: <defaults>
</compile_context>

<pallas_src>
import functools

import jax
import jax.numpy as jnp
from jax.experimental import pallas as pl
from jax.experimental.pallas import tpu as pltpu

EPS = 1e-5
_MAX_CONV_TILE_B = 8      # cap images per conv grid step (bounds unrolled code size)


def _vmem_limit_bytes():
    """Generation-aware VMEM budget (v5e/v6e: 128 MiB parts, v7x: 64 MiB)."""
    cap = 128 * 1024 * 1024
    try:
        cap = int(getattr(pltpu.get_tpu_info(), "vmem_capacity_bytes", cap))
    except Exception:
        pass
    # Leave headroom for compiler scratch / double-buffering bookkeeping.
    return max(32 * 1024 * 1024, min(int(cap * 0.70), 100 * 1024 * 1024))


def _pick_divisor(n, target, align=1):
    """Largest divisor of n that is <= target and (a multiple of align or == n)."""
    best = None
    for d in range(1, n + 1):
        if n % d == 0 and d <= target and (d % align == 0 or d == n):
            best = d
    return best if best is not None else n


def _tap_masks(h, w, dtype):
    """(9, 1, H*W) 0/1 masks: is 3x3-tap (kh, kw) in-bounds at flat output pos p."""
    p = jnp.arange(h * w, dtype=jnp.int32)
    hi, wi = p // w, p % w
    rows = []
    for kh in range(3):
        for kw in range(3):
            ok_h = jnp.logical_and(hi + (kh - 1) >= 0, hi + (kh - 1) < h)
            ok_w = jnp.logical_and(wi + (kw - 1) >= 0, wi + (kw - 1) < w)
            rows.append(jnp.logical_and(ok_h, ok_w))
    return jnp.stack(rows).astype(dtype).reshape(9, 1, h * w)


# --------------------------------------------------------------------------
# Kernel 1: SeqToANN Conv2d(3x3, stride 1, pad 1, bias=False)  +  TAB stats
# --------------------------------------------------------------------------
def _conv3x3_kernel(x_ref, w_ref, mask_ref, y_ref, sum_ref, sq_ref, acc_ref, *,
                    width):
    """One (tile_b, Cin, H*W) block -> (tile_b, Cout, H*W) + TAB sum / sumsq.

    3x3/stride-1/SAME conv as 9 lane-rotated + boundary-masked MXU matmuls:
      out[co, p] += W[tap][co, :] @ (roll(x, -(kh-1)*W-(kw-1), lanes) * mask[tap])[:, p]
    Grid = (T, B_tiles); per-(t, c) stats accumulate over the trailing
    ("arbitrary") batch axis into resident output blocks.
    """
    b = pl.program_id(1)

    @pl.when(b == 0)
    def _():
        sum_ref[...] = jnp.zeros(sum_ref.shape, sum_ref.dtype)
        sq_ref[...] = jnp.zeros(sq_ref.shape, sq_ref.dtype)

    tile_b, _, hw = x_ref.shape
    w_all = w_ref[...]            # (9, Cout, Cin), hoisted out of the image loop
    m_all = mask_ref[...]         # (9, 1, H*W)

    for bi in range(tile_b):
        xb = x_ref[bi]            # (Cin, H*W)
        acc_ref[...] = jnp.zeros(acc_ref.shape, acc_ref.dtype)   # f32 VMEM accumulator
        for kh in range(3):
            for kw in range(3):
                tap = kh * 3 + kw
                shift = (kh - 1) * width + (kw - 1)
                if shift == 0:                      # center tap: no shift, mask all-ones
                    xs = xb
                else:
                    xs = pltpu.roll(xb, shift=(-shift) % hw, axis=1) * m_all[tap]
                acc_ref[...] += jnp.dot(w_all[tap], xs,
                                        preferred_element_type=jnp.float32)
        acc = acc_ref[...]
        y_ref[bi] = acc.astype(y_ref.dtype)                       # lane-dense store
        sum_ref[...] += jnp.sum(acc, axis=1, keepdims=True)       # (Cout, 1)
        sq_ref[...] += jnp.sum(acc * acc, axis=1, keepdims=True)


def conv3x3_tab_stats(x, w_hwio, masks, *, width, compute_dtype, out_dtype,
                      vmem_limit):
    """x: [B, T, Cin, H*W] (compute_dtype), w: [3, 3, Cin, Cout] (HWIO).

    Returns y [B, T, Cout, H*W] (out_dtype) and per-timestep channel sum / sumsq
    [T, Cout, 1] (f32) for the TAB cumulative batch-norm.
    """
    B, T, Cin, HW = x.shape
    Cout = w_hwio.shape[-1]
    # (9, Cout, Cin): tap-major, output-channel rows (matmul LHS).
    w9 = jnp.transpose(w_hwio.astype(compute_dtype).reshape(9, Cin, Cout), (0, 2, 1))

    in_esz = jnp.dtype(compute_dtype).itemsize
    out_esz = jnp.dtype(out_dtype).itemsize
    per_img = HW * (2 * Cin * in_esz + 2 * Cout * out_esz)        # double-buffered in+out
    fixed = HW * Cout * 4 + 9 * HW * in_esz + 9 * Cout * Cin * in_esz
    budget = max(vmem_limit // 2 - fixed, per_img)
    tile_b = _pick_divisor(B, min(_MAX_CONV_TILE_B, max(1, budget // per_img)))

    kernel = functools.partial(_conv3x3_kernel, width=width)
    y, s, sq = pl.pallas_call(
        kernel,
        out_shape=(jax.ShapeDtypeStruct((B, T, Cout, HW), out_dtype),
                   jax.ShapeDtypeStruct((T, Cout, 1), jnp.float32),
                   jax.ShapeDtypeStruct((T, Cout, 1), jnp.float32)),
        grid=(T, B // tile_b),
        in_specs=[
            pl.BlockSpec((tile_b, None, Cin, HW), lambda t, b: (b, t, 0, 0)),
            pl.BlockSpec((9, Cout, Cin), lambda t, b: (0, 0, 0)),
            pl.BlockSpec((9, 1, HW), lambda t, b: (0, 0, 0)),
        ],
        out_specs=(
            pl.BlockSpec((tile_b, None, Cout, HW), lambda t, b: (b, t, 0, 0)),
            pl.BlockSpec((None, Cout, 1), lambda t, b: (t, 0, 0)),
            pl.BlockSpec((None, Cout, 1), lambda t, b: (t, 0, 0)),
        ),
        scratch_shapes=[pltpu.VMEM((Cout, HW), jnp.float32)],
        compiler_params=pltpu.CompilerParams(
            dimension_semantics=("parallel", "arbitrary"),
            vmem_limit_bytes=vmem_limit),
    )(x, w9, masks)
    return y, s, sq


# --------------------------------------------------------------------------
# TAB statistics -> per-(t, c) affine  (tiny, plain XLA)
# --------------------------------------------------------------------------
def tab_affine(sum_t, sq_t, count_per_t, p, gamma, beta, eps=EPS):
    """Fold cumulative-window BN + affine + p**2 into per-(t, c) scale / shift."""
    T = sum_t.shape[0]
    csum = jnp.cumsum(sum_t, axis=0)                              # (T, C, 1)
    csq = jnp.cumsum(sq_t, axis=0)
    counts = (jnp.arange(1, T + 1, dtype=jnp.float32)
              * float(count_per_t)).reshape(T, 1, 1)
    mean = csum / counts
    var = jnp.maximum(csq / counts - mean * mean, 0.0)            # clamp E[x^2]-E[x]^2
    inv = jax.lax.rsqrt(var + eps)
    p2 = (p.astype(jnp.float32) ** 2).reshape(T, 1, 1)            # _prob_check(p) = p**2
    g = gamma.astype(jnp.float32).reshape(1, -1, 1)
    b = beta.astype(jnp.float32).reshape(1, -1, 1)
    scale = inv * g * p2
    shift = (b - mean * inv * g) * p2
    return scale, shift                                           # (T, C, 1) each


# --------------------------------------------------------------------------
# Kernel 2: fused TAB-normalize (+ optional residual) + LIF neuron
# --------------------------------------------------------------------------
def _tab_lif_core(t, x, res, scale_ref, shift_ref, o_ref, mem_ref, tau, v_th):
    @pl.when(t == 0)
    def _():
        mem_ref[...] = jnp.zeros(mem_ref.shape, mem_ref.dtype)

    u = x.astype(jnp.float32) * scale_ref[...] + shift_ref[...]   # (C,1) bcast over lanes
    if res is not None:
        u = u + res.astype(jnp.float32)
    mem = tau * mem_ref[...] + u
    spike = (mem > v_th).astype(jnp.float32)
    mem_ref[...] = mem * (1.0 - spike)
    o_ref[...] = spike.astype(o_ref.dtype)


def _tab_lif_kernel(scale_ref, shift_ref, x_ref, o_ref, mem_ref, *, tau, v_th):
    _tab_lif_core(pl.program_id(2), x_ref[...], None,
                  scale_ref, shift_ref, o_ref, mem_ref, tau, v_th)


def _tab_lif_res_kernel(scale_ref, shift_ref, x_ref, res_ref, o_ref, mem_ref, *,
                        tau, v_th):
    _tab_lif_core(pl.program_id(2), x_ref[...], res_ref[...],
                  scale_ref, shift_ref, o_ref, mem_ref, tau, v_th)


def tab_lif(y, scale, shift, res, *, tau, v_th, out_dtype, vmem_limit):
    """Fused TAB affine (+ residual) + LIF over [B, T, C, H*W].

    Grid (B, HW-tiles, T): T is the sequential (membrane carry) axis, the rest
    are parallel; the membrane scratch only holds one (C, tile_p) slab.
    """
    B, T, C, HW = y.shape
    in_bytes = jnp.dtype(y.dtype).itemsize * (2 if res is not None else 1)
    out_bytes = jnp.dtype(out_dtype).itemsize
    per_col = C * (2 * (in_bytes + out_bytes) + 4)    # double-buffered io + f32 membrane
    tile_p = _pick_divisor(HW, max(128, (vmem_limit // 2) // max(per_col, 1)),
                           align=128)

    data_spec = pl.BlockSpec((None, None, C, tile_p), lambda b, p, t: (b, t, 0, p))
    stat_spec = pl.BlockSpec((None, C, 1), lambda b, p, t: (t, 0, 0))

    args = [scale, shift, y]
    in_specs = [stat_spec, stat_spec, data_spec]
    if res is None:
        kernel = functools.partial(_tab_lif_kernel, tau=tau, v_th=v_th)
    else:
        args.append(res)
        in_specs.append(data_spec)
        kernel = functools.partial(_tab_lif_res_kernel, tau=tau, v_th=v_th)

    return pl.pallas_call(
        kernel,
        out_shape=jax.ShapeDtypeStruct((B, T, C, HW), out_dtype),
        grid=(B, HW // tile_p, T),
        in_specs=in_specs,
        out_specs=data_spec,
        scratch_shapes=[pltpu.VMEM((C, tile_p), jnp.float32)],
        compiler_params=pltpu.CompilerParams(
            dimension_semantics=("parallel", "parallel", "arbitrary"),
            vmem_limit_bytes=vmem_limit),
    )(*args)


# --------------------------------------------------------------------------
# Full BasicBlock4SNN forward
# --------------------------------------------------------------------------
def basic_block4snn_forward(x_btchw, params, *, stride=1, tau=0.9, v_th=1.0,
                            compute_dtype=jnp.bfloat16):
    """x: [B, T, Cin, H, W] -> spikes [B, T, planes, H, W] (float32)."""
    if stride != 1:
        raise NotImplementedError("stride != 1 needs the (absent) downsample branch")
    B, T, Cin, H, W = x_btchw.shape
    planes = params["w1"].shape[-1]
    vmem_limit = _vmem_limit_bytes()

    # NCHW -> [B, T, C, H*W] is a free reshape (no transpose); cast once so
    # conv #1's input DMA is already half-width on the bf16 path.
    x_flat = x_btchw.reshape(B, T, Cin, H * W).astype(compute_dtype)
    masks = _tap_masks(H, W, compute_dtype)
    count = B * H * W                                  # samples/channel/timestep

    # Conv_TAB_Layer #1  +  lif1 (no residual -> no zero tensor materialized)
    y1, s1, q1 = conv3x3_tab_stats(x_flat, params["w1"], masks, width=W,
                                   compute_dtype=compute_dtype,
                                   out_dtype=compute_dtype, vmem_limit=vmem_limit)
    sc1, sh1 = tab_affine(s1, q1, count, params["p1"], params["g1"], params["b1"])
    spk1 = tab_lif(y1, sc1, sh1, None, tau=tau, v_th=v_th,
                   out_dtype=compute_dtype, vmem_limit=vmem_limit)

    # Conv_TAB_Layer #2  +  (out += identity)  +  lif2, fused
    y2, s2, q2 = conv3x3_tab_stats(spk1, params["w2"], masks, width=W,
                                   compute_dtype=compute_dtype,
                                   out_dtype=compute_dtype, vmem_limit=vmem_limit)
    sc2, sh2 = tab_affine(s2, q2, count, params["p2"], params["g2"], params["b2"])
    spk2 = tab_lif(y2, sc2, sh2, x_flat, tau=tau, v_th=v_th,
                   out_dtype=jnp.float32, vmem_limit=vmem_limit)

    return spk2.reshape(B, T, planes, H, W)            # free reshape back to NCHW


# --------------------------------------------------------------------------
# pure-JAX reference (for the self-check)
# --------------------------------------------------------------------------
def _reference_forward(x, params, *, tau, v_th, eps=EPS):
    def conv(x5, w):
        B, T, C, H, W = x5.shape
        xf = x5.reshape(B * T, C, H, W)
        y = jax.lax.conv_general_dilated(
            xf, w, (1, 1), "SAME", dimension_numbers=("NCHW", "HWIO", "NCHW"))
        return y.reshape(B, T, -1, H, W)

    def tab(x5, p, g, b):
        B, T, C, H, W = x5.shape
        outs = []
        for t in range(T):
            win = x5[:, :t + 1]
            mean = win.mean(axis=(0, 1, 3, 4))
            var = ((win - mean[None, None, :, None, None]) ** 2).mean(axis=(0, 1, 3, 4))
            yt = (x5[:, t] - mean[None, :, None, None]) * jax.lax.rsqrt(var + eps)[None, :, None, None]
            yt = yt * g[None, :, None, None] + b[None, :, None, None]
            outs.append(yt * (p[t] ** 2))
        return jnp.stack(outs, axis=1)

    def lif(x5, res):
        B, T = x5.shape[:2]
        mem = jnp.zeros((B,) + x5.shape[2:], jnp.float32)
        outs = []
        for t in range(T):
            m = tau * mem + x5[:, t] + res[:, t]
            s = (m - v_th > 0).astype(jnp.float32)
            mem = m * (1.0 - s)
            outs.append(s)
        return jnp.stack(outs, axis=1)

    y = conv(x, params["w1"])
    y = tab(y, params["p1"], params["g1"], params["b1"])
    y = lif(y, jnp.zeros_like(y))
    y = conv(y, params["w2"])
    y = tab(y, params["p2"], params["g2"], params["b2"])
    y = lif(y, x)
    return y


if __name__ == "__main__":
    # inplanes == planes, stride=1 -> downsample=None (the supported configuration).
    B, T, C, H, W = 2, 4, 8, 16, 16
    planes, tau, v_th = C, 0.9, 1.0

    key = jax.random.PRNGKey(0)
    kx, k1, k2 = jax.random.split(key, 3)
    x = jax.random.normal(kx, (B, T, C, H, W), jnp.float32)
    params = {
        "w1": jax.random.normal(k1, (3, 3, C, planes), jnp.float32) * 0.1,        # HWIO
        "w2": jax.random.normal(k2, (3, 3, planes, planes), jnp.float32) * 0.1,   # HWIO
        # TAB params at PyTorch init values: p = 1, BN weight = 1, bias = 0
        "p1": jnp.ones((T,), jnp.float32),
        "g1": jnp.ones((planes,), jnp.float32),
        "b1": jnp.zeros((planes,), jnp.float32),
        "p2": jnp.ones((T,), jnp.float32),
        "g2": jnp.ones((planes,), jnp.float32),
        "b2": jnp.zeros((planes,), jnp.float32),
    }

    ref = _reference_forward(x, params, tau=tau, v_th=v_th)

    # 1) float32 compute path: strict check of the kernel math vs the reference.
    fwd32 = jax.jit(functools.partial(basic_block4snn_forward, stride=1, tau=tau,
                                      v_th=v_th, compute_dtype=jnp.float32))
    out32 = jax.block_until_ready(fwd32(x, params))
    assert out32.shape == (B, T, planes, H, W)
    err32 = float(jnp.mean(jnp.abs(out32 - ref)))
    assert err32 < 1e-2, f"f32 spike mismatch rate {err32}"

    # 2) bfloat16 MXU / bf16-HBM path (default / fast).  Spikes are a hard
    #    threshold of the membrane, so bf16 rounding of activations can flip a
    #    small fraction of near-threshold spikes -> loose sanity bound only.
    fwd16 = jax.jit(functools.partial(basic_block4snn_forward, stride=1, tau=tau,
                                      v_th=v_th, compute_dtype=jnp.bfloat16))
    out16 = jax.block_until_ready(fwd16(x, params))
    assert out16.shape == (B, T, planes, H, W)
    err16 = float(jnp.mean(jnp.abs(out16 - ref)))
    assert err16 < 0.15, f"bf16 spike mismatch rate {err16}"

    print("KERNEL_OK")
</pallas_src>

<mosaic_0001>
module attributes {stable_mosaic.version = 11 : i64} {
  func.func @_conv3x3_kernel(%arg0: i32, %arg1: i32, %arg2: memref<2x1x8x256xf32, #tpu.memory_space<vmem>>, %arg3: memref<9x8x8xf32, #tpu.memory_space<vmem>>, %arg4: memref<9x1x256xf32, #tpu.memory_space<vmem>>, %arg5: memref<2x1x8x256xf32, #tpu.memory_space<vmem>>, %arg6: memref<1x8x1xf32, #tpu.memory_space<vmem>>, %arg7: memref<1x8x1xf32, #tpu.memory_space<vmem>>, %arg8: memref<8x256xf32, #tpu.memory_space<vmem>>) attributes {dimension_semantics = [#tpu.dimension_semantics<parallel>, #tpu.dimension_semantics<arbitrary>], iteration_bounds = array<i64: 4, 1>, scalar_prefetch = 0 : i64, scratch_operands = 1 : i64, tpu.core_type = #tpu.core_type<tc>, window_params = [{transform_indices = @transform_0, window_bounds = array<i64: 2, 1, 8, 256>}, {pipeline_mode = #tpu.pipeline_mode<synchronous>, transform_indices = @transform_1, window_bounds = array<i64: 9, 8, 8>}, {pipeline_mode = #tpu.pipeline_mode<synchronous>, transform_indices = @transform_2, window_bounds = array<i64: 9, 1, 256>}, {transform_indices = @transform_3, window_bounds = array<i64: 2, 1, 8, 256>}, {transform_indices = @transform_4, window_bounds = array<i64: 1, 8, 1>}, {transform_indices = @transform_5, window_bounds = array<i64: 1, 8, 1>}]} {
    %c0_i32 = arith.constant 0 : i32
    %0 = arith.cmpi eq, %arg1, %c0_i32 : i32
    %1 = arith.extui %0 : i1 to i32
    %c0_i32_0 = arith.constant 0 : i32
    %2 = arith.cmpi ne, %1, %c0_i32_0 : i32
    scf.if %2 {
      %cst_156 = arith.constant 0.000000e+00 : f32
      %243 = vector.broadcast %cst_156 : f32 to vector<8x1xf32>
      %c0_157 = arith.constant 0 : index
      %c0_158 = arith.constant 0 : index
      %c0_159 = arith.constant 0 : index
      %244 = vector.load %arg6[%c0_157, %c0_158, %c0_159] : memref<1x8x1xf32, #tpu.memory_space<vmem>>, vector<1x8x1xf32>
      %245 = vector.shape_cast %244 : vector<1x8x1xf32> to vector<8x1xf32>
      %246 = vector.shape_cast %243 : vector<8x1xf32> to vector<1x8x1xf32>
      tpu.vector_store %arg6[%c0_157, %c0_158, %c0_159], %246 {strides = array<i32>} : memref<1x8x1xf32, #tpu.memory_space<vmem>>, vector<1x8x1xf32>,
      %cst_160 = arith.constant 0.000000e+00 : f32
      %247 = vector.broadcast %cst_160 : f32 to vector<8x1xf32>
      %c0_161 = arith.constant 0 : index
      %c0_162 = arith.constant 0 : index
      %c0_163 = arith.constant 0 : index
      %248 = vector.load %arg7[%c0_161, %c0_162, %c0_163] : memref<1x8x1xf32, #tpu.memory_space<vmem>>, vector<1x8x1xf32>
      %249 = vector.shape_cast %248 : vector<1x8x1xf32> to vector<8x1xf32>
      %250 = vector.shape_cast %247 : vector<8x1xf32> to vector<1x8x1xf32>
      tpu.vector_store %arg7[%c0_161, %c0_162, %c0_163], %250 {strides = array<i32>} : memref<1x8x1xf32, #tpu.memory_space<vmem>>, vector<1x8x1xf32>,
    } else {
    }
    %c0 = arith.constant 0 : index
    %c0_1 = arith.constant 0 : index
    %c0_2 = arith.constant 0 : index
    %3 = vector.load %arg3[%c0, %c0_1, %c0_2] : memref<9x8x8xf32, #tpu.memory_space<vmem>>, vector<9x8x8xf32>
    %c0_3 = arith.constant 0 : index
    %c0_4 = arith.constant 0 : index
    %c0_5 = arith.constant 0 : index
    %4 = vector.load %arg4[%c0_3, %c0_4, %c0_5] : memref<9x1x256xf32, #tpu.memory_space<vmem>>, vector<9x1x256xf32>
    %c0_6 = arith.constant 0 : index
    %c0_7 = arith.constant 0 : index
    %c0_8 = arith.constant 0 : index
    %c0_9 = arith.constant 0 : index
    %5 = vector.load %arg2[%c0_6, %c0_7, %c0_8, %c0_9] : memref<2x1x8x256xf32, #tpu.memory_space<vmem>>, vector<1x1x8x256xf32>
    %6 = vector.shape_cast %5 : vector<1x1x8x256xf32> to vector<8x256xf32>
    %cst = arith.constant 0.000000e+00 : f32
    %7 = vector.broadcast %cst : f32 to vector<8x256xf32>
    %c0_10 = arith.constant 0 : index
    %c0_11 = arith.constant 0 : index
    %8 = vector.load %arg8[%c0_10, %c0_11] : memref<8x256xf32, #tpu.memory_space<vmem>>, vector<8x256xf32>
    tpu.vector_store %arg8[%c0_10, %c0_11], %7 {strides = array<i32>} : memref<8x256xf32, #tpu.memory_space<vmem>>, vector<8x256xf32>,
    %c17_i32 = arith.constant 17 : i32
    %9 = tpu.dynamic_rotate %6 by %c17_i32 dim 1 : vector<8x256xf32>, i32 -> vector<8x256xf32>
    %10 = vector.extract_strided_slice %4 {offsets = [0, 0, 0], sizes = [1, 1, 256], strides = [1, 1, 1]} : vector<9x1x256xf32> to vector<1x1x256xf32>
    %11 = vector.shape_cast %10 : vector<1x1x256xf32> to vector<1x256xf32>
    %12 = vector.broadcast %11 : vector<1x256xf32> to vector<8x256xf32>
    %13 = arith.mulf %9, %12 : vector<8x256xf32>
    %c0_12 = arith.constant 0 : index
    %c0_13 = arith.constant 0 : index
    %14 = vector.load %arg8[%c0_12, %c0_13] : memref<8x256xf32, #tpu.memory_space<vmem>>, vector<8x256xf32>
    %15 = vector.extract_strided_slice %3 {offsets = [0, 0, 0], sizes = [1, 8, 8], strides = [1, 1, 1]} : vector<9x8x8xf32> to vector<1x8x8xf32>
    %16 = vector.shape_cast %15 : vector<1x8x8xf32> to vector<8x8xf32>
    %cst_14 = arith.constant dense<0.000000e+00> : vector<8x256xf32>
    %17 = tpu.matmul %16, %13, %cst_14 {dimension_numbers = #tpu.dot_dimension_numbers<[1], [0], [0], [1], [0, 0, 1, 1], [], []>} : vector<8x8xf32>, vector<8x256xf32>, vector<8x256xf32> -> vector<8x256xf32>
    %18 = arith.addf %14, %17 : vector<8x256xf32>
    %c0_15 = arith.constant 0 : index
    %c0_16 = arith.constant 0 : index
    %19 = vector.load %arg8[%c0_15, %c0_16] : memref<8x256xf32, #tpu.memory_space<vmem>>, vector<8x256xf32>
    tpu.vector_store %arg8[%c0_15, %c0_16], %18 {strides = array<i32>} : memref<8x256xf32, #tpu.memory_space<vmem>>, vector<8x256xf32>,
    %c16_i32 = arith.constant 16 : i32
    %20 = tpu.dynamic_rotate %6 by %c16_i32 dim 1 : vector<8x256xf32>, i32 -> vector<8x256xf32>
    %21 = vector.extract_strided_slice %4 {offsets = [1, 0, 0], sizes = [1, 1, 256], strides = [1, 1, 1]} : vector<9x1x256xf32> to vector<1x1x256xf32>
    %22 = vector.shape_cast %21 : vector<1x1x256xf32> to vector<1x256xf32>
    %23 = vector.broadcast %22 : vector<1x256xf32> to vector<8x256xf32>
    %24 = arith.mulf %20, %23 : vector<8x256xf32>
    %c0_17 = arith.constant 0 : index
    %c0_18 = arith.constant 0 : index
    %25 = vector.load %arg8[%c0_17, %c0_18] : memref<8x256xf32, #tpu.memory_space<vmem>>, vector<8x256xf32>
    %26 = vector.extract_strided_slice %3 {offsets = [1, 0, 0], sizes = [1, 8, 8], strides = [1, 1, 1]} : vector<9x8x8xf32> to vector<1x8x8xf32>
    %27 = vector.shape_cast %26 : vector<1x8x8xf32> to vector<8x8xf32>
    %cst_19 = arith.constant dense<0.000000e+00> : vector<8x256xf32>
    %28 = tpu.matmul %27, %24, %cst_19 {dimension_numbers = #tpu.dot_dimension_numbers<[1], [0], [0], [1], [0, 0, 1, 1], [], []>} : vector<8x8xf32>, vector<8x256xf32>, vector<8x256xf32> -> vector<8x256xf32>
    %29 = arith.addf %25, %28 : vector<8x256xf32>
    %c0_20 = arith.constant 0 : index
    %c0_21 = arith.constant 0 : index
    %30 = vector.load %arg8[%c0_20, %c0_21] : memref<8x256xf32, #tpu.memory_space<vmem>>, vector<8x256xf32>
    tpu.vector_store %arg8[%c0_20, %c0_21], %29 {strides = array<i32>} : memref<8x256xf32, #tpu.memory_space<vmem>>, vector<8x256xf32>,
    %c15_i32 = arith.constant 15 : i32
    %31 = tpu.dynamic_rotate %6 by %c15_i32 dim 1 : vector<8x256xf32>, i32 -> vector<8x256xf32>
    %32 = vector.extract_strided_slice %4 {offsets = [2, 0, 0], sizes = [1, 1, 256], strides = [1, 1, 1]} : vector<9x1x256xf32> to vector<1x1x256xf32>
    %33 = vector.shape_cast %32 : vector<1x1x256xf32> to vector<1x256xf32>
    %34 = vector.broadcast %33 : vector<1x256xf32> to vector<8x256xf32>
    %35 = arith.mulf %31, %34 : vector<8x256xf32>
    %c0_22 = arith.constant 0 : index
    %c0_23 = arith.constant 0 : index
    %36 = vector.load %arg8[%c0_22, %c0_23] : memref<8x256xf32, #tpu.memory_space<vmem>>, vector<8x256xf32>
    %37 = vector.extract_strided_slice %3 {offsets = [2, 0, 0], sizes = [1, 8, 8], strides = [1, 1, 1]} : vector<9x8x8xf32> to vector<1x8x8xf32>
    %38 = vector.shape_cast %37 : vector<1x8x8xf32> to vector<8x8xf32>
    %cst_24 = arith.constant dense<0.000000e+00> : vector<8x256xf32>
    %39 = tpu.matmul %38, %35, %cst_24 {dimension_numbers = #tpu.dot_dimension_numbers<[1], [0], [0], [1], [0, 0, 1, 1], [], []>} : vector<8x8xf32>, vector<8x256xf32>, vector<8x256xf32> -> vector<8x256xf32>
    %40 = arith.addf %36, %39 : vector<8x256xf32>
    %c0_25 = arith.constant 0 : index
    %c0_26 = arith.constant 0 : index
    %41 = vector.load %arg8[%c0_25, %c0_26] : memref<8x256xf32, #tpu.memory_space<vmem>>, vector<8x256xf32>
    tpu.vector_store %arg8[%c0_25, %c0_26], %40 {strides = array<i32>} : memref<8x256xf32, #tpu.memory_space<vmem>>, vector<8x256xf32>,
    %c1_i32 = arith.constant 1 : i32
    %42 = tpu.dynamic_rotate %6 by %c1_i32 dim 1 : vector<8x256xf32>, i32 -> vector<8x256xf32>
    %43 = vector.extract_strided_slice %4 {offsets = [3, 0, 0], sizes = [1, 1, 256], strides = [1, 1, 1]} : vector<9x1x256xf32> to vector<1x1x256xf32>
    %44 = vector.shape_cast %43 : vector<1x1x256xf32> to vector<1x256xf32>
    %45 = vector.broadcast %44 : vector<1x256xf32> to vector<8x256xf32>
    %46 = arith.mulf %42, %45 : vector<8x256xf32>
    %c0_27 = arith.constant 0 : index
    %c0_28 = arith.constant 0 : index
    %47 = vector.load %arg8[%c0_27, %c0_28] : memref<8x256xf32, #tpu.memory_space<vmem>>, vector<8x256xf32>
    %48 = vector.extract_strided_slice %3 {offsets = [3, 0, 0], sizes = [1, 8, 8], strides = [1, 1, 1]} : vector<9x8x8xf32> to vector<1x8x8xf32>
    %49 = vector.shape_cast %48 : vector<1x8x8xf32> to vector<8x8xf32>
    %cst_29 = arith.constant dense<0.000000e+00> : vector<8x256xf32>
    %50 = tpu.matmul %49, %46, %cst_29 {dimension_numbers = #tpu.dot_dimension_numbers<[1], [0], [0], [1], [0, 0, 1, 1], [], []>} : vector<8x8xf32>, vector<8x256xf32>, vector<8x256xf32> -> vector<8x256xf32>
    %51 = arith.addf %47, %50 : vector<8x256xf32>
    %c0_30 = arith.constant 0 : index
    %c0_31 = arith.constant 0 : index
    %52 = vector.load %arg8[%c0_30, %c0_31] : memref<8x256xf32, #tpu.memory_space<vmem>>, vector<8x256xf32>
    tpu.vector_store %arg8[%c0_30, %c0_31], %51 {strides = array<i32>} : memref<8x256xf32, #tpu.memory_space<vmem>>, vector<8x256xf32>,
    %c0_32 = arith.constant 0 : index
    %c0_33 = arith.constant 0 : index
    %53 = vector.load %arg8[%c0_32, %c0_33] : memref<8x256xf32, #tpu.memory_space<vmem>>, vector<8x256xf32>
    %54 = vector.extract_strided_slice %3 {offsets = [4, 0, 0], sizes = [1, 8, 8], strides = [1, 1, 1]} : vector<9x8x8xf32> to vector<1x8x8xf32>
    %55 = vector.shape_cast %54 : vector<1x8x8xf32> to vector<8x8xf32>
    %cst_34 = arith.constant dense<0.000000e+00> : vector<8x256xf32>
    %56 = tpu.matmul %55, %6, %cst_34 {dimension_numbers = #tpu.dot_dimension_numbers<[1], [0], [0], [1], [0, 0, 1, 1], [], []>} : vector<8x8xf32>, vector<8x256xf32>, vector<8x256xf32> -> vector<8x256xf32>
    %57 = arith.addf %53, %56 : vector<8x256xf32>
    %c0_35 = arith.constant 0 : index
    %c0_36 = arith.constant 0 : index
    %58 = vector.load %arg8[%c0_35, %c0_36] : memref<8x256xf32, #tpu.memory_space<vmem>>, vector<8x256xf32>
    tpu.vector_store %arg8[%c0_35, %c0_36], %57 {strides = array<i32>} : memref<8x256xf32, #tpu.memory_space<vmem>>, vector<8x256xf32>,
    %c255_i32 = arith.constant 255 : i32
    %59 = tpu.dynamic_rotate %6 by %c255_i32 dim 1 : vector<8x256xf32>, i32 -> vector<8x256xf32>
    %60 = vector.extract_strided_slice %4 {offsets = [5, 0, 0], sizes = [1, 1, 256], strides = [1, 1, 1]} : vector<9x1x256xf32> to vector<1x1x256xf32>
    %61 = vector.shape_cast %60 : vector<1x1x256xf32> to vector<1x256xf32>
    %62 = vector.broadcast %61 : vector<1x256xf32> to vector<8x256xf32>
    %63 = arith.mulf %59, %62 : vector<8x256xf32>
    %c0_37 = arith.constant 0 : index
    %c0_38 = arith.constant 0 : index
    %64 = vector.load %arg8[%c0_37, %c0_38] : memref<8x256xf32, #tpu.memory_space<vmem>>, vector<8x256xf32>
    %65 = vector.extract_strided_slice %3 {offsets = [5, 0, 0], sizes = [1, 8, 8], strides = [1, 1, 1]} : vector<9x8x8xf32> to vector<1x8x8xf32>
    %66 = vector.shape_cast %65 : vector<1x8x8xf32> to vector<8x8xf32>
    %cst_39 = arith.constant dense<0.000000e+00> : vector<8x256xf32>
    %67 = tpu.matmul %66, %63, %cst_39 {dimension_numbers = #tpu.dot_dimension_numbers<[1], [0], [0], [1], [0, 0, 1, 1], [], []>} : vector<8x8xf32>, vector<8x256xf32>, vector<8x256xf32> -> vector<8x256xf32>
    %68 = arith.addf %64, %67 : vector<8x256xf32>
    %c0_40 = arith.constant 0 : index
    %c0_41 = arith.constant 0 : index
    %69 = vector.load %arg8[%c0_40, %c0_41] : memref<8x256xf32, #tpu.memory_space<vmem>>, vector<8x256xf32>
    tpu.vector_store %arg8[%c0_40, %c0_41], %68 {strides = array<i32>} : memref<8x256xf32, #tpu.memory_space<vmem>>, vector<8x256xf32>,
    %c241_i32 = arith.constant 241 : i32
    %70 = tpu.dynamic_rotate %6 by %c241_i32 dim 1 : vector<8x256xf32>, i32 -> vector<8x256xf32>
    %71 = vector.extract_strided_slice %4 {offsets = [6, 0, 0], sizes = [1, 1, 256], strides = [1, 1, 1]} : vector<9x1x256xf32> to vector<1x1x256xf32>
    %72 = vector.shape_cast %71 : vector<1x1x256xf32> to vector<1x256xf32>
    %73 = vector.broadcast %72 : vector<1x256xf32> to vector<8x256xf32>
    %74 = arith.mulf %70, %73 : vector<8x256xf32>
    %c0_42 = arith.constant 0 : index
    %c0_43 = arith.constant 0 : index
    %75 = vector.load %arg8[%c0_42, %c0_43] : memref<8x256xf32, #tpu.memory_space<vmem>>, vector<8x256xf32>
    %76 = vector.extract_strided_slice %3 {offsets = [6, 0, 0], sizes = [1, 8, 8], strides = [1, 1, 1]} : vector<9x8x8xf32> to vector<1x8x8xf32>
    %77 = vector.shape_cast %76 : vector<1x8x8xf32> to vector<8x8xf32>
    %cst_44 = arith.constant dense<0.000000e+00> : vector<8x256xf32>
    %78 = tpu.matmul %77, %74, %cst_44 {dimension_numbers = #tpu.dot_dimension_numbers<[1], [0], [0], [1], [0, 0, 1, 1], [], []>} : vector<8x8xf32>, vector<8x256xf32>, vector<8x256xf32> -> vector<8x256xf32>
    %79 = arith.addf %75, %78 : vector<8x256xf32>
    %c0_45 = arith.constant 0 : index
    %c0_46 = arith.constant 0 : index
    %80 = vector.load %arg8[%c0_45, %c0_46] : memref<8x256xf32, #tpu.memory_space<vmem>>, vector<8x256xf32>
    tpu.vector_store %arg8[%c0_45, %c0_46], %79 {strides = array<i32>} : memref<8x256xf32, #tpu.memory_space<vmem>>, vector<8x256xf32>,
    %c240_i32 = arith.constant 240 : i32
    %81 = tpu.dynamic_rotate %6 by %c240_i32 dim 1 : vector<8x256xf32>, i32 -> vector<8x256xf32>
    %82 = vector.extract_strided_slice %4 {offsets = [7, 0, 0], sizes = [1, 1, 256], strides = [1, 1, 1]} : vector<9x1x256xf32> to vector<1x1x256xf32>
    %83 = vector.shape_cast %82 : vector<1x1x256xf32> to vector<1x256xf32>
    %84 = vector.broadcast %83 : vector<1x256xf32> to vector<8x256xf32>
    %85 = arith.mulf %81, %84 : vector<8x256xf32>
    %c0_47 = arith.constant 0 : index
    %c0_48 = arith.constant 0 : index
    %86 = vector.load %arg8[%c0_47, %c0_48] : memref<8x256xf32, #tpu.memory_space<vmem>>, vector<8x256xf32>
    %87 = vector.extract_strided_slice %3 {offsets = [7, 0, 0], sizes = [1, 8, 8], strides = [1, 1, 1]} : vector<9x8x8xf32> to vector<1x8x8xf32>
    %88 = vector.shape_cast %87 : vector<1x8x8xf32> to vector<8x8xf32>
    %cst_49 = arith.constant dense<0.000000e+00> : vector<8x256xf32>
    %89 = tpu.matmul %88, %85, %cst_49 {dimension_numbers = #tpu.dot_dimension_numbers<[1], [0], [0], [1], [0, 0, 1, 1], [], []>} : vector<8x8xf32>, vector<8x256xf32>, vector<8x256xf32> -> vector<8x256xf32>
    %90 = arith.addf %86, %89 : vector<8x256xf32>
    %c0_50 = arith.constant 0 : index
    %c0_51 = arith.constant 0 : index
    %91 = vector.load %arg8[%c0_50, %c0_51] : memref<8x256xf32, #tpu.memory_space<vmem>>, vector<8x256xf32>
    tpu.vector_store %arg8[%c0_50, %c0_51], %90 {strides = array<i32>} : memref<8x256xf32, #tpu.memory_space<vmem>>, vector<8x256xf32>,
    %c239_i32 = arith.constant 239 : i32
    %92 = tpu.dynamic_rotate %6 by %c239_i32 dim 1 : vector<8x256xf32>, i32 -> vector<8x256xf32>
    %93 = vector.extract_strided_slice %4 {offsets = [8, 0, 0], sizes = [1, 1, 256], strides = [1, 1, 1]} : vector<9x1x256xf32> to vector<1x1x256xf32>
    %94 = vector.shape_cast %93 : vector<1x1x256xf32> to vector<1x256xf32>
    %95 = vector.broadcast %94 : vector<1x256xf32> to vector<8x256xf32>
    %96 = arith.mulf %92, %95 : vector<8x256xf32>
    %c0_52 = arith.constant 0 : index
    %c0_53 = arith.constant 0 : index
    %97 = vector.load %arg8[%c0_52, %c0_53] : memref<8x256xf32, #tpu.memory_space<vmem>>, vector<8x256xf32>
    %98 = vector.extract_strided_slice %3 {offsets = [8, 0, 0], sizes = [1, 8, 8], strides = [1, 1, 1]} : vector<9x8x8xf32> to vector<1x8x8xf32>
    %99 = vector.shape_cast %98 : vector<1x8x8xf32> to vector<8x8xf32>
    %cst_54 = arith.constant dense<0.000000e+00> : vector<8x256xf32>
    %100 = tpu.matmul %99, %96, %cst_54 {dimension_numbers = #tpu.dot_dimension_numbers<[1], [0], [0], [1], [0, 0, 1, 1], [], []>} : vector<8x8xf32>, vector<8x256xf32>, vector<8x256xf32> -> vector<8x256xf32>
    %101 = arith.addf %97, %100 : vector<8x256xf32>
    %c0_55 = arith.constant 0 : index
    %c0_56 = arith.constant 0 : index
    %102 = vector.load %arg8[%c0_55, %c0_56] : memref<8x256xf32, #tpu.memory_space<vmem>>, vector<8x256xf32>
    tpu.vector_store %arg8[%c0_55, %c0_56], %101 {strides = array<i32>} : memref<8x256xf32, #tpu.memory_space<vmem>>, vector<8x256xf32>,
    %c0_57 = arith.constant 0 : index
    %c0_58 = arith.constant 0 : index
    %103 = vector.load %arg8[%c0_57, %c0_58] : memref<8x256xf32, #tpu.memory_space<vmem>>, vector<8x256xf32>
    %c0_59 = arith.constant 0 : index
    %c0_60 = arith.constant 0 : index
    %c0_61 = arith.constant 0 : index
    %c0_62 = arith.constant 0 : index
    %104 = vector.load %arg5[%c0_59, %c0_60, %c0_61, %c0_62] : memref<2x1x8x256xf32, #tpu.memory_space<vmem>>, vector<1x1x8x256xf32>
    %105 = vector.shape_cast %104 : vector<1x1x8x256xf32> to vector<8x256xf32>
    %106 = vector.shape_cast %103 : vector<8x256xf32> to vector<1x1x8x256xf32>
    tpu.vector_store %arg5[%c0_59, %c0_60, %c0_61, %c0_62], %106 {strides = array<i32>} : memref<2x1x8x256xf32, #tpu.memory_space<vmem>>, vector<1x1x8x256xf32>,
    %c0_63 = arith.constant 0 : index
    %c0_64 = arith.constant 0 : index
    %c0_65 = arith.constant 0 : index
    %107 = vector.load %arg6[%c0_63, %c0_64, %c0_65] : memref<1x8x1xf32, #tpu.memory_space<vmem>>, vector<1x8x1xf32>
    %108 = vector.shape_cast %107 : vector<1x8x1xf32> to vector<8x1xf32>
    %cst_66 = arith.constant dense<0.000000e+00> : vector<8xf32>
    %109 = vector.multi_reduction <add>, %103, %cst_66 [1] : vector<8x256xf32> to vector<8xf32>
    %110 = vector.shape_cast %109 : vector<8xf32> to vector<8x1xf32>
    %111 = arith.addf %108, %110 : vector<8x1xf32>
    %c0_67 = arith.constant 0 : index
    %c0_68 = arith.constant 0 : index
    %c0_69 = arith.constant 0 : index
    %112 = vector.load %arg6[%c0_67, %c0_68, %c0_69] : memref<1x8x1xf32, #tpu.memory_space<vmem>>, vector<1x8x1xf32>
    %113 = vector.shape_cast %112 : vector<1x8x1xf32> to vector<8x1xf32>
    %114 = vector.shape_cast %111 : vector<8x1xf32> to vector<1x8x1xf32>
    tpu.vector_store %arg6[%c0_67, %c0_68, %c0_69], %114 {strides = array<i32>} : memref<1x8x1xf32, #tpu.memory_space<vmem>>, vector<1x8x1xf32>,
    %c0_70 = arith.constant 0 : index
    %c0_71 = arith.constant 0 : index
    %c0_72 = arith.constant 0 : index
    %115 = vector.load %arg7[%c0_70, %c0_71, %c0_72] : memref<1x8x1xf32, #tpu.memory_space<vmem>>, vector<1x8x1xf32>
    %116 = vector.shape_cast %115 : vector<1x8x1xf32> to vector<8x1xf32>
    %117 = arith.mulf %103, %103 : vector<8x256xf32>
    %cst_73 = arith.constant dense<0.000000e+00> : vector<8xf32>
    %118 = vector.multi_reduction <add>, %117, %cst_73 [1] : vector<8x256xf32> to vector<8xf32>
    %119 = vector.shape_cast %118 : vector<8xf32> to vector<8x1xf32>
    %120 = arith.addf %116, %119 : vector<8x1xf32>
    %c0_74 = arith.constant 0 : index
    %c0_75 = arith.constant 0 : index
    %c0_76 = arith.constant 0 : index
    %121 = vector.load %arg7[%c0_74, %c0_75, %c0_76] : memref<1x8x1xf32, #tpu.memory_space<vmem>>, vector<1x8x1xf32>
    %122 = vector.shape_cast %121 : vector<1x8x1xf32> to vector<8x1xf32>
    %123 = vector.shape_cast %120 : vector<8x1xf32> to vector<1x8x1xf32>
    tpu.vector_store %arg7[%c0_74, %c0_75, %c0_76], %123 {strides = array<i32>} : memref<1x8x1xf32, #tpu.memory_space<vmem>>, vector<1x8x1xf32>,
    %c1 = arith.constant 1 : index
    %c0_77 = arith.constant 0 : index
    %c0_78 = arith.constant 0 : index
    %c0_79 = arith.constant 0 : index
    %124 = vector.load %arg2[%c1, %c0_77, %c0_78, %c0_79] : memref<2x1x8x256xf32, #tpu.memory_space<vmem>>, vector<1x1x8x256xf32>
    %125 = vector.shape_cast %124 : vector<1x1x8x256xf32> to vector<8x256xf32>
    %cst_80 = arith.constant 0.000000e+00 : f32
    %126 = vector.broadcast %cst_80 : f32 to vector<8x256xf32>
    %c0_81 = arith.constant 0 : index
    %c0_82 = arith.constant 0 : index
    %127 = vector.load %arg8[%c0_81, %c0_82] : memref<8x256xf32, #tpu.memory_space<vmem>>, vector<8x256xf32>
    tpu.vector_store %arg8[%c0_81, %c0_82], %126 {strides = array<i32>} : memref<8x256xf32, #tpu.memory_space<vmem>>, vector<8x256xf32>,
    %c17_i32_83 = arith.constant 17 : i32
    %128 = tpu.dynamic_rotate %125 by %c17_i32_83 dim 1 : vector<8x256xf32>, i32 -> vector<8x256xf32>
    %129 = vector.extract_strided_slice %4 {offsets = [0, 0, 0], sizes = [1, 1, 256], strides = [1, 1, 1]} : vector<9x1x256xf32> to vector<1x1x256xf32>
    %130 = vector.shape_cast %129 : vector<1x1x256xf32> to vector<1x256xf32>
    %131 = vector.broadcast %130 : vector<1x256xf32> to vector<8x256xf32>
    %132 = arith.mulf %128, %131 : vector<8x256xf32>
    %c0_84 = arith.constant 0 : index
    %c0_85 = arith.constant 0 : index
    %133 = vector.load %arg8[%c0_84, %c0_85] : memref<8x256xf32, #tpu.memory_space<vmem>>, vector<8x256xf32>
    %134 = vector.extract_strided_slice %3 {offsets = [0, 0, 0], sizes = [1, 8, 8], strides = [1, 1, 1]} : vector<9x8x8xf32> to vector<1x8x8xf32>
    %135 = vector.shape_cast %134 : vector<1x8x8xf32> to vector<8x8xf32>
    %cst_86 = arith.constant dense<0.000000e+00> : vector<8x256xf32>
    %136 = tpu.matmul %135, %132, %cst_86 {dimension_numbers = #tpu.dot_dimension_numbers<[1], [0], [0], [1], [0, 0, 1, 1], [], []>} : vector<8x8xf32>, vector<8x256xf32>, vector<8x256xf32> -> vector<8x256xf32>
    %137 = arith.addf %133, %136 : vector<8x256xf32>
    %c0_87 = arith.constant 0 : index
    %c0_88 = arith.constant 0 : index
    %138 = vector.load %arg8[%c0_87, %c0_88] : memref<8x256xf32, #tpu.memory_space<vmem>>, vector<8x256xf32>
    tpu.vector_store %arg8[%c0_87, %c0_88], %137 {strides = array<i32>} : memref<8x256xf32, #tpu.memory_space<vmem>>, vector<8x256xf32>,
    %c16_i32_89 = arith.constant 16 : i32
    %139 = tpu.dynamic_rotate %125 by %c16_i32_89 dim 1 : vector<8x256xf32>, i32 -> vector<8x256xf32>
    %140 = vector.extract_strided_slice %4 {offsets = [1, 0, 0], sizes = [1, 1, 256], strides = [1, 1, 1]} : vector<9x1x256xf32> to vector<1x1x256xf32>
    %141 = vector.shape_cast %140 : vector<1x1x256xf32> to vector<1x256xf32>
    %142 = vector.broadcast %141 : vector<1x256xf32> to vector<8x256xf32>
    %143 = arith.mulf %139, %142 : vector<8x256xf32>
    %c0_90 = arith.constant 0 : index
    %c0_91 = arith.constant 0 : index
    %144 = vector.load %arg8[%c0_90, %c0_91] : memref<8x256xf32, #tpu.memory_space<vmem>>, vector<8x256xf32>
    %145 = vector.extract_strided_slice %3 {offsets = [1, 0, 0], sizes = [1, 8, 8], strides = [1, 1, 1]} : vector<9x8x8xf32> to vector<1x8x8xf32>
    %146 = vector.shape_cast %145 : vector<1x8x8xf32> to vector<8x8xf32>
    %cst_92 = arith.constant dense<0.000000e+00> : vector<8x256xf32>
    %147 = tpu.matmul %146, %143, %cst_92 {dimension_numbers = #tpu.dot_dimension_numbers<[1], [0], [0], [1], [0, 0, 1, 1], [], []>} : vector<8x8xf32>, vector<8x256xf32>, vector<8x256xf32> -> vector<8x256xf32>
    %148 = arith.addf %144, %147 : vector<8x256xf32>
    %c0_93 = arith.constant 0 : index
    %c0_94 = arith.constant 0 : index
    %149 = vector.load %arg8[%c0_93, %c0_94] : memref<8x256xf32, #tpu.memory_space<vmem>>, vector<8x256xf32>
    tpu.vector_store %arg8[%c0_93, %c0_94], %148 {strides = array<i32>} : memref<8x256xf32, #tpu.memory_space<vmem>>, vector<8x256xf32>,
    %c15_i32_95 = arith.constant 15 : i32
    %150 = tpu.dynamic_rotate %125 by %c15_i32_95 dim 1 : vector<8x256xf32>, i32 -> vector<8x256xf32>
    %151 = vector.extract_strided_slice %4 {offsets = [2, 0, 0], sizes = [1, 1, 256], strides = [1, 1, 1]} : vector<9x1x256xf32> to vector<1x1x256xf32>
    %152 = vector.shape_cast %151 : vector<1x1x256xf32> to vector<1x256xf32>
    %153 = vector.broadcast %152 : vector<1x256xf32> to vector<8x256xf32>
    %154 = arith.mulf %150, %153 : vector<8x256xf32>
    %c0_96 = arith.constant 0 : index
    %c0_97 = arith.constant 0 : index
    %155 = vector.load %arg8[%c0_96, %c0_97] : memref<8x256xf32, #tpu.memory_space<vmem>>, vector<8x256xf32>
    %156 = vector.extract_strided_slice %3 {offsets = [2, 0, 0], sizes = [1, 8, 8], strides = [1, 1, 1]} : vector<9x8x8xf32> to vector<1x8x8xf32>
    %157 = vector.shape_cast %156 : vector<1x8x8xf32> to vector<8x8xf32>
    %cst_98 = arith.constant dense<0.000000e+00> : vector<8x256xf32>
    %158 = tpu.matmul %157, %154, %cst_98 {dimension_numbers = #tpu.dot_dimension_numbers<[1], [0], [0], [1], [0, 0, 1, 1], [], []>} : vector<8x8xf32>, vector<8x256xf32>, vector<8x256xf32> -> vector<8x256xf32>
    %159 = arith.addf %155, %158 : vector<8x256xf32>
    %c0_99 = arith.constant 0 : index
    %c0_100 = arith.constant 0 : index
    %160 = vector.load %arg8[%c0_99, %c0_100] : memref<8x256xf32, #tpu.memory_space<vmem>>, vector<8x256xf32>
    tpu.vector_store %arg8[%c0_99, %c0_100], %159 {strides = array<i32>} : memref<8x256xf32, #tpu.memory_space<vmem>>, vector<8x256xf32>,
    %c1_i32_101 = arith.constant 1 : i32
    %161 = tpu.dynamic_rotate %125 by %c1_i32_101 dim 1 : vector<8x256xf32>, i32 -> vector<8x256xf32>
    %162 = vector.extract_strided_slice %4 {offsets = [3, 0, 0], sizes = [1, 1, 256], strides = [1, 1, 1]} : vector<9x1x256xf32> to vector<1x1x256xf32>
    %163 = vector.shape_cast %162 : vector<1x1x256xf32> to vector<1x256xf32>
    %164 = vector.broadcast %163 : vector<1x256xf32> to vector<8x256xf32>
    %165 = arith.mulf %161, %164 : vector<8x256xf32>
    %c0_102 = arith.constant 0 : index
    %c0_103 = arith.constant 0 : index
    %166 = vector.load %arg8[%c0_102, %c0_103] : memref<8x256xf32, #tpu.memory_space<vmem>>, vector<8x256xf32>
    %167 = vector.extract_strided_slice %3 {offsets = [3, 0, 0], sizes = [1, 8, 8], strides = [1, 1, 1]} : vector<9x8x8xf32> to vector<1x8x8xf32>
    %168 = vector.shape_cast %167 : vector<1x8x8xf32> to vector<8x8xf32>
    %cst_104 = arith.constant dense<0.000000e+00> : vector<8x256xf32>
    %169 = tpu.matmul %168, %165, %cst_104 {dimension_numbers = #tpu.dot_dimension_numbers<[1], [0], [0], [1], [0, 0, 1, 1], [], []>} : vector<8x8xf32>, vector<8x256xf32>, vector<8x256xf32> -> vector<8x256xf32>
    %170 = arith.addf %166, %169 : vector<8x256xf32>
    %c0_105 = arith.constant 0 : index
    %c0_106 = arith.constant 0 : index
    %171 = vector.load %arg8[%c0_105, %c0_106] : memref<8x256xf32, #tpu.memory_space<vmem>>, vector<8x256xf32>
    tpu.vector_store %arg8[%c0_105, %c0_106], %170 {strides = array<i32>} : memref<8x256xf32, #tpu.memory_space<vmem>>, vector<8x256xf32>,
    %c0_107 = arith.constant 0 : index
    %c0_108 = arith.constant 0 : index
    %172 = vector.load %arg8[%c0_107, %c0_108] : memref<8x256xf32, #tpu.memory_space<vmem>>, vector<8x256xf32>
    %173 = vector.extract_strided_slice %3 {offsets = [4, 0, 0], sizes = [1, 8, 8], strides = [1, 1, 1]} : vector<9x8x8xf32> to vector<1x8x8xf32>
    %174 = vector.shape_cast %173 : vector<1x8x8xf32> to vector<8x8xf32>
    %cst_109 = arith.constant dense<0.000000e+00> : vector<8x256xf32>
    %175 = tpu.matmul %174, %125, %cst_109 {dimension_numbers = #tpu.dot_dimension_numbers<[1], [0], [0], [1], [0, 0, 1, 1], [], []>} : vector<8x8xf32>, vector<8x256xf32>, vector<8x256xf32> -> vector<8x256xf32>
    %176 = arith.addf %172, %175 : vector<8x256xf32>
    %c0_110 = arith.constant 0 : index
    %c0_111 = arith.constant 0 : index
    %177 = vector.load %arg8[%c0_110, %c0_111] : memref<8x256xf32, #tpu.memory_space<vmem>>, vector<8x256xf32>
    tpu.vector_store %arg8[%c0_110, %c0_111], %176 {strides = array<i32>} : memref<8x256xf32, #tpu.memory_space<vmem>>, vector<8x256xf32>,
    %c255_i32_112 = arith.constant 255 : i32
    %178 = tpu.dynamic_rotate %125 by %c255_i32_112 dim 1 : vector<8x256xf32>, i32 -> vector<8x256xf32>
    %179 = vector.extract_strided_slice %4 {offsets = [5, 0, 0], sizes = [1, 1, 256], strides = [1, 1, 1]} : vector<9x1x256xf32> to vector<1x1x256xf32>
    %180 = vector.shape_cast %179 : vector<1x1x256xf32> to vector<1x256xf32>
    %181 = vector.broadcast %180 : vector<1x256xf32> to vector<8x256xf32>
    %182 = arith.mulf %178, %181 : vector<8x256xf32>
    %c0_113 = arith.constant 0 : index
    %c0_114 = arith.constant 0 : index
    %183 = vector.load %arg8[%c0_113, %c0_114] : memref<8x256xf32, #tpu.memory_space<vmem>>, vector<8x256xf32>
    %184 = vector.extract_strided_slice %3 {offsets = [5, 0, 0], sizes = [1, 8, 8], strides = [1, 1, 1]} : vector<9x8x8xf32> to vector<1x8x8xf32>
    %185 = vector.shape_cast %184 : vector<1x8x8xf32> to vector<8x8xf32>
    %cst_115 = arith.constant dense<0.000000e+00> : vector<8x256xf32>
    %186 = tpu.matmul %185, %182, %cst_115 {dimension_numbers = #tpu.dot_dimension_numbers<[1], [0], [0], [1], [0, 0, 1, 1], [], []>} : vector<8x8xf32>, vector<8x256xf32>, vector<8x256xf32> -> vector<8x256xf32>
    %187 = arith.addf %183, %186 : vector<8x256xf32>
    %c0_116 = arith.constant 0 : index
    %c0_117 = arith.constant 0 : index
    %188 = vector.load %arg8[%c0_116, %c0_117] : memref<8x256xf32, #tpu.memory_space<vmem>>, vector<8x256xf32>
    tpu.vector_store %arg8[%c0_116, %c0_117], %187 {strides = array<i32>} : memref<8x256xf32, #tpu.memory_space<vmem>>, vector<8x256xf32>,
    %c241_i32_118 = arith.constant 241 : i32
    %189 = tpu.dynamic_rotate %125 by %c241_i32_118 dim 1 : vector<8x256xf32>, i32 -> vector<8x256xf32>
    %190 = vector.extract_strided_slice %4 {offsets = [6, 0, 0], sizes = [1, 1, 256], strides = [1, 1, 1]} : vector<9x1x256xf32> to vector<1x1x256xf32>
    %191 = vector.shape_cast %190 : vector<1x1x256xf32> to vector<1x256xf32>
    %192 = vector.broadcast %191 : vector<1x256xf32> to vector<8x256xf32>
    %193 = arith.mulf %189, %192 : vector<8x256xf32>
    %c0_119 = arith.constant 0 : index
    %c0_120 = arith.constant 0 : index
    %194 = vector.load %arg8[%c0_119, %c0_120] : memref<8x256xf32, #tpu.memory_space<vmem>>, vector<8x256xf32>
    %195 = vector.extract_strided_slice %3 {offsets = [6, 0, 0], sizes = [1, 8, 8], strides = [1, 1, 1]} : vector<9x8x8xf32> to vector<1x8x8xf32>
    %196 = vector.shape_cast %195 : vector<1x8x8xf32> to vector<8x8xf32>
    %cst_121 = arith.constant dense<0.000000e+00> : vector<8x256xf32>
    %197 = tpu.matmul %196, %193, %cst_121 {dimension_numbers = #tpu.dot_dimension_numbers<[1], [0], [0], [1], [0, 0, 1, 1], [], []>} : vector<8x8xf32>, vector<8x256xf32>, vector<8x256xf32> -> vector<8x256xf32>
    %198 = arith.addf %194, %197 : vector<8x256xf32>
    %c0_122 = arith.constant 0 : index
    %c0_123 = arith.constant 0 : index
    %199 = vector.load %arg8[%c0_122, %c0_123] : memref<8x256xf32, #tpu.memory_space<vmem>>, vector<8x256xf32>
    tpu.vector_store %arg8[%c0_122, %c0_123], %198 {strides = array<i32>} : memref<8x256xf32, #tpu.memory_space<vmem>>, vector<8x256xf32>,
    %c240_i32_124 = arith.constant 240 : i32
    %200 = tpu.dynamic_rotate %125 by %c240_i32_124 dim 1 : vector<8x256xf32>, i32 -> vector<8x256xf32>
    %201 = vector.extract_strided_slice %4 {offsets = [7, 0, 0], sizes = [1, 1, 256], strides = [1, 1, 1]} : vector<9x1x256xf32> to vector<1x1x256xf32>
    %202 = vector.shape_cast %201 : vector<1x1x256xf32> to vector<1x256xf32>
    %203 = vector.broadcast %202 : vector<1x256xf32> to vector<8x256xf32>
    %204 = arith.mulf %200, %203 : vector<8x256xf32>
    %c0_125 = arith.constant 0 : index
    %c0_126 = arith.constant 0 : index
    %205 = vector.load %arg8[%c0_125, %c0_126] : memref<8x256xf32, #tpu.memory_space<vmem>>, vector<8x256xf32>
    %206 = vector.extract_strided_slice %3 {offsets = [7, 0, 0], sizes = [1, 8, 8], strides = [1, 1, 1]} : vector<9x8x8xf32> to vector<1x8x8xf32>
    %207 = vector.shape_cast %206 : vector<1x8x8xf32> to vector<8x8xf32>
    %cst_127 = arith.constant dense<0.000000e+00> : vector<8x256xf32>
    %208 = tpu.matmul %207, %204, %cst_127 {dimension_numbers = #tpu.dot_dimension_numbers<[1], [0], [0], [1], [0, 0, 1, 1], [], []>} : vector<8x8xf32>, vector<8x256xf32>, vector<8x256xf32> -> vector<8x256xf32>
    %209 = arith.addf %205, %208 : vector<8x256xf32>
    %c0_128 = arith.constant 0 : index
    %c0_129 = arith.constant 0 : index
    %210 = vector.load %arg8[%c0_128, %c0_129] : memref<8x256xf32, #tpu.memory_space<vmem>>, vector<8x256xf32>
    tpu.vector_store %arg8[%c0_128, %c0_129], %209 {strides = array<i32>} : memref<8x256xf32, #tpu.memory_space<vmem>>, vector<8x256xf32>,
    %c239_i32_130 = arith.constant 239 : i32
    %211 = tpu.dynamic_rotate %125 by %c239_i32_130 dim 1 : vector<8x256xf32>, i32 -> vector<8x256xf32>
    %212 = vector.extract_strided_slice %4 {offsets = [8, 0, 0], sizes = [1, 1, 256], strides = [1, 1, 1]} : vector<9x1x256xf32> to vector<1x1x256xf32>
    %213 = vector.shape_cast %212 : vector<1x1x256xf32> to vector<1x256xf32>
    %214 = vector.broadcast %213 : vector<1x256xf32> to vector<8x256xf32>
    %215 = arith.mulf %211, %214 : vector<8x256xf32>
    %c0_131 = arith.constant 0 : index
    %c0_132 = arith.constant 0 : index
    %216 = vector.load %arg8[%c0_131, %c0_132] : memref<8x256xf32, #tpu.memory_space<vmem>>, vector<8x256xf32>
    %217 = vector.extract_strided_slice %3 {offsets = [8, 0, 0], sizes = [1, 8, 8], strides = [1, 1, 1]} : vector<9x8x8xf32> to vector<1x8x8xf32>
    %218 = vector.shape_cast %217 : vector<1x8x8xf32> to vector<8x8xf32>
    %cst_133 = arith.constant dense<0.000000e+00> : vector<8x256xf32>
    %219 = tpu.matmul %218, %215, %cst_133 {dimension_numbers = #tpu.dot_dimension_numbers<[1], [0], [0], [1], [0, 0, 1, 1], [], []>} : vector<8x8xf32>, vector<8x256xf32>, vector<8x256xf32> -> vector<8x256xf32>
    %220 = arith.addf %216, %219 : vector<8x256xf32>
    %c0_134 = arith.constant 0 : index
    %c0_135 = arith.constant 0 : index
    %221 = vector.load %arg8[%c0_134, %c0_135] : memref<8x256xf32, #tpu.memory_space<vmem>>, vector<8x256xf32>
    tpu.vector_store %arg8[%c0_134, %c0_135], %220 {strides = array<i32>} : memref<8x256xf32, #tpu.memory_space<vmem>>, vector<8x256xf32>,
    %c0_136 = arith.constant 0 : index
    %c0_137 = arith.constant 0 : index
    %222 = vector.load %arg8[%c0_136, %c0_137] : memref<8x256xf32, #tpu.memory_space<vmem>>, vector<8x256xf32>
    %c1_138 = arith.constant 1 : index
    %c0_139 = arith.constant 0 : index
    %c0_140 = arith.constant 0 : index
    %c0_141 = arith.constant 0 : index
    %223 = vector.load %arg5[%c1_138, %c0_139, %c0_140, %c0_141] : memref<2x1x8x256xf32, #tpu.memory_space<vmem>>, vector<1x1x8x256xf32>
    %224 = vector.shape_cast %223 : vector<1x1x8x256xf32> to vector<8x256xf32>
    %225 = vector.shape_cast %222 : vector<8x256xf32> to vector<1x1x8x256xf32>
    tpu.vector_store %arg5[%c1_138, %c0_139, %c0_140, %c0_141], %225 {strides = array<i32>} : memref<2x1x8x256xf32, #tpu.memory_space<vmem>>, vector<1x1x8x256xf32>,
    %c0_142 = arith.constant 0 : index
    %c0_143 = arith.constant 0 : index
    %c0_144 = arith.constant 0 : index
    %226 = vector.load %arg6[%c0_142, %c0_143, %c0_144] : memref<1x8x1xf32, #tpu.memory_space<vmem>>, vector<1x8x1xf32>
    %227 = vector.shape_cast %226 : vector<1x8x1xf32> to vector<8x1xf32>
    %cst_145 = arith.constant dense<0.000000e+00> : vector<8xf32>
    %228 = vector.multi_reduction <add>, %222, %cst_145 [1] : vector<8x256xf32> to vector<8xf32>
    %229 = vector.shape_cast %228 : vector<8xf32> to vector<8x1xf32>
    %230 = arith.addf %227, %229 : vector<8x1xf32>
    %c0_146 = arith.constant 0 : index
    %c0_147 = arith.constant 0 : index
    %c0_148 = arith.constant 0 : index
    %231 = vector.load %arg6[%c0_146, %c0_147, %c0_148] : memref<1x8x1xf32, #tpu.memory_space<vmem>>, vector<1x8x1xf32>
    %232 = vector.shape_cast %231 : vector<1x8x1xf32> to vector<8x1xf32>
    %233 = vector.shape_cast %230 : vector<8x1xf32> to vector<1x8x1xf32>
    tpu.vector_store %arg6[%c0_146, %c0_147, %c0_148], %233 {strides = array<i32>} : memref<1x8x1xf32, #tpu.memory_space<vmem>>, vector<1x8x1xf32>,
    %c0_149 = arith.constant 0 : index
    %c0_150 = arith.constant 0 : index
    %c0_151 = arith.constant 0 : index
    %234 = vector.load %arg7[%c0_149, %c0_150, %c0_151] : memref<1x8x1xf32, #tpu.memory_space<vmem>>, vector<1x8x1xf32>
    %235 = vector.shape_cast %234 : vector<1x8x1xf32> to vector<8x1xf32>
    %236 = arith.mulf %222, %222 : vector<8x256xf32>
    %cst_152 = arith.constant dense<0.000000e+00> : vector<8xf32>
    %237 = vector.multi_reduction <add>, %236, %cst_152 [1] : vector<8x256xf32> to vector<8xf32>
    %238 = vector.shape_cast %237 : vector<8xf32> to vector<8x1xf32>
    %239 = arith.addf %235, %238 : vector<8x1xf32>
    %c0_153 = arith.constant 0 : index
    %c0_154 = arith.constant 0 : index
    %c0_155 = arith.constant 0 : index
    %240 = vector.load %arg7[%c0_153, %c0_154, %c0_155] : memref<1x8x1xf32, #tpu.memory_space<vmem>>, vector<1x8x1xf32>
    %241 = vector.shape_cast %240 : vector<1x8x1xf32> to vector<8x1xf32>
    %242 = vector.shape_cast %239 : vector<8x1xf32> to vector<1x8x1xf32>
    tpu.vector_store %arg7[%c0_153, %c0_154, %c0_155], %242 {strides = array<i32>} : memref<1x8x1xf32, #tpu.memory_space<vmem>>, vector<1x8x1xf32>,
    return
  }
  func.func @transform_0(%arg0: i32, %arg1: i32) -> (i32, i32, i32, i32) {
    %c0_i32 = arith.constant 0 : i32
    %c0_i32_0 = arith.constant 0 : i32
    %c0_i32_1 = arith.constant 0 : i32
    return %arg1, %arg0, %c0_i32, %c0_i32_0 : i32, i32, i32, i32
  }
  func.func @transform_1(%arg0: i32, %arg1: i32) -> (i32, i32, i32) {
    %c0_i32 = arith.constant 0 : i32
    %c0_i32_0 = arith.constant 0 : i32
    %c0_i32_1 = arith.constant 0 : i32
    %c0_i32_2 = arith.constant 0 : i32
    return %c0_i32, %c0_i32_0, %c0_i32_1 : i32, i32, i32
  }
  func.func @transform_2(%arg0: i32, %arg1: i32) -> (i32, i32, i32) {
    %c0_i32 = arith.constant 0 : i32
    %c0_i32_0 = arith.constant 0 : i32
    %c0_i32_1 = arith.constant 0 : i32
    %c0_i32_2 = arith.constant 0 : i32
    return %c0_i32, %c0_i32_0, %c0_i32_1 : i32, i32, i32
  }
  func.func @transform_3(%arg0: i32, %arg1: i32) -> (i32, i32, i32, i32) {
    %c0_i32 = arith.constant 0 : i32
    %c0_i32_0 = arith.constant 0 : i32
    %c0_i32_1 = arith.constant 0 : i32
    return %arg1, %arg0, %c0_i32, %c0_i32_0 : i32, i32, i32, i32
  }
  func.func @transform_4(%arg0: i32, %arg1: i32) -> (i32, i32, i32) {
    %c0_i32 = arith.constant 0 : i32
    %c0_i32_0 = arith.constant 0 : i32
    %c0_i32_1 = arith.constant 0 : i32
    return %arg0, %c0_i32, %c0_i32_0 : i32, i32, i32
  }
  func.func @transform_5(%arg0: i32, %arg1: i32) -> (i32, i32, i32) {
    %c0_i32 = arith.constant 0 : i32
    %c0_i32_0 = arith.constant 0 : i32
    %c0_i32_1 = arith.constant 0 : i32
    return %arg0, %c0_i32, %c0_i32_0 : i32, i32, i32
  }
}

module attributes {stable_mosaic.version = 11 : i64} {
  func.func @_tab_lif_kernel(%arg0: i32, %arg1: i32, %arg2: i32, %arg3: memref<1x8x1xf32, #tpu.memory_space<vmem>>, %arg4: memref<1x8x1xf32, #tpu.memory_space<vmem>>, %arg5: memref<1x1x8x256xf32, #tpu.memory_space<vmem>>, %arg6: memref<1x1x8x256xf32, #tpu.memory_space<vmem>>, %arg7: memref<8x256xf32, #tpu.memory_space<vmem>>) attributes {dimension_semantics = [#tpu.dimension_semantics<parallel>, #tpu.dimension_semantics<parallel>, #tpu.dimension_semantics<arbitrary>], iteration_bounds = array<i64: 2, 1, 4>, scalar_prefetch = 0 : i64, scratch_operands = 1 : i64, tpu.core_type = #tpu.core_type<tc>, window_params = [{transform_indices = @transform_0, window_bounds = array<i64: 1, 8, 1>}, {transform_indices = @transform_1, window_bounds = array<i64: 1, 8, 1>}, {transform_indices = @transform_2, window_bounds = array<i64: 1, 1, 8, 256>}, {transform_indices = @transform_3, window_bounds = array<i64: 1, 1, 8, 256>}]} {
    %c0 = arith.constant 0 : index
    %c0_0 = arith.constant 0 : index
    %c0_1 = arith.constant 0 : index
    %c0_2 = arith.constant 0 : index
    %0 = vector.load %arg5[%c0, %c0_0, %c0_1, %c0_2] : memref<1x1x8x256xf32, #tpu.memory_space<vmem>>, vector<1x1x8x256xf32>
    %1 = vector.shape_cast %0 : vector<1x1x8x256xf32> to vector<8x256xf32>
    %c0_i32 = arith.constant 0 : i32
    %2 = arith.cmpi eq, %arg2, %c0_i32 : i32
    %3 = arith.extui %2 : i1 to i32
    %c0_i32_3 = arith.constant 0 : i32
    %4 = arith.cmpi ne, %3, %c0_i32_3 : i32
    scf.if %4 {
      %cst_20 = arith.constant 0.000000e+00 : f32
      %28 = vector.broadcast %cst_20 : f32 to vector<8x256xf32>
      %c0_21 = arith.constant 0 : index
      %c0_22 = arith.constant 0 : index
      %29 = vector.load %arg7[%c0_21, %c0_22] : memref<8x256xf32, #tpu.memory_space<vmem>>, vector<8x256xf32>
      tpu.vector_store %arg7[%c0_21, %c0_22], %28 {strides = array<i32>} : memref<8x256xf32, #tpu.memory_space<vmem>>, vector<8x256xf32>,
    } else {
    }
    %c0_4 = arith.constant 0 : index
    %c0_5 = arith.constant 0 : index
    %c0_6 = arith.constant 0 : index
    %5 = vector.load %arg3[%c0_4, %c0_5, %c0_6] : memref<1x8x1xf32, #tpu.memory_space<vmem>>, vector<1x8x1xf32>
    %6 = vector.shape_cast %5 : vector<1x8x1xf32> to vector<8x1xf32>
    %7 = vector.broadcast %6 : vector<8x1xf32> to vector<8x256xf32>
    %8 = arith.mulf %1, %7 : vector<8x256xf32>
    %c0_7 = arith.constant 0 : index
    %c0_8 = arith.constant 0 : index
    %c0_9 = arith.constant 0 : index
    %9 = vector.load %arg4[%c0_7, %c0_8, %c0_9] : memref<1x8x1xf32, #tpu.memory_space<vmem>>, vector<1x8x1xf32>
    %10 = vector.shape_cast %9 : vector<1x8x1xf32> to vector<8x1xf32>
    %11 = vector.broadcast %10 : vector<8x1xf32> to vector<8x256xf32>
    %12 = arith.addf %8, %11 : vector<8x256xf32>
    %c0_10 = arith.constant 0 : index
    %c0_11 = arith.constant 0 : index
    %13 = vector.load %arg7[%c0_10, %c0_11] : memref<8x256xf32, #tpu.memory_space<vmem>>, vector<8x256xf32>
    %cst = arith.constant 0.899999976 : f32
    %14 = vector.broadcast %cst : f32 to vector<8x256xf32>
    %15 = arith.mulf %14, %13 : vector<8x256xf32>
    %16 = arith.addf %15, %12 : vector<8x256xf32>
    %cst_12 = arith.constant 1.000000e+00 : f32
    %17 = vector.broadcast %cst_12 : f32 to vector<8x256xf32>
    %18 = arith.cmpf ogt, %16, %17 : vector<8x256xf32>
    %19 = arith.extui %18 : vector<8x256xi1> to vector<8x256xi32>
    %20 = arith.sitofp %19 : vector<8x256xi32> to vector<8x256xf32>
    %cst_13 = arith.constant 1.000000e+00 : f32
    %21 = vector.broadcast %cst_13 : f32 to vector<8x256xf32>
    %22 = arith.subf %21, %20 : vector<8x256xf32>
    %23 = arith.mulf %16, %22 : vector<8x256xf32>
    %c0_14 = arith.constant 0 : index
    %c0_15 = arith.constant 0 : index
    %24 = vector.load %arg7[%c0_14, %c0_15] : memref<8x256xf32, #tpu.memory_space<vmem>>, vector<8x256xf32>
    tpu.vector_store %arg7[%c0_14, %c0_15], %23 {strides = array<i32>} : memref<8x256xf32, #tpu.memory_space<vmem>>, vector<8x256xf32>,
    %c0_16 = arith.constant 0 : index
    %c0_17 = arith.constant 0 : index
    %c0_18 = arith.constant 0 : index
    %c0_19 = arith.constant 0 : index
    %25 = vector.load %arg6[%c0_16, %c0_17, %c0_18, %c0_19] : memref<1x1x8x256xf32, #tpu.memory_space<vmem>>, vector<1x1x8x256xf32>
    %26 = vector.shape_cast %25 : vector<1x1x8x256xf32> to vector<8x256xf32>
    %27 = vector.shape_cast %20 : vector<8x256xf32> to vector<1x1x8x256xf32>
    tpu.vector_store %arg6[%c0_16, %c0_17, %c0_18, %c0_19], %27 {strides = array<i32>} : memref<1x1x8x256xf32, #tpu.memory_space<vmem>>, vector<1x1x8x256xf32>,
    return
  }
  func.func @transform_0(%arg0: i32, %arg1: i32, %arg2: i32) -> (i32, i32, i32) {
    %c0_i32 = arith.constant 0 : i32
    %c0_i32_0 = arith.constant 0 : i32
    %c0_i32_1 = arith.constant 0 : i32
    return %arg2, %c0_i32, %c0_i32_0 : i32, i32, i32
  }
  func.func @transform_1(%arg0: i32, %arg1: i32, %arg2: i32) -> (i32, i32, i32) {
    %c0_i32 = arith.constant 0 : i32
    %c0_i32_0 = arith.constant 0 : i32
    %c0_i32_1 = arith.constant 0 : i32
    return %arg2, %c0_i32, %c0_i32_0 : i32, i32, i32
  }
  func.func @transform_2(%arg0: i32, %arg1: i32, %arg2: i32) -> (i32, i32, i32, i32) {
    %c0_i32 = arith.constant 0 : i32
    %c0_i32_0 = arith.constant 0 : i32
    return %arg0, %arg2, %c0_i32, %arg1 : i32, i32, i32, i32
  }
  func.func @transform_3(%arg0: i32, %arg1: i32, %arg2: i32) -> (i32, i32, i32, i32) {
    %c0_i32 = arith.constant 0 : i32
    %c0_i32_0 = arith.constant 0 : i32
    return %arg0, %arg2, %c0_i32, %arg1 : i32, i32, i32, i32
  }
}

module attributes {stable_mosaic.version = 11 : i64} {
  func.func @_tab_lif_res_kernel(%arg0: i32, %arg1: i32, %arg2: i32, %arg3: memref<1x8x1xf32, #tpu.memory_space<vmem>>, %arg4: memref<1x8x1xf32, #tpu.memory_space<vmem>>, %arg5: memref<1x1x8x256xf32, #tpu.memory_space<vmem>>, %arg6: memref<1x1x8x256xf32, #tpu.memory_space<vmem>>, %arg7: memref<1x1x8x256xf32, #tpu.memory_space<vmem>>, %arg8: memref<8x256xf32, #tpu.memory_space<vmem>>) attributes {dimension_semantics = [#tpu.dimension_semantics<parallel>, #tpu.dimension_semantics<parallel>, #tpu.dimension_semantics<arbitrary>], iteration_bounds = array<i64: 2, 1, 4>, scalar_prefetch = 0 : i64, scratch_operands = 1 : i64, tpu.core_type = #tpu.core_type<tc>, window_params = [{transform_indices = @transform_0, window_bounds = array<i64: 1, 8, 1>}, {transform_indices = @transform_1, window_bounds = array<i64: 1, 8, 1>}, {transform_indices = @transform_2, window_bounds = array<i64: 1, 1, 8, 256>}, {transform_indices = @transform_3, window_bounds = array<i64: 1, 1, 8, 256>}, {transform_indices = @transform_4, window_bounds = array<i64: 1, 1, 8, 256>}]} {
    %c0 = arith.constant 0 : index
    %c0_0 = arith.constant 0 : index
    %c0_1 = arith.constant 0 : index
    %c0_2 = arith.constant 0 : index
    %0 = vector.load %arg5[%c0, %c0_0, %c0_1, %c0_2] : memref<1x1x8x256xf32, #tpu.memory_space<vmem>>, vector<1x1x8x256xf32>
    %1 = vector.shape_cast %0 : vector<1x1x8x256xf32> to vector<8x256xf32>
    %c0_3 = arith.constant 0 : index
    %c0_4 = arith.constant 0 : index
    %c0_5 = arith.constant 0 : index
    %c0_6 = arith.constant 0 : index
    %2 = vector.load %arg6[%c0_3, %c0_4, %c0_5, %c0_6] : memref<1x1x8x256xf32, #tpu.memory_space<vmem>>, vector<1x1x8x256xf32>
    %3 = vector.shape_cast %2 : vector<1x1x8x256xf32> to vector<8x256xf32>
    %c0_i32 = arith.constant 0 : i32
    %4 = arith.cmpi eq, %arg2, %c0_i32 : i32
    %5 = arith.extui %4 : i1 to i32
    %c0_i32_7 = arith.constant 0 : i32
    %6 = arith.cmpi ne, %5, %c0_i32_7 : i32
    scf.if %6 {
      %cst_24 = arith.constant 0.000000e+00 : f32
      %31 = vector.broadcast %cst_24 : f32 to vector<8x256xf32>
      %c0_25 = arith.constant 0 : index
      %c0_26 = arith.constant 0 : index
      %32 = vector.load %arg8[%c0_25, %c0_26] : memref<8x256xf32, #tpu.memory_space<vmem>>, vector<8x256xf32>
      tpu.vector_store %arg8[%c0_25, %c0_26], %31 {strides = array<i32>} : memref<8x256xf32, #tpu.memory_space<vmem>>, vector<8x256xf32>,
    } else {
    }
    %c0_8 = arith.constant 0 : index
    %c0_9 = arith.constant 0 : index
    %c0_10 = arith.constant 0 : index
    %7 = vector.load %arg3[%c0_8, %c0_9, %c0_10] : memref<1x8x1xf32, #tpu.memory_space<vmem>>, vector<1x8x1xf32>
    %8 = vector.shape_cast %7 : vector<1x8x1xf32> to vector<8x1xf32>
    %9 = vector.broadcast %8 : vector<8x1xf32> to vector<8x256xf32>
    %10 = arith.mulf %1, %9 : vector<8x256xf32>
    %c0_11 = arith.constant 0 : index
    %c0_12 = arith.constant 0 : index
    %c0_13 = arith.constant 0 : index
    %11 = vector.load %arg4[%c0_11, %c0_12, %c0_13] : memref<1x8x1xf32, #tpu.memory_space<vmem>>, vector<1x8x1xf32>
    %12 = vector.shape_cast %11 : vector<1x8x1xf32> to vector<8x1xf32>
    %13 = vector.broadcast %12 : vector<8x1xf32> to vector<8x256xf32>
    %14 = arith.addf %10, %13 : vector<8x256xf32>
    %15 = arith.addf %14, %3 : vector<8x256xf32>
    %c0_14 = arith.constant 0 : index
    %c0_15 = arith.constant 0 : index
    %16 = vector.load %arg8[%c0_14, %c0_15] : memref<8x256xf32, #tpu.memory_space<vmem>>, vector<8x256xf32>
    %cst = arith.constant 0.899999976 : f32
    %17 = vector.broadcast %cst : f32 to vector<8x256xf32>
    %18 = arith.mulf %17, %16 : vector<8x256xf32>
    %19 = arith.addf %18, %15 : vector<8x256xf32>
    %cst_16 = arith.constant 1.000000e+00 : f32
    %20 = vector.broadcast %cst_16 : f32 to vector<8x256xf32>
    %21 = arith.cmpf ogt, %19, %20 : vector<8x256xf32>
    %22 = arith.extui %21 : vector<8x256xi1> to vector<8x256xi32>
    %23 = arith.sitofp %22 : vector<8x256xi32> to vector<8x256xf32>
    %cst_17 = arith.constant 1.000000e+00 : f32
    %24 = vector.broadcast %cst_17 : f32 to vector<8x256xf32>
    %25 = arith.subf %24, %23 : vector<8x256xf32>
    %26 = arith.mulf %19, %25 : vector<8x256xf32>
    %c0_18 = arith.constant 0 : index
    %c0_19 = arith.constant 0 : index
    %27 = vector.load %arg8[%c0_18, %c0_19] : memref<8x256xf32, #tpu.memory_space<vmem>>, vector<8x256xf32>
    tpu.vector_store %arg8[%c0_18, %c0_19], %26 {strides = array<i32>} : memref<8x256xf32, #tpu.memory_space<vmem>>, vector<8x256xf32>,
    %c0_20 = arith.constant 0 : index
    %c0_21 = arith.constant 0 : index
    %c0_22 = arith.constant 0 : index
    %c0_23 = arith.constant 0 : index
    %28 = vector.load %arg7[%c0_20, %c0_21, %c0_22, %c0_23] : memref<1x1x8x256xf32, #tpu.memory_space<vmem>>, vector<1x1x8x256xf32>
    %29 = vector.shape_cast %28 : vector<1x1x8x256xf32> to vector<8x256xf32>
    %30 = vector.shape_cast %23 : vector<8x256xf32> to vector<1x1x8x256xf32>
    tpu.vector_store %arg7[%c0_20, %c0_21, %c0_22, %c0_23], %30 {strides = array<i32>} : memref<1x1x8x256xf32, #tpu.memory_space<vmem>>, vector<1x1x8x256xf32>,
    return
  }
  func.func @transform_0(%arg0: i32, %arg1: i32, %arg2: i32) -> (i32, i32, i32) {
    %c0_i32 = arith.constant 0 : i32
    %c0_i32_0 = arith.constant 0 : i32
    %c0_i32_1 = arith.constant 0 : i32
    return %arg2, %c0_i32, %c0_i32_0 : i32, i32, i32
  }
  func.func @transform_1(%arg0: i32, %arg1: i32, %arg2: i32) -> (i32, i32, i32) {
    %c0_i32 = arith.constant 0 : i32
    %c0_i32_0 = arith.constant 0 : i32
    %c0_i32_1 = arith.constant 0 : i32
    return %arg2, %c0_i32, %c0_i32_0 : i32, i32, i32
  }
  func.func @transform_2(%arg0: i32, %arg1: i32, %arg2: i32) -> (i32, i32, i32, i32) {
    %c0_i32 = arith.constant 0 : i32
    %c0_i32_0 = arith.constant 0 : i32
    return %arg0, %arg2, %c0_i32, %arg1 : i32, i32, i32, i32
  }
  func.func @transform_3(%arg0: i32, %arg1: i32, %arg2: i32) -> (i32, i32, i32, i32) {
    %c0_i32 = arith.constant 0 : i32
    %c0_i32_0 = arith.constant 0 : i32
    return %arg0, %arg2, %c0_i32, %arg1 : i32, i32, i32, i32
  }
  func.func @transform_4(%arg0: i32, %arg1: i32, %arg2: i32) -> (i32, i32, i32, i32) {
    %c0_i32 = arith.constant 0 : i32
    %c0_i32_0 = arith.constant 0 : i32
    return %arg0, %arg2, %c0_i32, %arg1 : i32, i32, i32, i32
  }
}

</mosaic_0001>

<bundles_post_ra>
// kernel: integer_pow.2
= control target key start
LH: loop header
LB: loop body
LE: loop exit
PB: predicated region body
PF: predicated region fallthrough
CT: control target
= control target key end

     0   :  { %3 = vsyncpa [#allocation1], 0  ;;  %s172_s0 = inlined_call_operand.hbm [shape: f32[4], index: 0, kind: input, shape index: {}, may-alias: {0,1}]   ;;  %s173_s1 = inlined_call_operand.hbm [shape: f32[4], index: 1, kind: input, shape index: {}, may-alias: {0,1}]   ;;  %s174_s2 = inlined_call_operand.hbm [shape: f32[4], index: 2, kind: output, shape index: {}]  }
   0x1   :  { %4 = vsyncpa [#allocation4], 0 }
   0x2   :  { %5 = vsyncpa [#allocation2], 0  ;;  %s118_s9 = smov [#allocation0]   ;;  %s119_s11 = smov [#allocation3]  }
   0x3   :  { %s10_s10 = sshll.u32 %s118_s9, 4  ;;  %s18_s12 = sshll.u32 %s119_s11, 4  ;;  %s11_s10 = int_to_ptr.vmem [resolvable:$true] %s10_s10  ;;  %s19_s12 = int_to_ptr.vmem [resolvable:$true] %s18_s12 }
   0x4   :  { %s46_s15 = scalar_lea.hbm %s172_s0, 16 }
   0x5   :  { %p47_p0 = scmp.ne.s32.totalorder %s172_s0, %s46_s15  ;;  %p50_p1 = scmp.lt.u32.totalorder %s46_s15, %s172_s0 }
   0x7   :  { %p52_p2 = pnand %p50_p1, %p47_p0 }
   0x9   :  { %55 = shalt.err (!%p52_p2)
}
   0xa   :  { %s56_s20 = scalar_lea.vmem %s11_s10, 16  ;;  %s60_s21 = scalar_lea.vmem %s11_s10, 32 }
   0xb   :  { %p57_p3 = scmp.ne.s32.totalorder %s11_s10, %s56_s20  ;;  %p61_p4 = scmp.lt.s32.totalorder %s11_s10, %s11_s10 }
   0xc   :  { %p62_p5 = scmp.lt.s32.totalorder %s60_s21, %s56_s20 }
   0xe   :  { %p63_p6 = por %p62_p5, %p61_p4 }
  0x10   :  { %p64_p7 = pnand %p63_p6, %p57_p3 }
  0x12   :  { %67 = shalt.err (!%p64_p7)
}
  0x13   :  { %13 = dma.hbm_to_vmem [thread:$0]  %s172_s0, 16, %s11_s10, [#allocation1]  }
  0x14   :  { %s68_s25 = scalar_lea.hbm %s173_s1, 16 }
  0x15   :  { %p69_p8 = scmp.ne.s32.totalorder %s173_s1, %s68_s25  ;;  %p72_p9 = scmp.lt.u32.totalorder %s68_s25, %s173_s1 }
  0x17   :  { %p74_p10 = pnand %p72_p9, %p69_p8 }
  0x19   :  { %77 = shalt.err (!%p74_p10)
}
  0x1a   :  { %s78_s30 = scalar_lea.vmem %s19_s12, 16  ;;  %s82_s3 = scalar_lea.vmem %s19_s12, 32 }
  0x1b   :  { %p79_p11 = scmp.ne.s32.totalorder %s19_s12, %s78_s30  ;;  %p83_p12 = scmp.lt.s32.totalorder %s19_s12, %s19_s12 }
  0x1c   :  { %p84_p13 = scmp.lt.s32.totalorder %s82_s3, %s78_s30 }
  0x1e   :  { %p85_p0 = por %p84_p13, %p83_p12 }
  0x20   :  { %p86_p1 = pnand %p85_p0, %p79_p11 }
  0x22   :  { %89 = shalt.err (!%p86_p1)
}
  0x23   :  { %21 = dma.hbm_to_vmem [thread:$0]  %s173_s1, 16, %s19_s12, [#allocation4]  }
  0x24   :  { %112 = dma.done.wait [#allocation1], 16  }
  0x25   :  { %113 = vsyncadd [#allocation1], 4294967280 }
  0x26   :  { %114 = dma.done.wait [#allocation4], 16  }
  0x27   :  { %115 = vsyncadd [#allocation4], 4294967280  ;;  %s120_s1 = smov [#allocation5]   ;;  %v24_v0 = vld [vmem:[#allocation0] sm:$0x1] }
  0x28   :  { %s35_s6 = sshll.u32 %s120_s1, 4  ;;  %v25_v1 = vld [vmem:[#allocation3] sm:$0x1]  ;;  %s36_s6 = int_to_ptr.vmem [resolvable:$true] %s35_s6 }
  0x29   :  { %v28_v2 = vmul.f32 %v25_v1, %v24_v0  ;;  %s90_s7 = scalar_lea.vmem %s36_s6, 16  ;;  %s94_s8 = scalar_lea.vmem %s36_s6, 32 }
  0x2a   :  { %p91_p2 = scmp.ne.s32.totalorder %s36_s6, %s90_s7  ;;  %p95_p3 = scmp.lt.s32.totalorder %s36_s6, %s36_s6 }
  0x2b   :  { %30 = vst [vmem:[#allocation5] sm:$0x1] %v28_v2  ;;  %p96_p4 = scmp.lt.s32.totalorder %s94_s8, %s90_s7 }
  0x2d   :  { %p97_p5 = por %p96_p4, %p95_p3 }
  0x2f   :  { %p98_p6 = pnand %p97_p5, %p91_p2 }
  0x31   :  { %101 = shalt.err (!%p98_p6)
}
  0x32   :  { %s102_s11 = scalar_lea.hbm %s174_s2, 16 }
  0x33   :  { %p103_p7 = scmp.ne.s32.totalorder %s174_s2, %s102_s11  ;;  %p106_p8 = scmp.lt.u32.totalorder %s102_s11, %s174_s2 }
  0x35   :  { %p108_p9 = pnand %p106_p8, %p103_p7 }
  0x37   :  { %111 = shalt.err (!%p108_p9)
}
  0x38   :  { %38 = dma.vmem_to_hbm [thread:$0]  %s36_s6, 16, %s174_s2, [#allocation2]  }
  0x39   :  { %116 = dma.done.wait [#allocation2], 16  }
  0x3a   :  { %117 = vsyncadd [#allocation2], 4294967280 }
  0x3b   :  { %40 = vsyncpa [#allocation1], 1 }
  0x3c   :  { %41 = vsyncpa [#allocation4], 1 }
  0x3d   :  { %42 = vsyncpa [#allocation2], 1 }

// kernel: basic_block4snn_forward.5
= control target key start
LH: loop header
LB: loop body
LE: loop exit
PB: predicated region body
PF: predicated region fallthrough
CT: control target
= control target key end

     0   :  { %s1228_s0 = inlined_call_operand.hbm [shape: f32[4,8,1], index: 0, kind: input, shape index: {}]   ;;  %s1229_s1 = inlined_call_operand.hbm [shape: f32[4,8,1], index: 1, kind: input, shape index: {}]   ;;  %s1230_s2 = inlined_call_operand.hbm [shape: f32[2,4,8,256], index: 2, kind: input, shape index: {}]   ;;  %s1231_s3 = inlined_call_operand.hbm [shape: f32[2,4,8,256], index: 3, kind: output, shape index: {}]  }
   0x1   :  { %1246 = sst [smem:[#allocation19_spill]] %s1228_s0 }
   0x2   :  { %1247 = sst [smem:[#allocation20_spill]] %s1229_s1 }
   0x3   :  { %1248 = sst [smem:[#allocation21_spill]] %s1231_s3 }
   0x4   :  { %8 = vsyncpa [#allocation4], 0 }
   0x5   :  { %10 = vsyncpa [#allocation4 + $0x1], 0 }
   0x6   :  { %11 = vsyncpa [#allocation7], 0 }
   0x7   :  { %13 = vsyncpa [#allocation7 + $0x1], 0 }
   0x8   :  { %14 = vsyncpa [#allocation5], 0 }
   0x9   :  { %16 = vsyncpa [#allocation5 + $0x1], 0  ;;  %s882_s12 = smov 0   ;;  %s884_s13 = smov 0  }
   0xa   :  { %s886_s14 = smov 0   ;;  %s888_s15 = smov 0  }
   0xb   :  { %s890_s16 = smov 0   ;;  %s892_s17 = smov 0  }
   0xc   :  { %s894_s18 = smov 0   ;;  %s896_s19 = smov 0  }
   0xd   :  { %s898_s20 = smov 0   ;;  %s900_s21 = smov 0  }
   0xe   :  { %s902_s22 = smov 0  }
   0xf LB: > { %1249 = sst [smem:[#allocation14_spill]] %s813_s12  ;;  %s936_s23 = sadd.s32 4294967295, %s853_s22   ;;  %s853_s22 = sphi %s902_s22, %s22_s22   ;;  %s849_s21 = sphi %s900_s21, %s1290_s21   ;;  %s845_s20 = sphi %s898_s20, %s1289_s20   ;;  %s841_s19 = sphi %s896_s19, %s1288_s19   ;;  %s837_s18 = sphi %s894_s18, %s1287_s18   ;;  %s833_s17 = sphi %s892_s17, %s1280_s17   ;;  %s829_s16 = sphi %s890_s16, %s1286_s16   ;;  %s825_s15 = sphi %s888_s15, %s1285_s15   ;;  %s821_s14 = sphi %s886_s14, %s1284_s14   ;;  %s817_s13 = sphi %s884_s13, %s1283_s13   ;;  %s813_s12 = sphi %s882_s12, %s1282_s12  }
  0x10   : > { %1250 = sst [smem:[#allocation15_spill]] %s833_s17  ;;  %s34_s24 = sadd.s32 1, %s845_s20 }
  0x11   : > { %p939_p0 = scmp.ge.s32.totalorder %s34_s24, 4  ;;  %s48_s26 = sadd.s32 1, %s833_s17 }
  0x12   : > { %p55_p1 = scmp.ne.s32.totalorder %s833_s17, %s829_s16  ;;  %p1237_p2 = scmp.eq.s32.totalorder %s853_s22, 0 }
  0x13   : > { %s1251_s25 = scalar_select %p939_p0, 1, 0 }
  0x14   : > { %s1292_s24 = smov (%p939_p0, %s34_s24), 0  ;;  %p57_p3 = por %p1237_p2, %p55_p1 }
  0x15   : > { %1252 = sst [smem:[#allocation16_spill]] %s1292_s24  ;;  %p61_p4 = scmp.ne.s32.totalorder %s829_s16, %s825_s15 }
  0x16   : > { %s956_s27 = ssub.s32 %s845_s20, %s1292_s24  ;;  %p1236_p5 = scmp.eq.s32.totalorder %s936_s23, 0 }
  0x17   : > { %p46_p6 = scmp.eq.s32.totalorder %s956_s27, 0  ;;  %p1235_p8 = scmp.lt.s32.totalorder %s853_s22, 8 }
  0x18   : > { %p962_p7 = por %p1236_p5, %p61_p4  ;;  %s1232_s30 = sand.u32 1, %s833_s17  }
  0x19   : > { %s968_s29 = scalar_select %p46_p6, %s833_s17, %s48_s26  }
  0x1a   : > { %s1253_s28 = scalar_select %p962_p7, 1, 0 }
  0x1b   : > { %1254 = sst [smem:[#allocation17_spill]] %s968_s29  ;;  %s1233_s4 = sshll.u32 %s845_s20, 7 }
  0x1c   : > { %s974_s5 = sshll.u32 %s1232_s30, 3  ;;  %p978_p9 = pnand %p1235_p8, %p57_p3 }
  0x1d   : > { %s189_s7 = sand.u32 1, %s853_s22   ;;  %s1256_s1 = sld [smem:[#allocation20_spill]] }
  0x1e   : > { %s193_s11 = scalar_lea.vmem [#allocation6], %s974_s5  ;;  %s994_s26 = scalar_lea.sflag [#allocation7], %s189_s7 }
  0x1f   : > { %s200_s15 = sshll.u32 %s193_s11, 4  ;;  %p635_p12 = pneg %p978_p9  ;;  %s991_s15 = int_to_ptr.vmem [resolvable:$true] %s200_s15 }
  0x23   : > { %s988_s10 = scalar_lea.hbm %s1256_s1, %s1233_s4  ;;  %s638_s4 = scalar_lea.hbm %s1256_s1, 512 }
  0x24   : > { %s633_s30 = scalar_lea.hbm %s988_s10, 128  ;;  %p639_p3 = scmp.lt.u32.totalorder %s988_s10, %s1256_s1 }
  0x25   : > { %p634_p11 = scmp.ne.s32.totalorder %s988_s10, %s633_s30  ;;  %p640_p4 = scmp.lt.u32.totalorder %s638_s4, %s633_s30 }
  0x26   : > { %p642_p8 = scmp.lt.u32.totalorder %s633_s30, %s988_s10 }
  0x27   : > { %p636_p13 = pnand %p635_p12, %p634_p11  ;;  %p641_p6 = por %p640_p4, %p639_p3 }
  0x29   : > { %p637_p1 = pneg %p636_p13  ;;  %p643_p5 = por %p642_p8, %p641_p6 }
  0x2b   : > { %p644_p2 = pnand %p643_p5, %p637_p1 }
  0x2d   : > { %647 = shalt.err (!%p644_p2)
}
  0x2e   : > { %s648_s7 = scalar_lea.vmem %s991_s15, 128  ;;  %s855_s11 = smov [#allocation6]  }
  0x2f   : > { %p649_p11 = scmp.ne.s32.totalorder %s991_s15, %s648_s7  ;;  %s653_s8 = sshll.u32 %s855_s11, 4  ;;  %s654_s8 = int_to_ptr.vmem [resolvable:$false] %s653_s8 }
  0x30   : > { %s655_s24 = scalar_lea.vmem %s654_s8, 256  ;;  %p656_p7 = scmp.lt.s32.totalorder %s991_s15, %s654_s8 }
  0x31   : > { %p651_p13 = pnand %p649_p11, %p635_p12  ;;  %p657_p3 = scmp.lt.s32.totalorder %s655_s24, %s648_s7 }
  0x33   : > { %p652_p10 = pneg %p651_p13  ;;  %p658_p4 = por %p657_p3, %p656_p7 }
  0x35   : > { %p659_p8 = pnand %p658_p4, %p652_p10 }
  0x37   : > { %662 = shalt.err (!%p659_p8)
}
  0x38   : > { %531 = dma.hbm_to_vmem [thread:$0]  (!%p978_p9), %s988_s10, 128, %s991_s15, %s994_s26  }
  0x39   : > { %p228_p2 = scmp.lt.s32.totalorder %s853_s22, 9  ;;  %p1257_p5 = scmp.ge.s32.totalorder %s853_s22, 1 }
  0x3a   : > { %s1259_s30 = sshll.u32 %s845_s20, 7  ;;  %s1260_s0 = sld [smem:[#allocation19_spill]] }
  0x3b   : > { %p1025_p1 = pnand %p1257_p5, %p228_p2  ;;  %s175_s11 = scalar_lea.vmem [#allocation3], %s974_s5 }
  0x3c   : > { %s182_s8 = sshll.u32 %s175_s11, 4  ;;  %s1261_s10 = sand.u32 1, %s833_s17   ;;  %s183_s8 = int_to_ptr.vmem [resolvable:$true] %s182_s8 }
  0x3d   : > { %s1258_s29 = scalar_select %p1025_p1, 1, 0 }
  0x3e   : > { %s172_s15 = scalar_lea.sflag [#allocation4], %s1261_s10 }
  0x40   : > { %s1034_s7 = scalar_lea.hbm %s1260_s0, %s1259_s30  ;;  %s668_s30 = scalar_lea.hbm %s1260_s0, 512 }
  0x41   : > { %s663_s24 = scalar_lea.hbm %s1034_s7, 128  ;;  %p669_p11 = scmp.lt.u32.totalorder %s1034_s7, %s1260_s0 }
  0x42   : > { %p664_p7 = scmp.ne.s32.totalorder %s1034_s7, %s663_s24  ;;  %p670_p13 = scmp.lt.u32.totalorder %s668_s30, %s663_s24 }
  0x43   : > { %p672_p4 = scmp.lt.u32.totalorder %s663_s24, %s1034_s7 }
  0x44   : > { %p666_p10 = pnand %p664_p7, %p635_p12  ;;  %p671_p3 = por %p670_p13, %p669_p11 }
  0x46   : > { %p667_p6 = pneg %p666_p10  ;;  %p673_p8 = por %p672_p4, %p671_p3 }
  0x48   : > { %p674_p2 = pnand %p673_p8, %p667_p6 }
  0x4a   : > { %677 = shalt.err (!%p674_p2)
}
  0x4b   : > { %s678_s5 = scalar_lea.vmem %s183_s8, 128  ;;  %s856_s11 = smov [#allocation3]  }
  0x4c   : > { %p679_p5 = scmp.ne.s32.totalorder %s183_s8, %s678_s5  ;;  %s683_s1 = sshll.u32 %s856_s11, 4  ;;  %s684_s1 = int_to_ptr.vmem [resolvable:$false] %s683_s1 }
  0x4d   : > { %s685_s3 = scalar_lea.vmem %s684_s1, 256  ;;  %p686_p1 = scmp.lt.s32.totalorder %s183_s8, %s684_s1 }
  0x4e   : > { %p681_p7 = pnand %p679_p5, %p635_p12  ;;  %p687_p0 = scmp.lt.s32.totalorder %s685_s3, %s678_s5 }
  0x50   : > { %p682_p10 = pneg %p681_p7  ;;  %p688_p11 = por %p687_p0, %p686_p1 }
  0x52   : > { %p689_p13 = pnand %p688_p11, %p682_p10 }
  0x54   : > { %692 = shalt.err (!%p689_p13)
}
  0x55   : > { %528 = dma.hbm_to_vmem [thread:$0]  (!%p978_p9), %s1034_s7, 128, %s183_s8, %s172_s15  }
  0x56   : > { %s492_s10 = sadd.s32 4294967294, %s853_s22   ;;  %s41_s24 = sadd.s32 1, %s849_s21 }
  0x57   : > { %s104_s6 = sadd.s32 1, %s821_s14  ;;  %p1262_p0 = scmp.ne.s32.totalorder %s1251_s25, 0 }
  0x58   : > { %p111_p12 = scmp.ne.s32.totalorder %s821_s14, %s817_s13  ;;  %p117_p1 = scmp.ne.s32.totalorder %s817_s13, %s813_s12 }
  0x59   : > { %s1294_s24 = smov (!%p1262_p0, %s41_s24), %s849_s21  ;;  %p145_p3 = scmp.eq.s32.totalorder %s936_s23, 7 }
  0x5a   : > { %p43_p6 = scmp.ge.s32.totalorder %s1294_s24, 2  ;;  %p1263_p4 = scmp.eq.s32.totalorder %s853_s22, 0 }
  0x5b   : > { %p1265_p2 = scmp.eq.s32.totalorder %s936_s23, 0  ;;  %p1083_p5 = por %p145_p3, %p111_p12 }
  0x5c   : > { %p1071_p8 = por %p111_p12, %p1263_p4  ;;  %s1296_s24 = smov (%p43_p6, %s1294_s24), 0 }
  0x5d   : > { %p1077_p9 = por %p117_p1, %p1265_p2  ;;  %p151_p7 = scmp.eq.s32.totalorder %s492_s10, 7 }
  0x5e   : > { %s1267_s25 = scalar_select %p1083_p5, 1, 0 }
  0x5f   : > { %s97_s8 = ssub.s32 %s849_s21, %s1296_s24  ;;  %s209_s15 = sand.u32 1, %s821_s14  }
  0x60   : > { %1268 = sst [smem:[#allocation18_spill]] %s1267_s25  ;;  %s99_s4 = sor.u32 %s97_s8, %s956_s27 }
  0x61   : > { %p1091_p10 = por %p151_p7, %p117_p1  ;;  %p102_p11 = scmp.eq.s32.totalorder %s99_s4, 0 }
  0x62   : > { %s499_s5 = sshll.u32 %s209_s15, 4  ;;  %s500_s11 = sshll.u32 %s845_s20, 1 }
  0x63   : > { %s1269_s9 = scalar_select %p1091_p10, 1, 0 }
  0x64   : > { %s1097_s1 = scalar_select %p102_p11, %s821_s14, %s104_s6  }
  0x65   : > { %s501_s3 = sshll.u32 %s849_s21, 3  ;;  %s211_s0 = scalar_lea.vmem [#allocation8], %s499_s5 }
  0x66   : > { %s223_s17 = sshll.u32 %s211_s0, 4  ;;  %s219_s12 = sadd.s32 %s501_s3, %s500_s11  ;;  %s1100_s17 = int_to_ptr.vmem [resolvable:$true] %s223_s17 }
  0x67   : > { %s502_s25 = sshll.u32 %s219_s12, 7  ;;  %p1270_p13 = scmp.lt.s32.totalorder %s853_s22, 8 }
  0x68   : > { %s221_s6 = scalar_lea.hbm %s1230_s2, %s502_s25  ;;  %s698_s30 = scalar_lea.hbm %s1230_s2, 2048 }
  0x69   : > { %p1106_p0 = pnand %p1270_p13, %p1071_p8  ;;  %s693_s15 = scalar_lea.hbm %s221_s6, 256 }
  0x6a   : > { %p694_p12 = scmp.ne.s32.totalorder %s221_s6, %s693_s15  ;;  %p699_p4 = scmp.lt.u32.totalorder %s221_s6, %s1230_s2 }
  0x6b   : > { %p695_p1 = pneg %p1106_p0  ;;  %p700_p8 = scmp.lt.u32.totalorder %s698_s30, %s693_s15 }
  0x6c   : > { %p702_p7 = scmp.lt.u32.totalorder %s693_s15, %s221_s6 }
  0x6d   : > { %p696_p6 = pnand %p695_p1, %p694_p12  ;;  %p701_p2 = por %p700_p8, %p699_p4 }
  0x6f   : > { %p697_p3 = pneg %p696_p6  ;;  %p703_p11 = por %p702_p7, %p701_p2 }
  0x71   : > { %p704_p13 = pnand %p703_p11, %p697_p3 }
  0x73   : > { %707 = shalt.err (!%p704_p13)
}
  0x74   : > { %s708_s25 = scalar_lea.vmem %s1100_s17, 256  ;;  %s857_s11 = smov [#allocation8]  }
  0x75   : > { %p709_p12 = scmp.ne.s32.totalorder %s1100_s17, %s708_s25  ;;  %s713_s3 = sshll.u32 %s857_s11, 4  ;;  %s714_s3 = int_to_ptr.vmem [resolvable:$false] %s713_s3 }
  0x76   : > { %s715_s10 = scalar_lea.vmem %s714_s3, 512  ;;  %p716_p5 = scmp.lt.s32.totalorder %s1100_s17, %s714_s3 }
  0x77   : > { %p711_p6 = pnand %p709_p12, %p695_p1  ;;  %p717_p4 = scmp.lt.s32.totalorder %s715_s10, %s708_s25 }
  0x79   : > { %p712_p10 = pneg %p711_p6  ;;  %p718_p8 = por %p717_p4, %p716_p5 }
  0x7b   : > { %p719_p2 = pnand %p718_p8, %p712_p10 }
  0x7d   : > { %722 = shalt.err (!%p719_p2)
}
  0x7e   : > { %534 = dma.hbm_to_vmem [thread:$0]  (!%p1106_p0), %s221_s6, 256, %s1100_s17, %s994_s26  }
  0x7f   : > { %p1272_p3 = scmp.ne.s32.totalorder %s1258_s29, 0 }
  0x80   : > { %s234_s8 = sand.u32 (!%p1272_p3), 1, %s829_s16   ;;  %p1273_p1 = scmp.ne.s32.totalorder (!%p1272_p3), %s1253_s28, 0 }
  0x81   : > { %232 = sbr.rel (%p1272_p3) target bundleno = 309 (0x135), region = 32  ;;  %s504_s15 = sshll.u32 (!%p1272_p3), %s234_s8, 3 }
  0x82   : > { %s235_s0 = scalar_lea.sflag (!%p1272_p3), [#allocation4], %s234_s8  ;;  %s238_s12 = scalar_lea.vmem (!%p1272_p3), [#allocation3], %s504_s15 }
  0x88   : > { %796 = dma.done.wait (%p1273_p1), %s235_s0, 128  }
  0x89   : > { %798 = vsyncadd (%p1273_p1), %s235_s0, 4294967168  ;;  %s243_s27 = sand.u32 1, %s936_s23   ;;  %s247_s4 = scalar_lea.vmem [#allocation6], %s504_s15 }
  0x8a   : > { %s244_s30 = scalar_lea.sflag [#allocation7], %s243_s27 }
  0x8b   : > { %800 = dma.done.wait (%p1273_p1), %s244_s30, 128  }
  0x8c   : > { %802 = vsyncadd (%p1273_p1), %s244_s30, 4294967168  ;;  %s254_s17 = sand.u32 1, %s817_s13  }
  0x8d   : > { %s506_s26 = sshll.u32 %s254_s17, 4 }
  0x8e   : > { %s256_s29 = scalar_lea.vmem [#allocation8], %s506_s26 }
  0x8f   : > { %804 = dma.done.wait (%p1077_p9), %s244_s30, 256  }
  0x90   : > { %806 = vsyncadd (%p1077_p9), %s244_s30, 4294967040  ;;  %v291_v0 = vld [vmem:[%s256_s29] sm:$0xff]  ;;  %v292_v1 = vld [vmem:[%s256_s29 + $0x8] sm:$0xff]  ;;  %s1153_s23 = scalar_lea.vmem [#allocation9], %s506_s26  ;;  %p508_p5 = scmp.ne.s32.totalorder %s837_s18, 0 }
  0x91   : > { %v858_v2 = vmov (!%p508_p5), 0.0  }
  0x92   : > { %296 = sbr.rel (%p508_p5) target bundleno = 153 (0x99), region = 48  ;;  %297 = vst [vmem:[#allocation2] sm:$0xff] (!%p508_p5), %v858_v2  ;;  %298 = vst [vmem:[#allocation2 + $0x8] sm:$0xff] (!%p508_p5), %v858_v2 }
  0x99 PF: > { %v299_v3 = vld [vmem:[%s238_s12] sm:$0xff]  ;;  %v859_v4 = vmov 0   ;;  %v307_v5 = vld [vmem:[%s247_s4] sm:$0xff]  ;;  %s512_s28 = sshll.u32 %s837_s18, 1  ;;  %s513_s7 = sshll.u32 %s841_s19, 3  ;;  %v860_v18 = vmov 0.0  }
  0x9a   : > { %632 = vset.pattern.permute.xlu0 %v859_v4  ;;  %v315_v7 = vld [vmem:[#allocation2] sm:$0xff]  ;;  %v316_v8 = vld [vmem:[#allocation2 + $0x8] sm:$0xff]  ;;  %s350_s6 = sadd.s32 %s513_s7, %s512_s28  ;;  %s354_s25 = sshll.u32 %s1153_s23, 4  ;;  %s1164_s25 = int_to_ptr.vmem [resolvable:$true] %s354_s25 }
  0x9b   : > { %302 = vperm.xlu0 %632, %v299_v3   ;;  %v317_v11 = vmul.f32 0.9, %v315_v7  ;;  %v318_v12 = vmul.f32 0.9, %v316_v8  ;;  %s514_s5 = sshll.u32 %s350_s6, 7  ;;  %s1274_s11 = sld [smem:[#allocation18_spill]] }
  0x9c   : > { %s1275_s3 = sld [smem:[#allocation21_spill]]  ;;  %s336_s8 = scalar_lea.sflag [#allocation5], %s254_s17 }
  0x9d   : > { %s723_s15 = scalar_lea.vmem %s1164_s25, 256  ;;  %s861_s0 = smov [#allocation9]  }
  0x9e   : > { %p724_p9 = scmp.ne.s32.totalorder %s1164_s25, %s723_s15  ;;  %s727_s12 = sshll.u32 %s861_s0, 4  ;;  %s728_s12 = int_to_ptr.vmem [resolvable:$false] %s727_s12 }
  0x9f   : > { %310 = vperm.xlu0 %632, %v307_v5   ;;  %s729_s27 = scalar_lea.vmem %s728_s12, 512  ;;  %p730_p11 = scmp.lt.s32.totalorder %s1164_s25, %s728_s12 }
  0xa0   : > { %p731_p13 = scmp.lt.s32.totalorder %s729_s27, %s723_s15 }
  0xa1   : > { %p1276_p10 = scmp.ne.s32.totalorder %s1274_s11, 0 }
  0xa2   : > { %s1162_s10 = scalar_lea.hbm %s1275_s3, %s514_s5  ;;  %p732_p12 = por %p731_p13, %p730_p11 }
  0xa3   : > { %p725_p0 = pnand %p724_p9, %p1276_p10 }
  0xa5   : > { %p726_p7 = pneg %p725_p0 }
  0xa7   : > { %p733_p6 = pnand %p732_p12, %p726_p7 }
 0x11a   : > { %v303_v6 = vpop.permute.xlu0 %302 }
 0x11b   : > { %v305_v9 = vmul.f32 %v303_v6, %v291_v0  ;;  %v306_v10 = vmul.f32 %v303_v6, %v292_v1 }
 0x11e   : > { %v311_v13 = vpop.permute.xlu0 %310 }
 0x11f   : > { %v313_v14 = vadd.f32 %v311_v13, %v305_v9  ;;  %v314_v15 = vadd.f32 %v311_v13, %v306_v10 }
 0x121   : > { %v319_v16 = vadd.f32 %v317_v11, %v313_v14  ;;  %v320_v17 = vadd.f32 %v318_v12, %v314_v15 }
 0x123   : > { %vm321_vm0 = vcmp.gt.f32.partialorder %v319_v16, 1.0  ;;  %vm322_vm1 = vcmp.gt.f32.partialorder %v320_v17, 1.0 }
 0x124   : > { %v509_v19 = vsel %vm321_vm0, 1.0, %v860_v18  ;;  %v510_v20 = vsel %vm322_vm1, 1.0, %v860_v18 }
 0x125   : > { %v327_v21 = vsub.f32 1.0, %v509_v19  ;;  %v328_v22 = vsub.f32 1.0, %v510_v20  ;;  %333 = vst [vmem:[%s1153_s23] sm:$0xff] %v509_v19  ;;  %334 = vst [vmem:[%s1153_s23 + $0x8] sm:$0xff] %v510_v20 }
 0x126   : > { %736 = shalt.err (!%p733_p6)
}
 0x127   : > { %s737_s30 = scalar_lea.hbm %s1162_s10, 256  ;;  %s741_s26 = scalar_lea.hbm %s1275_s3, 2048 }
 0x128   : > { %p738_p4 = scmp.ne.s32.totalorder %s1162_s10, %s737_s30  ;;  %p742_p3 = scmp.lt.u32.totalorder %s1162_s10, %s1275_s3 }
 0x129   : > { %p743_p1 = scmp.lt.u32.totalorder %s741_s26, %s737_s30  ;;  %p745_p9 = scmp.lt.u32.totalorder %s737_s30, %s1162_s10 }
 0x12a   : > { %p739_p8 = pnand %p738_p4, %p1276_p10 }
 0x12b   : > { %p744_p5 = por %p743_p1, %p742_p3 }
 0x12c   : > { %p740_p2 = pneg %p739_p8 }
 0x12d   : > { %p746_p0 = por %p745_p9, %p744_p5 }
 0x12f   : > { %p747_p7 = pnand %p746_p0, %p740_p2 }
 0x131   : > { %750 = shalt.err (!%p747_p7)
}
 0x132   : > { %523 = dma.vmem_to_hbm [thread:$0]  (%p1276_p10), %s1164_s25, 256, %s1162_s10, %s336_s8   ;;  %v329_v23 = vmul.f32 %v327_v21, %v319_v16  ;;  %v330_v24 = vmul.f32 %v328_v22, %v320_v17 }
 0x134   : > { %331 = vst [vmem:[#allocation2] sm:$0xff] %v329_v23  ;;  %332 = vst [vmem:[#allocation2 + $0x8] sm:$0xff] %v330_v24 }
 0x135 PF: > { %s1277_s28 = sld [smem:[#allocation14_spill]]  ;;  %p540_p11 = scmp.ge.s32.totalorder %s853_s22, 2 }
 0x136   : > { %p1278_p13 = scmp.ne.s32.totalorder %s1269_s9, 0 }
 0x138   : > { %p536_p12 = pnand %p540_p11, %p1278_p13 }
 0x13b   : > { %s366_s7 = sand.u32 1, %s1277_s28  }
 0x13c   : > { %s367_s6 = scalar_lea.sflag [#allocation5], %s366_s7 }
 0x13d   : > { %808 = dma.done.wait (!%p536_p12), %s367_s6, 256  }
 0x13e   : > { %810 = vsyncadd (!%p536_p12), %s367_s6, 4294967040  ;;  %s22_s22 = sadd.s32 1, %s853_s22   ;;  %s1279_s5 = sld [smem:[#allocation15_spill]] }
 0x13f   : > { %p19_p6 = scmp.ge.s32.totalorder %s22_s22, 10   ;;  %s1280_s17 = sld [smem:[#allocation17_spill]] }
 0x140   : > { %s1281_s25 = sld [smem:[#allocation16_spill]]  ;;  %s1282_s12 = smov %s817_s13 }
 0x141   : > { %s1283_s13 = smov %s821_s14  ;;  %s1284_s14 = smov %s1097_s1 }
 0x142   : > { %s1285_s15 = smov %s829_s16  ;;  %s1287_s18 = smov %s845_s20 }
 0x143   : > { %s1288_s19 = smov %s849_s21  ;;  %s1290_s21 = smov %s1296_s24 }
 0x144   : > { %s1286_s16 = smov %s1279_s5  ;;  %21 = sbr.rel (!%p19_p6) target bundleno = 15 (0xf), region = 105 }
 0x146   : > { %s1289_s20 = smov %s1281_s25 }
 0x14b   :  { %372 = vsyncpa [#allocation4], 1 }
 0x14c   :  { %374 = vsyncpa [#allocation4 + $0x1], 1 }
 0x14d   :  { %375 = vsyncpa [#allocation7], 1 }
 0x14e   :  { %377 = vsyncpa [#allocation7 + $0x1], 1 }
 0x14f   :  { %378 = vsyncpa [#allocation5], 1 }
 0x150   :  { %380 = vsyncpa [#allocation5 + $0x1], 1 }

// kernel: basic_block4snn_forward.7
= control target key start
LH: loop header
LB: loop body
LE: loop exit
PB: predicated region body
PF: predicated region fallthrough
CT: control target
= control target key end

     0   :  { %s1438_s0 = inlined_call_operand.hbm [shape: f32[4,8,1], index: 0, kind: input, shape index: {}]   ;;  %s1439_s1 = inlined_call_operand.hbm [shape: f32[4,8,1], index: 1, kind: input, shape index: {}]   ;;  %s1440_s2 = inlined_call_operand.hbm [shape: f32[2,4,8,256], index: 2, kind: input, shape index: {}]   ;;  %s1441_s3 = inlined_call_operand.hbm [shape: f32[2,4,8,256], index: 3, kind: input, shape index: {}]   ;;  %s1442_s4 = inlined_call_operand.hbm [shape: f32[2,4,8,256], index: 4, kind: output, shape index: {}]  }
   0x1   :  { %1459 = sst [smem:[#allocation24_spill]] %s1438_s0 }
   0x2   :  { %1460 = sst [smem:[#allocation25_spill]] %s1439_s1 }
   0x3   :  { %1461 = sst [smem:[#allocation26_spill]] %s1442_s4 }
   0x4   :  { %9 = vsyncpa [#allocation4], 0 }
   0x5   :  { %11 = vsyncpa [#allocation4 + $0x1], 0 }
   0x6   :  { %12 = vsyncpa [#allocation7], 0 }
   0x7   :  { %14 = vsyncpa [#allocation7 + $0x1], 0 }
   0x8   :  { %15 = vsyncpa [#allocation10], 0 }
   0x9   :  { %17 = vsyncpa [#allocation10 + $0x1], 0 }
   0xa   :  { %18 = vsyncpa [#allocation5], 0 }
   0xb   :  { %20 = vsyncpa [#allocation5 + $0x1], 0  ;;  %s1038_s15 = smov 0   ;;  %s1040_s16 = smov 0  }
   0xc   :  { %s1042_s17 = smov 0   ;;  %s1044_s18 = smov 0  }
   0xd   :  { %s1046_s19 = smov 0   ;;  %s1048_s20 = smov 0  }
   0xe   :  { %s1050_s21 = smov 0   ;;  %s1052_s22 = smov 0  }
   0xf   :  { %s1054_s23 = smov 0   ;;  %s1056_s24 = smov 0  }
  0x10   :  { %s1058_s25 = smov 0  }
  0x11 LB: > { %1462 = sst [smem:[#allocation17_spill]] %s963_s15  ;;  %s1092_s26 = sadd.s32 4294967295, %s1003_s25   ;;  %s1003_s25 = sphi %s1058_s25, %s26_s25   ;;  %s999_s24 = sphi %s1056_s24, %s1510_s24   ;;  %s995_s23 = sphi %s1054_s23, %s1509_s23   ;;  %s991_s22 = sphi %s1052_s22, %s1508_s22   ;;  %s987_s21 = sphi %s1050_s21, %s1507_s21   ;;  %s983_s20 = sphi %s1048_s20, %s1506_s20   ;;  %s979_s19 = sphi %s1046_s19, %s1505_s19   ;;  %s975_s18 = sphi %s1044_s18, %s1504_s18   ;;  %s971_s17 = sphi %s1042_s17, %s1503_s17   ;;  %s967_s16 = sphi %s1040_s16, %s1502_s16   ;;  %s963_s15 = sphi %s1038_s15, %s1501_s15  }
  0x12   : > { %1463 = sst [smem:[#allocation18_spill]] %s991_s22  ;;  %s598_s27 = sadd.s32 4294967294, %s1003_s25  }
  0x13   : > { %1464 = sst [smem:[#allocation19_spill]] %s1003_s25  ;;  %s38_s28 = sadd.s32 1, %s995_s23 }
  0x14   : > { %s52_s29 = sadd.s32 1, %s983_s20  ;;  %p1097_p0 = scmp.ge.s32.totalorder %s38_s28, 4 }
  0x15   : > { %p59_p1 = scmp.ne.s32.totalorder %s983_s20, %s979_s19  ;;  %p60_p2 = scmp.eq.s32.totalorder %s1003_s25, 0 }
  0x16   : > { %s1465_s30 = scalar_select %p1097_p0, 1, 0 }
  0x17   : > { %p65_p3 = scmp.ne.s32.totalorder %s979_s19, %s975_s18  ;;  %s1512_s28 = smov (%p1097_p0, %s38_s28), 0 }
  0x18   : > { %1466 = sst [smem:[#allocation20_spill]] %s1512_s28  ;;  %p1109_p4 = por %p60_p2, %p59_p1 }
  0x19   : > { %p66_p5 = scmp.eq.s32.totalorder %s1092_s26, 0  ;;  %s1116_s6 = ssub.s32 %s995_s23, %s1512_s28 }
  0x1a   : > { %p50_p6 = scmp.eq.s32.totalorder %s1116_s6, 0  ;;  %p115_p8 = scmp.ne.s32.totalorder %s971_s17, %s967_s16 }
  0x1b   : > { %p1120_p7 = por %p66_p5, %p65_p3  ;;  %p121_p9 = scmp.ne.s32.totalorder %s967_s16, %s963_s15 }
  0x1c   : > { %s1129_s9 = scalar_select %p50_p6, %s983_s20, %s52_s29  }
  0x1d   : > { %s1468_s8 = scalar_select %p1120_p7, 1, 0 }
  0x1e   : > { %1469 = sst [smem:[#allocation21_spill]] %s1129_s9  ;;  %p1131_p10 = por %p115_p8, %p60_p2 }
  0x1f   : > { %p1135_p11 = por %p121_p9, %p66_p5  ;;  %p179_p12 = scmp.eq.s32.totalorder %s1092_s26, 7 }
  0x20   : > { %p185_p13 = scmp.eq.s32.totalorder %s598_s27, 7  ;;  %p655_p1 = scmp.lt.s32.totalorder %s1003_s25, 8 }
  0x21   : > { %s1471_s11 = scalar_select %p1135_p11, 1, 0 }
  0x22   : > { %p1141_p3 = por %p179_p12, %p115_p8  ;;  %p1145_p7 = por %p185_p13, %p121_p9 }
  0x23   : > { %s1446_s14 = sand.u32 1, %s983_s20   ;;  %s1451_s18 = sshll.u32 %s995_s23, 7 }
  0x24   : > { %s1472_s12 = scalar_select %p1141_p3, 1, 0 }
  0x25   : > { %s1474_s13 = scalar_select %p1145_p7, 1, 0 }
  0x26   : > { %1473 = sst [smem:[#allocation22_spill]] %s1472_s12  ;;  %s1153_s29 = sshll.u32 %s1446_s14, 3 }
  0x27   : > { %1475 = sst [smem:[#allocation23_spill]] %s1474_s13  ;;  %p1157_p2 = pnand %p655_p1, %p1109_p4 }
  0x28   : > { %s223_s27 = sand.u32 1, %s1003_s25   ;;  %s1477_s1 = sld [smem:[#allocation25_spill]] }
  0x29   : > { %s227_s14 = scalar_lea.vmem [#allocation6], %s1153_s29  ;;  %p1174_p4 = pnand %p655_p1, %p1131_p10 }
  0x2a   : > { %s234_s5 = sshll.u32 %s227_s14, 4  ;;  %s1178_s4 = scalar_lea.sflag [#allocation7], %s223_s27  ;;  %s1170_s5 = int_to_ptr.vmem [resolvable:$true] %s234_s5 }
  0x2b   : > { %s1478_s13 = scalar_select %p1174_p4, 1, 0 }
  0x2c   : > { %p751_p6 = pneg %p1157_p2 }
  0x2e   : > { %s1167_s15 = scalar_lea.hbm %s1477_s1, %s1451_s18  ;;  %s754_s14 = scalar_lea.hbm %s1477_s1, 512 }
  0x2f   : > { %s749_s12 = scalar_lea.hbm %s1167_s15, 128  ;;  %p755_p10 = scmp.lt.u32.totalorder %s1167_s15, %s1477_s1 }
  0x30   : > { %p750_p5 = scmp.ne.s32.totalorder %s1167_s15, %s749_s12  ;;  %p756_p12 = scmp.lt.u32.totalorder %s754_s14, %s749_s12 }
  0x31   : > { %p758_p1 = scmp.lt.u32.totalorder %s749_s12, %s1167_s15 }
  0x32   : > { %p752_p8 = pnand %p751_p6, %p750_p5  ;;  %p757_p13 = por %p756_p12, %p755_p10 }
  0x34   : > { %p753_p9 = pneg %p752_p8  ;;  %p759_p7 = por %p758_p1, %p757_p13 }
  0x36   : > { %p760_p3 = pnand %p759_p7, %p753_p9 }
  0x38   : > { %763 = shalt.err (!%p760_p3)
}
  0x39   : > { %s764_s27 = scalar_lea.vmem %s1170_s5, 128  ;;  %s1005_s28 = smov [#allocation6]  }
  0x3a   : > { %p765_p5 = scmp.ne.s32.totalorder %s1170_s5, %s764_s27  ;;  %s769_s9 = sshll.u32 %s1005_s28, 4  ;;  %s770_s9 = int_to_ptr.vmem [resolvable:$false] %s769_s9 }
  0x3b   : > { %s771_s18 = scalar_lea.vmem %s770_s9, 256  ;;  %p772_p4 = scmp.lt.s32.totalorder %s1170_s5, %s770_s9 }
  0x3c   : > { %p767_p8 = pnand %p765_p5, %p751_p6  ;;  %p773_p10 = scmp.lt.s32.totalorder %s771_s18, %s764_s27 }
  0x3e   : > { %p768_p11 = pneg %p767_p8  ;;  %p774_p12 = por %p773_p10, %p772_p4 }
  0x40   : > { %p775_p13 = pnand %p774_p12, %p768_p11 }
  0x42   : > { %778 = shalt.err (!%p775_p13)
}
  0x43   : > { %644 = dma.hbm_to_vmem [thread:$0]  (!%p1157_p2), %s1167_s15, 128, %s1170_s5, %s1178_s4  }
  0x44   : > { %p613_p7 = scmp.ge.s32.totalorder %s1003_s25, 1  ;;  %p285_p3 = scmp.lt.s32.totalorder %s1003_s25, 9 }
  0x45   : > { %s1480_s14 = sshll.u32 %s995_s23, 7  ;;  %s1481_s0 = sld [smem:[#allocation24_spill]] }
  0x46   : > { %p1208_p9 = pnand %p613_p7, %p285_p3  ;;  %s209_s9 = scalar_lea.vmem [#allocation3], %s1153_s29 }
  0x47   : > { %s216_s18 = sshll.u32 %s209_s9, 4  ;;  %s1482_s15 = sand.u32 1, %s983_s20   ;;  %s217_s18 = int_to_ptr.vmem [resolvable:$true] %s216_s18 }
  0x48   : > { %s1479_s12 = scalar_select %p1208_p9, 1, 0 }
  0x49   : > { %s206_s5 = scalar_lea.sflag [#allocation4], %s1482_s15 }
  0x4b   : > { %s1217_s28 = scalar_lea.hbm %s1481_s0, %s1480_s14  ;;  %s784_s14 = scalar_lea.hbm %s1481_s0, 512 }
  0x4c   : > { %s779_s1 = scalar_lea.hbm %s1217_s28, 128  ;;  %p785_p5 = scmp.lt.u32.totalorder %s1217_s28, %s1481_s0 }
  0x4d   : > { %p780_p11 = scmp.ne.s32.totalorder %s1217_s28, %s779_s1  ;;  %p786_p8 = scmp.lt.u32.totalorder %s784_s14, %s779_s1 }
  0x4e   : > { %p788_p12 = scmp.lt.u32.totalorder %s779_s1, %s1217_s28 }
  0x4f   : > { %p782_p4 = pnand %p780_p11, %p751_p6  ;;  %p787_p10 = por %p786_p8, %p785_p5 }
  0x51   : > { %p783_p1 = pneg %p782_p4  ;;  %p789_p13 = por %p788_p12, %p787_p10 }
  0x53   : > { %p790_p7 = pnand %p789_p13, %p783_p1 }
  0x55   : > { %793 = shalt.err (!%p790_p7)
}
  0x56   : > { %s794_s29 = scalar_lea.vmem %s217_s18, 128  ;;  %s1006_s9 = smov [#allocation3]  }
  0x57   : > { %p795_p3 = scmp.ne.s32.totalorder %s217_s18, %s794_s29  ;;  %s799_s22 = sshll.u32 %s1006_s9, 4  ;;  %s800_s22 = int_to_ptr.vmem [resolvable:$false] %s799_s22 }
  0x58   : > { %s801_s25 = scalar_lea.vmem %s800_s22, 256  ;;  %p802_p9 = scmp.lt.s32.totalorder %s217_s18, %s800_s22 }
  0x59   : > { %p797_p11 = pnand %p795_p3, %p751_p6  ;;  %p803_p0 = scmp.lt.s32.totalorder %s801_s25, %s794_s29 }
  0x5b   : > { %p798_p4 = pneg %p797_p11  ;;  %p804_p5 = por %p803_p0, %p802_p9 }
  0x5d   : > { %p805_p8 = pnand %p804_p5, %p798_p4 }
  0x5f   : > { %808 = shalt.err (!%p805_p8)
}
  0x60   : > { %641 = dma.hbm_to_vmem [thread:$0]  (!%p1157_p2), %s1217_s28, 128, %s217_s18, %s206_s5  }
  0x61   : > { %s1458_s1 = sand.u32 1, %s971_s17   ;;  %s45_s15 = sadd.s32 1, %s999_s24 }
  0x62   : > { %s1245_s14 = sshll.u32 %s1458_s1, 4  ;;  %p1483_p0 = scmp.ne.s32.totalorder %s1465_s30, 0 }
  0x63   : > { %s606_s7 = sshll.u32 %s995_s23, 1  ;;  %s607_s10 = sshll.u32 %s999_s24, 3 }
  0x64   : > { %s1514_s15 = smov (!%p1483_p0, %s45_s15), %s999_s24  ;;  %s1252_s27 = sadd.s32 %s607_s10, %s606_s7 }
  0x65   : > { %p47_p6 = scmp.ge.s32.totalorder %s1514_s15, 2  ;;  %s245_s29 = scalar_lea.vmem [#allocation8], %s1245_s14 }
  0x66   : > { %s257_s28 = sshll.u32 %s245_s29, 4  ;;  %s608_s18 = sshll.u32 %s1252_s27, 7  ;;  %s1258_s28 = int_to_ptr.vmem [resolvable:$true] %s257_s28 }
  0x67   : > { %s1516_s15 = smov (%p47_p6, %s1514_s15), 0  ;;  %s1267_s22 = scalar_lea.hbm %s1440_s2, %s608_s18 }
  0x68   : > { %s101_s30 = ssub.s32 %s999_s24, %s1516_s15  ;;  %s809_s7 = scalar_lea.hbm %s1267_s22, 256 }
  0x69   : > { %s1270_s25 = sor.u32 %s101_s30, %s1116_s6  ;;  %p810_p9 = scmp.ne.s32.totalorder %s1267_s22, %s809_s7 }
  0x6a   : > { %p106_p2 = scmp.eq.s32.totalorder %s1270_s25, 0  ;;  %p1484_p1 = scmp.ne.s32.totalorder %s1478_s13, 0 }
  0x6b   : > { %s814_s5 = scalar_lea.hbm %s1440_s2, 2048  ;;  %p815_p7 = scmp.lt.u32.totalorder %s1267_s22, %s1440_s2 }
  0x6c   : > { %p811_p10 = pneg %p1484_p1  ;;  %p816_p3 = scmp.lt.u32.totalorder %s814_s5, %s809_s7 }
  0x6d   : > { %p818_p4 = scmp.lt.u32.totalorder %s809_s7, %s1267_s22 }
  0x6e   : > { %p812_p12 = pnand %p811_p10, %p810_p9  ;;  %p817_p11 = por %p816_p3, %p815_p7 }
  0x70   : > { %p813_p13 = pneg %p812_p12  ;;  %p819_p5 = por %p818_p4, %p817_p11 }
  0x72   : > { %p820_p8 = pnand %p819_p5, %p813_p13 }
  0x74   : > { %823 = shalt.err (!%p820_p8)
}
  0x75   : > { %s824_s6 = scalar_lea.vmem %s1258_s28, 256  ;;  %s1007_s30 = smov [#allocation8]  }
  0x76   : > { %p825_p0 = scmp.ne.s32.totalorder %s1258_s28, %s824_s6  ;;  %s829_s10 = sshll.u32 %s1007_s30, 4  ;;  %s830_s10 = int_to_ptr.vmem [resolvable:$false] %s829_s10 }
  0x77   : > { %s831_s1 = scalar_lea.vmem %s830_s10, 512  ;;  %p832_p12 = scmp.lt.s32.totalorder %s1258_s28, %s830_s10 }
  0x78   : > { %p827_p6 = pnand %p825_p0, %p811_p10  ;;  %p833_p7 = scmp.lt.s32.totalorder %s831_s1, %s824_s6 }
  0x7a   : > { %p828_p9 = pneg %p827_p6  ;;  %p834_p3 = por %p833_p7, %p832_p12 }
  0x7c   : > { %p835_p11 = pnand %p834_p3, %p828_p9 }
  0x7e   : > { %838 = shalt.err (!%p835_p11)
}
  0x7f   : > { %647 = dma.hbm_to_vmem [thread:$0]  (!%p1484_p1), %s1267_s22, 256, %s1258_s28, %s1178_s4  }
  0x80   : > { %s1485_s7 = sadd.s32 1, %s971_s17  ;;  %s1311_s6 = scalar_lea.hbm %s1441_s3, %s608_s18 }
  0x81   : > { %s1304_s29 = scalar_select %p106_p2, %s971_s17, %s1485_s7  }
  0x82   : > { %s268_s30 = scalar_lea.vmem [#allocation9], %s1245_s14  ;;  %s1486_s1 = sand.u32 1, %s971_s17  }
  0x83   : > { %s280_s10 = sshll.u32 %s268_s30, 4  ;;  %s265_s0 = scalar_lea.sflag [#allocation10], %s1486_s1  ;;  %s281_s10 = int_to_ptr.vmem [resolvable:$true] %s280_s10 }
  0x84   : > { %s839_s4 = scalar_lea.hbm %s1311_s6, 256  ;;  %s844_s18 = scalar_lea.hbm %s1441_s3, 2048 }
  0x85   : > { %p840_p13 = scmp.ne.s32.totalorder %s1311_s6, %s839_s4  ;;  %p845_p5 = scmp.lt.u32.totalorder %s1311_s6, %s1441_s3 }
  0x86   : > { %p846_p8 = scmp.lt.u32.totalorder %s844_s18, %s839_s4  ;;  %p848_p6 = scmp.lt.u32.totalorder %s839_s4, %s1311_s6 }
  0x87   : > { %p842_p2 = pnand %p840_p13, %p811_p10 }
  0x88   : > { %p847_p0 = por %p846_p8, %p845_p5 }
  0x89   : > { %p843_p4 = pneg %p842_p2 }
  0x8a   : > { %p849_p9 = por %p848_p6, %p847_p0 }
  0x8c   : > { %p850_p12 = pnand %p849_p9, %p843_p4 }
  0x8e   : > { %853 = shalt.err (!%p850_p12)
}
  0x8f   : > { %s854_s14 = scalar_lea.vmem %s281_s10, 256  ;;  %s1008_s7 = smov [#allocation9]  }
  0x90   : > { %p855_p7 = scmp.ne.s32.totalorder %s281_s10, %s854_s14  ;;  %s859_s5 = sshll.u32 %s1008_s7, 4  ;;  %s860_s5 = int_to_ptr.vmem [resolvable:$false] %s859_s5 }
  0x91   : > { %s861_s9 = scalar_lea.vmem %s860_s5, 512  ;;  %p862_p13 = scmp.lt.s32.totalorder %s281_s10, %s860_s5 }
  0x92   : > { %p857_p3 = pnand %p855_p7, %p811_p10  ;;  %p863_p2 = scmp.lt.s32.totalorder %s861_s9, %s854_s14 }
  0x94   : > { %p858_p11 = pneg %p857_p3  ;;  %p864_p5 = por %p863_p2, %p862_p13 }
  0x96   : > { %p865_p8 = pnand %p864_p5, %p858_p11 }
  0x98   : > { %868 = shalt.err (!%p865_p8)
}
  0x99   : > { %650 = dma.hbm_to_vmem [thread:$0]  (!%p1484_p1), %s1311_s6, 256, %s281_s10, %s265_s0  }
  0x9a   : > { %p1487_p4 = scmp.ne.s32.totalorder %s1479_s12, 0 }
  0x9b   : > { %s291_s30 = sand.u32 (!%p1487_p4), 1, %s979_s19   ;;  %p1488_p10 = scmp.ne.s32.totalorder (!%p1487_p4), %s1468_s8, 0 }
  0x9c   : > { %289 = sbr.rel (%p1487_p4) target bundleno = 340 (0x154), region = 36  ;;  %s1338_s1 = sshll.u32 (!%p1487_p4), %s291_s30, 3 }
  0x9d   : > { %s292_s4 = scalar_lea.sflag (!%p1487_p4), [#allocation4], %s291_s30  ;;  %s295_s27 = scalar_lea.vmem (!%p1487_p4), [#allocation3], %s1338_s1 }
  0xa3   : > { %942 = dma.done.wait (%p1488_p10), %s292_s4, 128  }
  0xa4   : > { %944 = vsyncadd (%p1488_p10), %s292_s4, 4294967168  ;;  %s300_s0 = sand.u32 1, %s1092_s26   ;;  %s304_s12 = scalar_lea.vmem [#allocation6], %s1338_s1 }
  0xa5   : > { %s301_s13 = scalar_lea.sflag [#allocation7], %s300_s0 }
  0xa6   : > { %946 = dma.done.wait (%p1488_p10), %s301_s13, 128  }
  0xa7   : > { %948 = vsyncadd (%p1488_p10), %s301_s13, 4294967168  ;;  %s1352_s6 = sand.u32 1, %s967_s16   ;;  %p1489_p1 = scmp.ne.s32.totalorder %s1471_s11, 0 }
  0xa8   : > { %s616_s10 = sshll.u32 %s1352_s6, 4 }
  0xa9   : > { %s313_s28 = scalar_lea.vmem [#allocation8], %s616_s10 }
  0xaa   : > { %950 = dma.done.wait (%p1489_p1), %s301_s13, 256  }
  0xab   : > { %952 = vsyncadd (%p1489_p1), %s301_s13, 4294967040  ;;  %s319_s26 = scalar_lea.sflag [#allocation10], %s1352_s6  ;;  %s322_s18 = scalar_lea.vmem [#allocation9], %s616_s10 }
  0xac   : > { %954 = dma.done.wait (%p1489_p1), %s319_s26, 256  }
  0xad   : > { %956 = vsyncadd (%p1489_p1), %s319_s26, 4294967040  ;;  %v365_v0 = vld [vmem:[%s313_s28] sm:$0xff]  ;;  %v366_v1 = vld [vmem:[%s313_s28 + $0x8] sm:$0xff]  ;;  %s1364_s8 = scalar_lea.vmem [#allocation11], %s616_s10  ;;  %p619_p0 = scmp.ne.s32.totalorder %s987_s21, 0 }
  0xae   : > { %v367_v2 = vld [vmem:[%s322_s18] sm:$0xff]  ;;  %v368_v3 = vld [vmem:[%s322_s18 + $0x8] sm:$0xff]  ;;  %v1009_v4 = vmov (!%p619_p0), 0.0  }
  0xaf   : > { %372 = sbr.rel (%p619_p0) target bundleno = 182 (0xb6), region = 56  ;;  %373 = vst [vmem:[#allocation2] sm:$0xff] (!%p619_p0), %v1009_v4  ;;  %374 = vst [vmem:[#allocation2 + $0x8] sm:$0xff] (!%p619_p0), %v1009_v4 }
  0xb6 PF: > { %v375_v5 = vld [vmem:[%s295_s27] sm:$0xff]  ;;  %s1490_s22 = sld [smem:[#allocation18_spill]]  ;;  %v1010_v6 = vmov 0   ;;  %v383_v7 = vld [vmem:[%s304_s12] sm:$0xff]  ;;  %s623_s11 = sshll.u32 %s987_s21, 1  ;;  %v1011_v22 = vmov 0.0  }
  0xb7   : > { %748 = vset.pattern.permute.xlu0 %v1010_v6  ;;  %v393_v9 = vld [vmem:[#allocation2] sm:$0xff]  ;;  %v394_v10 = vld [vmem:[#allocation2 + $0x8] sm:$0xff]  ;;  %s432_s5 = sshll.u32 %s1364_s8, 4  ;;  %s1491_s9 = sld [smem:[#allocation22_spill]]  ;;  %s1375_s5 = int_to_ptr.vmem [resolvable:$true] %s432_s5 }
  0xb8   : > { %378 = vperm.xlu0 %748, %v375_v5   ;;  %v395_v14 = vmul.f32 0.9, %v393_v9  ;;  %v396_v15 = vmul.f32 0.9, %v394_v10  ;;  %s1492_s1 = sld [smem:[#allocation26_spill]]  ;;  %s414_s27 = scalar_lea.sflag [#allocation5], %s1352_s6 }
  0xb9   : > { %s869_s0 = scalar_lea.vmem %s1375_s5, 256  ;;  %s1012_s13 = smov [#allocation11]  }
  0xba   : > { %p870_p6 = scmp.ne.s32.totalorder %s1375_s5, %s869_s0  ;;  %s873_s12 = sshll.u32 %s1012_s13, 4  ;;  %s874_s12 = int_to_ptr.vmem [resolvable:$false] %s873_s12 }
  0xbb   : > { %s875_s10 = scalar_lea.vmem %s874_s12, 512  ;;  %p876_p3 = scmp.lt.s32.totalorder %s1375_s5, %s874_s12 }
  0xbc   : > { %386 = vperm.xlu0 %748, %v383_v7   ;;  %s624_s25 = sshll.u32 %s1490_s22, 3  ;;  %p877_p11 = scmp.lt.s32.totalorder %s875_s10, %s869_s0 }
  0xbd   : > { %s428_s14 = sadd.s32 %s624_s25, %s623_s11  ;;  %p1493_p9 = scmp.ne.s32.totalorder %s1491_s9, 0 }
  0xbe   : > { %s625_s7 = sshll.u32 %s428_s14, 7  ;;  %p878_p13 = por %p877_p11, %p876_p3 }
  0xbf   : > { %s1373_s4 = scalar_lea.hbm %s1492_s1, %s625_s7  ;;  %p871_p12 = pnand %p870_p6, %p1493_p9 }
  0xc1   : > { %p872_p7 = pneg %p871_p12 }
  0xc3   : > { %p879_p2 = pnand %p878_p13, %p872_p7 }
 0x137   : > { %v379_v8 = vpop.permute.xlu0 %378 }
 0x138   : > { %v381_v11 = vmul.f32 %v379_v8, %v365_v0  ;;  %v382_v12 = vmul.f32 %v379_v8, %v366_v1 }
 0x13b   : > { %v387_v13 = vpop.permute.xlu0 %386 }
 0x13c   : > { %v389_v16 = vadd.f32 %v387_v13, %v381_v11  ;;  %v390_v17 = vadd.f32 %v387_v13, %v382_v12 }
 0x13e   : > { %v391_v18 = vadd.f32 %v389_v16, %v367_v2  ;;  %v392_v19 = vadd.f32 %v390_v17, %v368_v3 }
 0x140   : > { %v397_v20 = vadd.f32 %v395_v14, %v391_v18  ;;  %v398_v21 = vadd.f32 %v396_v15, %v392_v19 }
 0x142   : > { %vm399_vm0 = vcmp.gt.f32.partialorder %v397_v20, 1.0  ;;  %vm400_vm1 = vcmp.gt.f32.partialorder %v398_v21, 1.0 }
 0x143   : > { %v620_v23 = vsel %vm399_vm0, 1.0, %v1011_v22  ;;  %v621_v24 = vsel %vm400_vm1, 1.0, %v1011_v22 }
 0x144   : > { %v405_v25 = vsub.f32 1.0, %v620_v23  ;;  %v406_v26 = vsub.f32 1.0, %v621_v24  ;;  %411 = vst [vmem:[%s1364_s8] sm:$0xff] %v620_v23  ;;  %412 = vst [vmem:[%s1364_s8 + $0x8] sm:$0xff] %v621_v24 }
 0x145   : > { %882 = shalt.err (!%p879_p2)
}
 0x146   : > { %s883_s6 = scalar_lea.hbm %s1373_s4, 256  ;;  %s887_s18 = scalar_lea.hbm %s1492_s1, 2048 }
 0x147   : > { %p884_p5 = scmp.ne.s32.totalorder %s1373_s4, %s883_s6  ;;  %p888_p10 = scmp.lt.u32.totalorder %s1373_s4, %s1492_s1 }
 0x148   : > { %p889_p1 = scmp.lt.u32.totalorder %s887_s18, %s883_s6  ;;  %p891_p6 = scmp.lt.u32.totalorder %s883_s6, %s1373_s4 }
 0x149   : > { %p885_p8 = pnand %p884_p5, %p1493_p9 }
 0x14a   : > { %p890_p0 = por %p889_p1, %p888_p10 }
 0x14b   : > { %p886_p4 = pneg %p885_p8 }
 0x14c   : > { %p892_p12 = por %p891_p6, %p890_p0 }
 0x14e   : > { %p893_p7 = pnand %p892_p12, %p886_p4 }
 0x150   : > { %896 = shalt.err (!%p893_p7)
}
 0x151   : > { %636 = dma.vmem_to_hbm [thread:$0]  (%p1493_p9), %s1375_s5, 256, %s1373_s4, %s414_s27   ;;  %v407_v27 = vmul.f32 %v405_v25, %v397_v20  ;;  %v408_v28 = vmul.f32 %v406_v26, %v398_v21 }
 0x153   : > { %409 = vst [vmem:[#allocation2] sm:$0xff] %v407_v27  ;;  %410 = vst [vmem:[#allocation2 + $0x8] sm:$0xff] %v408_v28 }
 0x154 PF: > { %s1494_s11 = sld [smem:[#allocation19_spill]]  ;;  %s1495_s25 = sld [smem:[#allocation17_spill]] }
 0x155   : > { %s1496_s14 = sld [smem:[#allocation23_spill]] }
 0x15a   : > { %p656_p3 = scmp.ge.s32.totalorder %s1494_s11, 2  ;;  %s444_s7 = sand.u32 1, %s1495_s25  }
 0x15b   : > { %p1497_p11 = scmp.ne.s32.totalorder %s1496_s14, 0  ;;  %s445_s21 = scalar_lea.sflag [#allocation5], %s444_s7 }
 0x15d   : > { %p652_p13 = pnand %p656_p3, %p1497_p11 }
 0x15f   : > { %958 = dma.done.wait (!%p652_p13), %s445_s21, 256  }
 0x160   : > { %960 = vsyncadd (!%p652_p13), %s445_s21, 4294967040  ;;  %s26_s25 = sadd.s32 1, %s1494_s11   ;;  %s1498_s5 = sld [smem:[#allocation21_spill]] }
 0x161   : > { %p23_p2 = scmp.ge.s32.totalorder %s26_s25, 10   ;;  %s1499_s9 = sld [smem:[#allocation20_spill]] }
 0x162   : > { %s1500_s30 = smov %s1516_s15  ;;  %s1501_s15 = smov %s967_s16 }
 0x163   : > { %s1502_s16 = smov %s971_s17  ;;  %s1503_s17 = smov %s1304_s29 }
 0x164   : > { %s1504_s18 = smov %s979_s19  ;;  %s1505_s19 = smov %s983_s20 }
 0x165   : > { %s1507_s21 = smov %s995_s23  ;;  %s1508_s22 = smov %s999_s24 }
 0x166   : > { %s1506_s20 = smov %s1498_s5  ;;  %s1510_s24 = smov %s1500_s30 }
 0x167   : > { %s1509_s23 = smov %s1499_s9  ;;  %25 = sbr.rel (!%p23_p2) target bundleno = 17 (0x11), region = 122 }
 0x16e   :  { %450 = vsyncpa [#allocation4], 1 }
 0x16f   :  { %452 = vsyncpa [#allocation4 + $0x1], 1 }
 0x170   :  { %453 = vsyncpa [#allocation7], 1 }
 0x171   :  { %455 = vsyncpa [#allocation7 + $0x1], 1 }
 0x172   :  { %456 = vsyncpa [#allocation10], 1 }
 0x173   :  { %458 = vsyncpa [#allocation10 + $0x1], 1 }
 0x174   :  { %459 = vsyncpa [#allocation5], 1 }
 0x175   :  { %461 = vsyncpa [#allocation5 + $0x1], 1 }

// kernel: basic_block4snn_forward.4
= control target key start
LH: loop header
LB: loop body
LE: loop exit
PB: predicated region body
PF: predicated region fallthrough
CT: control target
= control target key end

     0   :  { %11 = vsyncpa [#allocation4], 0  ;;  %s3247_s0 = inlined_call_operand.hbm [shape: f32[2,4,8,256], index: 0, kind: input, shape index: {}]   ;;  %s3248_s1 = inlined_call_operand.hbm [shape: f32[9,8,8], index: 1, kind: input, shape index: {}]   ;;  %s3249_s2 = inlined_call_operand.hbm [shape: f32[9,1,256], index: 2, kind: input, shape index: {}]   ;;  %s3250_s3 = inlined_call_operand.hbm [shape: f32[2,4,8,256], index: 3, kind: output, shape index: {0}]   ;;  %s3251_s4 = inlined_call_operand.hbm [shape: f32[4,8,1], index: 4, kind: output, shape index: {1}]   ;;  %s3252_s5 = inlined_call_operand.hbm [shape: f32[4,8,1], index: 5, kind: output, shape index: {2}]  }
   0x1   :  { %13 = vsyncpa [#allocation4 + $0x1], 0 }
   0x2   :  { %14 = vsyncpa [#allocation7], 0 }
   0x3   :  { %15 = vsyncpa [#allocation5], 0 }
   0x4   :  { %17 = vsyncpa [#allocation5 + $0x1], 0 }
   0x5   :  { %18 = vsyncpa [#allocation11], 0 }
   0x6   :  { %20 = vsyncpa [#allocation11 + $0x1], 0  ;;  %s2722_s18 = smov 0   ;;  %s2724_s19 = smov 0  }
   0x7   :  { %s2726_s20 = smov 0   ;;  %s2728_s21 = smov 0  }
   0x8   :  { %s2730_s22 = smov 0   ;;  %s2732_s23 = smov 0  }
   0x9 LB: > { %s2753_s24 = sadd.s32 4294967295, %s2666_s23   ;;  %s3256_s25 = sadd.s32 4294967294, %s2666_s23   ;;  %s2666_s23 = sphi %s2732_s23, %s26_s23   ;;  %s2662_s22 = sphi %s2730_s22, %s3277_s22   ;;  %s2658_s21 = sphi %s2728_s21, %s3276_s21   ;;  %s2654_s20 = sphi %s2726_s20, %s3275_s20   ;;  %s2650_s19 = sphi %s2724_s19, %s3274_s19   ;;  %s2646_s18 = sphi %s2722_s18, %s3273_s18  }
   0xa   : > { %p54_p0 = scmp.ne.s32.totalorder %s2654_s20, %s2650_s19  ;;  %p55_p1 = scmp.eq.s32.totalorder %s2666_s23, 0 }
   0xb   : > { %p60_p2 = scmp.ne.s32.totalorder %s2650_s19, %s2646_s18  ;;  %p3253_p3 = scmp.eq.s32.totalorder %s2753_s24, 0 }
   0xc   : > { %p2762_p4 = por %p55_p1, %p54_p0  ;;  %p128_p5 = scmp.eq.s32.totalorder %s2753_s24, 3 }
   0xd   : > { %p2769_p6 = por %p3253_p3, %p60_p2  ;;  %p134_p7 = scmp.eq.s32.totalorder %s3256_s25, 3 }
   0xe   : > { %p2775_p8 = por %p128_p5, %p54_p0  ;;  %p2244_p9 = scmp.ge.s32.totalorder %s2666_s23, 1 }
   0xf   : > { %s3259_s27 = scalar_select %p2769_p6, 1, 0 }
  0x10   : > { %s3260_s28 = scalar_select %p2775_p8, 1, 0 }
  0x11   : > { %p2780_p10 = por %p134_p7, %p60_p2  ;;  %p193_p11 = scmp.lt.s32.totalorder %s2666_s23, 5 }
  0x12   : > { %s2668_s6 = smov [#allocation6]   ;;  %p2362_p0 = scmp.lt.s32.totalorder %s2666_s23, 4 }
  0x13   : > { %s3261_s29 = scalar_select %p2780_p10, 1, 0 }
  0x14   : > { %p2785_p12 = pnand %p2244_p9, %p193_p11  ;;  %s205_s7 = sshll.u32 %s2668_s6, 4  ;;  %s2789_s7 = int_to_ptr.vmem [resolvable:$true] %s205_s7 }
  0x15   : > { %3262 = sst [smem:[#allocation17_spill]] %s3261_s29  ;;  %p2802_p2 = pnand %p2362_p0, %p2762_p4 }
  0x16   : > { %p2339_p13 = pneg %p2785_p12  ;;  %s2669_s10 = smov [#allocation8]  }
  0x17   : > { %s218_s11 = sshll.u32 %s2669_s10, 4  ;;  %s2434_s14 = scalar_lea.hbm %s3248_s1, 1152  ;;  %s2806_s11 = int_to_ptr.vmem [resolvable:$true] %s218_s11 }
  0x18   : > { %p2796_p1 = pnand %p2339_p13, %p3253_p3  ;;  %p2435_p5 = scmp.ne.s32.totalorder %s3248_s1, %s2434_s14 }
  0x19   : > { %p2441_p11 = scmp.lt.u32.totalorder %s2434_s14, %s3248_s1 }
  0x1a   : > { %p2436_p7 = pneg %p2796_p1 }
  0x1c   : > { %p2437_p4 = pnand %p2436_p7, %p2435_p5 }
  0x1e   : > { %p2438_p9 = pneg %p2437_p4 }
  0x20   : > { %p2443_p13 = pnand %p2441_p11, %p2438_p9 }
  0x22   : > { %2446 = shalt.err (!%p2443_p13)
}
  0x23   : > { %s2447_s6 = scalar_lea.vmem %s2789_s7, 1152  ;;  %p2455_p8 = scmp.lt.s32.totalorder %s2789_s7, %s2789_s7 }
  0x24   : > { %p2448_p0 = scmp.ne.s32.totalorder %s2789_s7, %s2447_s6  ;;  %p2456_p5 = scmp.lt.s32.totalorder %s2447_s6, %s2447_s6 }
  0x26   : > { %p2450_p3 = pnand %p2448_p0, %p2436_p7  ;;  %p2457_p4 = por %p2456_p5, %p2455_p8 }
  0x28   : > { %p2451_p10 = pneg %p2450_p3 }
  0x2a   : > { %p2458_p6 = pnand %p2457_p4, %p2451_p10 }
  0x2c   : > { %2461 = shalt.err (!%p2458_p6)
}
  0x2d   : > { %s2670_s10 = smov 128   ;;  %s2671_s12 = smov 8  }
  0x2e   : > { %2342 = dma.hbm_to_vmem [thread:$0]  (!%p2796_p1), %s3248_s1, 1152, %s2789_s7, [#allocation7], %s2670_s10, %s2670_s10, %s2671_s12  }
  0x2f   : > { %s2462_s17 = scalar_lea.hbm %s3249_s2, 288 }
  0x30   : > { %p2463_p3 = scmp.ne.s32.totalorder %s3249_s2, %s2462_s17  ;;  %p2469_p10 = scmp.lt.u32.totalorder %s2462_s17, %s3249_s2 }
  0x32   : > { %p2465_p6 = pnand %p2463_p3, %p2436_p7 }
  0x34   : > { %p2466_p8 = pneg %p2465_p6 }
  0x36   : > { %p2471_p9 = pnand %p2469_p10, %p2466_p8 }
  0x38   : > { %2474 = shalt.err (!%p2471_p9)
}
  0x39   : > { %s2475_s7 = scalar_lea.vmem %s2806_s11, 288  ;;  %p2483_p5 = scmp.lt.s32.totalorder %s2806_s11, %s2806_s11 }
  0x3a   : > { %p2476_p11 = scmp.ne.s32.totalorder %s2806_s11, %s2475_s7  ;;  %p2484_p4 = scmp.lt.s32.totalorder %s2475_s7, %s2475_s7 }
  0x3c   : > { %p2478_p13 = pnand %p2476_p11, %p2436_p7  ;;  %p2485_p3 = por %p2484_p4, %p2483_p5 }
  0x3e   : > { %p2479_p0 = pneg %p2478_p13 }
  0x40   : > { %p2486_p6 = pnand %p2485_p3, %p2479_p0 }
  0x42   : > { %2489 = shalt.err (!%p2486_p6)
}
  0x43   : > { %s2672_s25 = smov 32   ;;  %s2673_s29 = smov 2  }
  0x44   : > { %2345 = dma.hbm_to_vmem [thread:$0]  (!%p2796_p1), %s3249_s2, 288, %s2806_s11, [#allocation7], %s2672_s25, %s2672_s25, %s2673_s29  }
  0x45   : > { %s47_s13 = sadd.s32 1, %s2654_s20  ;;  %s38_s14 = sadd.s32 1, %s2662_s22 }
  0x46   : > { %s232_s15 = sand.u32 1, %s2654_s20   ;;  %p40_p7 = scmp.ge.s32.totalorder %s38_s14, 4 }
  0x47   : > { %s2248_s16 = sshll.u32 %s232_s15, 5  ;;  %s2289_s17 = sshll.u32 %s2662_s22, 8 }
  0x48   : > { %s3279_s14 = smov (%p40_p7, %s38_s14), 0  ;;  %s2869_s7 = scalar_lea.hbm %s3247_s0, %s2289_s17 }
  0x49   : > { %s43_s8 = ssub.s32 %s2662_s22, %s3279_s14  ;;  %s236_s11 = scalar_lea.vmem [#allocation3], %s2248_s16 }
  0x4a   : > { %s246_s25 = sshll.u32 %s236_s11, 4  ;;  %p45_p1 = scmp.eq.s32.totalorder %s43_s8, 0  ;;  %s2873_s25 = int_to_ptr.vmem [resolvable:$true] %s246_s25 }
  0x4b   : > { %s2878_s10 = scalar_lea.sflag [#allocation4], %s232_s15  ;;  %s2490_s12 = scalar_lea.hbm %s2869_s7, 512 }
  0x4c   : > { %s2876_s29 = scalar_select %p45_p1, %s2654_s20, %s47_s13  }
  0x4d   : > { %p2491_p8 = scmp.ne.s32.totalorder %s2869_s7, %s2490_s12  ;;  %p2492_p10 = pneg %p2802_p2 }
  0x4e   : > { %s2495_s16 = scalar_lea.hbm %s3247_s0, 2048  ;;  %p2496_p13 = scmp.lt.u32.totalorder %s2869_s7, %s3247_s0 }
  0x4f   : > { %p2493_p9 = pnand %p2492_p10, %p2491_p8  ;;  %p2497_p0 = scmp.lt.u32.totalorder %s2495_s16, %s2490_s12 }
  0x50   : > { %p2499_p4 = scmp.lt.u32.totalorder %s2490_s12, %s2869_s7 }
  0x51   : > { %p2494_p11 = pneg %p2493_p9  ;;  %p2498_p5 = por %p2497_p0, %p2496_p13 }
  0x53   : > { %p2500_p3 = por %p2499_p4, %p2498_p5 }
  0x55   : > { %p2501_p6 = pnand %p2500_p3, %p2494_p11 }
  0x57   : > { %2504 = shalt.err (!%p2501_p6)
}
  0x58   : > { %s2505_s13 = scalar_lea.vmem %s2873_s25, 512  ;;  %s2674_s15 = smov [#allocation3]  }
  0x59   : > { %p2506_p7 = scmp.ne.s32.totalorder %s2873_s25, %s2505_s13  ;;  %s2510_s11 = sshll.u32 %s2674_s15, 4  ;;  %s2511_s11 = int_to_ptr.vmem [resolvable:$false] %s2510_s11 }
  0x5a   : > { %s2512_s17 = scalar_lea.vmem %s2511_s11, 1024  ;;  %p2513_p9 = scmp.lt.s32.totalorder %s2873_s25, %s2511_s11 }
  0x5b   : > { %p2508_p1 = pnand %p2506_p7, %p2492_p10  ;;  %p2514_p13 = scmp.lt.s32.totalorder %s2512_s17, %s2505_s13 }
  0x5d   : > { %p2509_p8 = pneg %p2508_p1  ;;  %p2515_p0 = por %p2514_p13, %p2513_p9 }
  0x5f   : > { %p2516_p5 = pnand %p2515_p0, %p2509_p8 }
  0x61   : > { %2519 = shalt.err (!%p2516_p5)
}
  0x62   : > { %s2675_s12 = smov 1024   ;;  %s2676_s26 = smov 256  }
  0x63   : > { %s2677_s16 = smov 16   ;;  %258 = sbr.rel (%p2785_p12) target bundleno = 705 (0x2c1), region = 32 }
  0x64   : > { %2349 = dma.hbm_to_vmem [thread:$0]  (!%p2802_p2), %s2869_s7, 512, %s2873_s25, %s2878_s10, %s2675_s12, %s2676_s26, %s2677_s16  }
  0x65   : > { %s2909_s6 = sand.u32 (!%p2785_p12), 1, %s2650_s19   ;;  %p3266_p10 = scmp.ne.s32.totalorder (!%p2785_p12), %s3259_s27, 0 }
  0x66   : > { %s2252_s8 = sshll.u32 (!%p2785_p12), %s2909_s6, 5  ;;  %s261_s13 = scalar_lea.sflag (!%p2785_p12), [#allocation4], %s2909_s6 }
  0x67   : > { %s264_s15 = scalar_lea.vmem (!%p2785_p12), [#allocation3], %s2252_s8 }
  0x6a   : > { %2629 = dma.done.wait (%p3266_p10), %s261_s13, 512  }
  0x6b   : > { %2631 = vsyncadd (%p3266_p10), %s261_s13, 4294966784  ;;  %p3267_p2 = scmp.eq.s32.totalorder %s2753_s24, 0 }
  0x6d   : > { %2633 = dma.done.wait (%p3267_p2), [#allocation7], 1440   ;;  %p3268_p12 = pmov %p3267_p2 }
  0x6e   : > { %v2678_v0 = vmov 0.0   ;;  %v2925_v1 = vld [vmem:[%s264_s15] sm:$0xff]  ;;  %s2679_s30 = smov 16   ;;  %s2680_s9 = smov 17   ;;  %v2930_v2 = vld [vmem:[%s264_s15 + $0x8] sm:$0xff]  ;;  %v2935_v3 = vld [vmem:[%s264_s15 + $0x18] sm:$0xff]  ;;  %v343_v5 = vlaneseq }
  0x6f   : > { %2635 = vsyncadd (%p3268_p12), [#allocation7], 4294965856  ;;  %431 = vmatprep.mubr.f32.mxu0 %v2678_v0  ;;  %1320 = vmatprep.mubr.f32.mxu1 %v2678_v0  ;;  %v2937_v4 = vld [vmem:[%s264_s15 + $0x10] sm:$0xff]  ;;  %s2681_s27 = smov 15   ;;  %s2682_s7 = smov 1   ;;  %v318_v26 = vld [vmem:[#allocation6] sm:$0xff] }
  0x70   : > { %442 = vrot.lane.b32.xlu1 %v2925_v1, %s2679_s30  ;;  %339 = vrot.lane.b32.xlu0 %v2925_v1, %s2680_s9  ;;  %s2683_s25 = smov 127   ;;  %s2684_s10 = smov 113   ;;  %v350_v6 = vshrl.u32 %v343_v5, 7  ;;  %v2969_v7 = vand.u32 127, %v343_v5  ;;  %v327_v10 = vld [vmem:[#allocation8] sm:$0x3] }
  0x71   : > { %s2685_s11 = smov 112   ;;  %s2686_s17 = smov 111   ;;  %v328_v13 = vld [vmem:[#allocation8 + $0x2] sm:$0x3]  ;;  %vm363_vm2 = vcmask 64512   ;;  %v320_v60 = vld [vmem:[#allocation6 + $0x10] sm:$0xff] }
  0x72   : > { %v2971_v8 = vsub.s32 0, %v350_v6  ;;  %v2973_v9 = vsub.s32 1, %v350_v6  ;;  %vm446_vm0 = vcmp.lt.s32.totalorder %v2969_v7, 16  ;;  %vm345_vm1 = vcmp.lt.s32.totalorder %v2969_v7, 17  ;;  %v329_v27 = vld [vmem:[#allocation8 + $0x4] sm:$0x3] }
  0x73   : > { %vm546_vm3 = vcmp.lt.s32.totalorder %v2969_v7, 15  ;;  %v319_v44 = vld [vmem:[#allocation6 + $0x8] sm:$0xff]  ;;  %vm646_vm4 = vcmp.lt.s32.totalorder %v2969_v7, 1  ;;  %vm826_vm5 = vcmp.lt.s32.totalorder %v2969_v7, 127  ;;  %vm926_vm6 = vcmp.lt.s32.totalorder %v2969_v7, 113  ;;  %s2256_s12 = sshll.u32 %s2909_s6, 3 }
  0x74   : > { %444 = vrot.lane.b32.xlu1 %v2930_v2, %s2679_s30  ;;  %341 = vrot.lane.b32.xlu0 %v2930_v2, %s2680_s9  ;;  %v356_v14 = vrot.slane %v327_v10, %v2973_v9  ;;  %v352_v15 = vrot.slane %v327_v10, %v2971_v8  ;;  %v457_v17 = vrot.slane %v328_v13, %v2973_v9  ;;  %v330_v45 = vld [vmem:[#allocation8 + $0x6] sm:$0x3]  ;;  %vm1026_vm7 = vcmp.lt.s32.totalorder %v2969_v7, 112  ;;  %s3102_s26 = scalar_lea.vmem [#allocation10], %s2256_s12  ;;  %s294_s16 = scalar_lea.vmem [#allocation9], %s2252_s8 }
  0x75   : > { %v453_v20 = vrot.slane %v328_v13, %v2971_v8  ;;  %v557_v34 = vrot.slane %v329_v27, %v2973_v9  ;;  %v553_v37 = vrot.slane %v329_v27, %v2971_v8  ;;  %v657_v52 = vrot.slane %v330_v45, %v2973_v9  ;;  %s3109_s8 = scalar_lea.vmem [#allocation12], %s2256_s12  ;;  %s2049_s13 = sshll.u32 %s294_s16, 4  ;;  %s3114_s13 = int_to_ptr.vmem [resolvable:$true] %s2049_s13 }
  0x76   : > { %v653_v53 = vrot.slane %v330_v45, %v2971_v8  ;;  %vm1126_vm8 = vcmp.lt.s32.totalorder %v2969_v7, 111  ;;  %vm315_vm9 = vcmask 7168   ;;  %s2290_s15 = sshll.u32 %s2658_s21, 8  ;;  %p3269_p4 = scmp.ne.s32.totalorder %s3260_s28, 0 }
  0x77   : > { %316 = vst.msk [vmem:[%s3102_s26] sm:$0xff] %vm315_vm9, %v2678_v0  ;;  %317 = vst.msk [vmem:[%s3109_s8] sm:$0xff] %vm315_vm9, %v2678_v0 }
  0x78   : > { %1248 = vrot.lane.b32.xlu1 %v2935_v3, %s2680_s9  ;;  %1246 = vrot.lane.b32.xlu0 %v2937_v4, %s2680_s9 }
  0x7c   : > { %544 = vrot.lane.b32.xlu1 %v2930_v2, %s2681_s27  ;;  %542 = vrot.lane.b32.xlu0 %v2925_v1, %s2681_s27 }
  0x80   : > { %1333 = vrot.lane.b32.xlu1 %v2935_v3, %s2679_s30  ;;  %1331 = vrot.lane.b32.xlu0 %v2937_v4, %s2679_s30 }
  0x84   : > { %644 = vrot.lane.b32.xlu1 %v2930_v2, %s2682_s7  ;;  %642 = vrot.lane.b32.xlu0 %v2925_v1, %s2682_s7 }
  0x88   : > { %1418 = vrot.lane.b32.xlu1 %v2935_v3, %s2681_s27  ;;  %1416 = vrot.lane.b32.xlu0 %v2937_v4, %s2681_s27 }
  0x8c   : > { %1503 = vrot.lane.b32.xlu1 %v2935_v3, %s2682_s7  ;;  %1501 = vrot.lane.b32.xlu0 %v2937_v4, %s2682_s7  ;;  %s3120_s7 = scalar_lea.hbm %s3250_s3, %s2290_s15 }
  0x90   : > { %824 = vrot.lane.b32.xlu1 %v2930_v2, %s2683_s25  ;;  %822 = vrot.lane.b32.xlu0 %v2925_v1, %s2683_s25 }
  0x94   : > { %924 = vrot.lane.b32.xlu1 %v2930_v2, %s2684_s10  ;;  %922 = vrot.lane.b32.xlu0 %v2925_v1, %s2684_s10 }
  0x98   : > { %1665 = vrot.lane.b32.xlu1 %v2935_v3, %s2683_s25  ;;  %1663 = vrot.lane.b32.xlu0 %v2937_v4, %s2683_s25  ;;  %s2023_s25 = scalar_lea.sflag [#allocation5], %s2909_s6 }
  0x9c   : > { %1024 = vrot.lane.b32.xlu1 %v2930_v2, %s2685_s11  ;;  %1022 = vrot.lane.b32.xlu0 %v2925_v1, %s2685_s11 }
  0xa0   : > { %1750 = vrot.lane.b32.xlu1 %v2935_v3, %s2684_s10  ;;  %1748 = vrot.lane.b32.xlu0 %v2937_v4, %s2684_s10  ;;  %s2520_s10 = scalar_lea.vmem %s3114_s13, 512 }
  0xa1   : > { %p2521_p11 = scmp.ne.s32.totalorder %s3114_s13, %s2520_s10 }
  0xa3   : > { %p2522_p3 = pnand %p2521_p11, %p3269_p4 }
  0xa4   : > { %1124 = vrot.lane.b32.xlu1 %v2930_v2, %s2686_s17  ;;  %1122 = vrot.lane.b32.xlu0 %v2925_v1, %s2686_s17 }
  0xa5   : > { %p2523_p6 = pneg %p2522_p3 }
  0xa8   : > { %1835 = vrot.lane.b32.xlu1 %v2935_v3, %s2685_s11  ;;  %1833 = vrot.lane.b32.xlu0 %v2937_v4, %s2685_s11  ;;  %s2687_s11 = smov [#allocation9]  }
  0xac   : > { %1920 = vrot.lane.b32.xlu1 %v2935_v3, %s2686_s17  ;;  %1918 = vrot.lane.b32.xlu0 %v2937_v4, %s2686_s17  ;;  %s2524_s17 = sshll.u32 %s2687_s11, 4  ;;  %s2525_s17 = int_to_ptr.vmem [resolvable:$false] %s2524_s17 }
  0xad   : > { %s2526_s12 = scalar_lea.vmem %s2525_s17, 1024  ;;  %p2527_p7 = scmp.lt.s32.totalorder %s3114_s13, %s2525_s17 }
  0xae   : > { %p2528_p1 = scmp.lt.s32.totalorder %s2526_s12, %s2520_s10 }
  0xb0   : > { %p2529_p8 = por %p2528_p1, %p2527_p7 }
  0xb2   : > { %p2530_p9 = pnand %p2529_p8, %p2523_p6 }
  0xe2   : > { %v443_v11 = vpop.permute.xlu1 %442  ;;  %v340_v12 = vpop.permute.xlu0 %339 }
  0xe6   : > { %v445_v16 = vpop.permute.xlu1 %444  ;;  %v342_v18 = vpop.permute.xlu0 %341 }
  0xe7   : > { %v447_v19 = vsel %vm446_vm0, %v443_v11, %v445_v16  ;;  %v347_v21 = vsel %vm345_vm1, %v342_v18, %v340_v12  ;;  %v346_v22 = vsel %vm345_vm1, %v340_v12, %v342_v18  ;;  %v448_v23 = vsel %vm446_vm0, %v445_v16, %v443_v11  ;;  %v331_v11 = vld [vmem:[#allocation8 + $0xa] sm:$0x3] }
  0xe8   : > { %v360_v24 = vmul.f32 %v356_v14, %v346_v22  ;;  %v359_v25 = vmul.f32 %v352_v15, %v347_v21  ;;  %v461_v28 = vmul.f32 %v457_v17, %v447_v19  ;;  %v460_v31 = vmul.f32 %v453_v20, %v448_v23  ;;  %v321_v19 = vld [vmem:[#allocation6 + $0x18] sm:$0xff]  ;;  %v332_v22 = vld [vmem:[#allocation8 + $0xc] sm:$0x3] }
  0xe9   : > { %v837_v18 = vrot.slane %v331_v11, %v2973_v9 }
  0xea   : > { %v1249_v29 = vpop.permute.xlu1 %1248  ;;  %v1247_v30 = vpop.permute.xlu0 %1246  ;;  %367 = vmatprep.subr.mxu0 %v360_v24  ;;  %v833_v24 = vrot.slane %v331_v11, %v2971_v8 }
  0xeb   : > { %v1251_v32 = vsel %vm345_vm1, %v1249_v29, %v1247_v30  ;;  %368 = vmatpush1.msra.mxu0 %v359_v25  ;;  %v1250_v33 = vsel %vm345_vm1, %v1247_v30, %v1249_v29  ;;  %v322_v30 = vld [vmem:[#allocation6 + $0x20] sm:$0xff] }
  0xec   : > { %2258 = vmatmul.mubr.msk.f32.vlgmr.msra.gmra.mrb[0].mxu0 %vm363_vm2, %v318_v26  ;;  %467 = vmatprep.subr.mxu0 %v461_v28  ;;  %v1253_v35 = vmul.f32 %v1250_v33, %v356_v14  ;;  %v1252_v36 = vmul.f32 %v1251_v32, %v352_v15  ;;  %v937_v28 = vrot.slane %v332_v22, %v2973_v9 }
  0xed   : > { %468 = vmatpush1.msra.mxu0 %v460_v31  ;;  %531 = vmatprep.mubr.f32.mxu0 %v2678_v0 }
  0xee   : > { %v545_v38 = vpop.permute.xlu1 %544  ;;  %v543_v39 = vpop.permute.xlu0 %542  ;;  %1256 = vmatprep.subr.mxu1 %v1253_v35  ;;  %v333_v35 = vld [vmem:[#allocation8 + $0xe] sm:$0x3] }
  0xef   : > { %v547_v40 = vsel %vm546_vm3, %v543_v39, %v545_v38  ;;  %v548_v41 = vsel %vm546_vm3, %v545_v38, %v543_v39  ;;  %1257 = vmatpush1.msra.mxu1 %v1252_v36 }
  0xf0   : > { %v561_v42 = vmul.f32 %v557_v34, %v547_v40  ;;  %2269 = vmatmul.mubr.msk.f32.vlgmr.msra.gmra.mrb[0].mxu1 %vm363_vm2, %v318_v26  ;;  %v560_v43 = vmul.f32 %v553_v37, %v548_v41  ;;  %v1037_v41 = vrot.slane %v333_v35, %v2973_v9 }
  0xf1   : > { %1405 = vmatprep.mubr.f32.mxu1 %v2678_v0 }
  0xf2   : > { %v1334_v46 = vpop.permute.xlu1 %1333  ;;  %v1332_v47 = vpop.permute.xlu0 %1331  ;;  %567 = vmatprep.subr.mxu0 %v561_v42 }
  0xf3   : > { %v1335_v48 = vsel %vm446_vm0, %v1332_v47, %v1334_v46  ;;  %v1336_v49 = vsel %vm446_vm0, %v1334_v46, %v1332_v47 }
  0xf4   : > { %v1337_v50 = vmul.f32 %v1336_v49, %v453_v20  ;;  %v1338_v51 = vmul.f32 %v1335_v48, %v457_v17  ;;  %2259 = vmatmul.mubr.msk.f32.vlgmr.msra.gmra.mrb[0].mxu0 %vm363_vm2, %v319_v44 }
  0xf5   : > { %568 = vmatpush1.msra.mxu0 %v560_v43  ;;  %631 = vmatprep.mubr.f32.mxu0 %v2678_v0 }
  0xf6   : > { %v645_v54 = vpop.permute.xlu1 %644  ;;  %v643_v55 = vpop.permute.xlu0 %642  ;;  %1341 = vmatprep.subr.mxu1 %v1338_v51 }
  0xf7   : > { %v647_v56 = vsel %vm646_vm4, %v643_v55, %v645_v54  ;;  %v648_v57 = vsel %vm646_vm4, %v645_v54, %v643_v55  ;;  %1342 = vmatpush1.msra.mxu1 %v1337_v50  ;;  %v334_v50 = vld [vmem:[#allocation8 + $0x10] sm:$0x3] }
  0xf8   : > { %v661_v58 = vmul.f32 %v657_v52, %v647_v56  ;;  %2270 = vmatmul.mubr.msk.f32.vlgmr.msra.gmra.mrb[0].mxu1 %vm363_vm2, %v319_v44  ;;  %v660_v59 = vmul.f32 %v653_v53, %v648_v57  ;;  %v323_v44 = vld [vmem:[#allocation6 + $0x28] sm:$0xff]  ;;  %v1137_v57 = vrot.slane %v334_v50, %v2973_v9 }
  0xf9   : > { %1490 = vmatprep.mubr.f32.mxu1 %v2678_v0 }
  0xfa   : > { %v1419_v61 = vpop.permute.xlu1 %1418  ;;  %v1417_v62 = vpop.permute.xlu0 %1416  ;;  %667 = vmatprep.subr.mxu0 %v661_v58 }
  0xfb   : > { %v1420_v63 = vsel %vm546_vm3, %v1417_v62, %v1419_v61  ;;  %v1421_v5 = vsel %vm546_vm3, %v1419_v61, %v1417_v62 }
  0xfc   : > { %v1422_v6 = vmul.f32 %v1421_v5, %v553_v37  ;;  %v1423_v10 = vmul.f32 %v1420_v63, %v557_v34  ;;  %2260 = vmatmul.mubr.msk.f32.vlgmr.msra.gmra.mrb[0].mxu0 %vm363_vm2, %v320_v60  ;;  %v933_v37 = vrot.slane %v332_v22, %v2971_v8 }
  0xfd   : > { %668 = vmatpush1.msra.mxu0 %v660_v59  ;;  %731 = vmatprep.mubr.f32.mxu0 %v2678_v0 }
  0xfe   : > { %1426 = vmatprep.subr.mxu1 %v1423_v10  ;;  %v1504_v12 = vpop.permute.xlu1 %1503  ;;  %v1502_v13 = vpop.permute.xlu0 %1501  ;;  %747 = vmatprep.subr.mxu0 %v2930_v2  ;;  %v1133_v10 = vrot.slane %v334_v50, %v2971_v8 }
  0xff   : > { %1427 = vmatpush1.msra.mxu1 %v1422_v6  ;;  %v1505_v14 = vsel %vm646_vm4, %v1502_v13, %v1504_v12  ;;  %v1506_v15 = vsel %vm646_vm4, %v1504_v12, %v1502_v13 }
 0x100   : > { %2271 = vmatmul.mubr.msk.f32.vlgmr.msra.gmra.mrb[0].mxu1 %vm363_vm2, %v320_v60  ;;  %v1507_v16 = vmul.f32 %v1506_v15, %v653_v53  ;;  %v1508_v17 = vmul.f32 %v1505_v14, %v657_v52  ;;  %v1033_v52 = vrot.slane %v333_v35, %v2971_v8  ;;  %v324_v60 = vld [vmem:[#allocation6 + $0x30] sm:$0xff] }
 0x101   : > { %1575 = vmatprep.mubr.f32.mxu1 %v2678_v0 }
 0x102   : > { %1511 = vmatprep.subr.mxu1 %v1508_v17  ;;  %v825_v2 = vpop.permute.xlu1 %824  ;;  %v823_v20 = vpop.permute.xlu0 %822 }
 0x103   : > { %1512 = vmatpush1.msra.mxu1 %v1507_v16  ;;  %v828_v21 = vsel %vm826_vm5, %v825_v2, %v823_v20  ;;  %v827_v25 = vsel %vm826_vm5, %v823_v20, %v825_v2  ;;  %v326_v2 = vld [vmem:[#allocation6 + $0x40] sm:$0xff] }
 0x104   : > { %2261 = vmatmul.mubr.msk.f32.vlgmr.msra.gmra.mrb[0].mxu0 %vm363_vm2, %v321_v19  ;;  %v841_v23 = vmul.f32 %v837_v18, %v828_v21  ;;  %1588 = vmatprep.subr.mxu1 %v2935_v3  ;;  %v840_v3 = vmul.f32 %v833_v24, %v827_v25 }
 0x105   : > { %748 = vmatpush1.msra.mxu0 %v2925_v1  ;;  %811 = vmatprep.mubr.f32.mxu0 %v2678_v0 }
 0x106   : > { %v925_v26 = vpop.permute.xlu1 %924  ;;  %v923_v27 = vpop.permute.xlu0 %922  ;;  %847 = vmatprep.subr.mxu0 %v841_v23 }
 0x107   : > { %v928_v29 = vsel %vm926_vm6, %v925_v26, %v923_v27  ;;  %v927_v38 = vsel %vm926_vm6, %v923_v27, %v925_v26 }
 0x108   : > { %2272 = vmatmul.mubr.msk.f32.vlgmr.msra.gmra.mrb[0].mxu1 %vm363_vm2, %v321_v19  ;;  %v941_v1 = vmul.f32 %v937_v28, %v928_v29  ;;  %v940_v43 = vmul.f32 %v933_v37, %v927_v38 }
 0x109   : > { %1589 = vmatpush1.msra.mxu1 %v2937_v4  ;;  %1652 = vmatprep.mubr.f32.mxu1 %v2678_v0 }
 0x10a   : > { %v1666_v31 = vpop.permute.xlu1 %1665  ;;  %v1664_v32 = vpop.permute.xlu0 %1663 }
 0x10b   : > { %v1667_v33 = vsel %vm826_vm5, %v1664_v32, %v1666_v31  ;;  %v1668_v34 = vsel %vm826_vm5, %v1666_v31, %v1664_v32 }
 0x10c   : > { %2262 = vmatmul.mubr.msk.f32.vlgmr.msra.gmra.mrb[0].mxu0 %vm363_vm2, %v322_v30  ;;  %v1670_v36 = vmul.f32 %v1668_v34, %v837_v18  ;;  %v1669_v4 = vmul.f32 %v1667_v33, %v833_v24  ;;  %v325_v18 = vld [vmem:[#allocation6 + $0x38] sm:$0xff] }
 0x10d   : > { %848 = vmatpush1.msra.mxu0 %v840_v3  ;;  %911 = vmatprep.mubr.f32.mxu0 %v2678_v0 }
 0x10e   : > { %947 = vmatprep.subr.mxu0 %v941_v1  ;;  %v1025_v39 = vpop.permute.xlu1 %1024  ;;  %v1023_v40 = vpop.permute.xlu0 %1022  ;;  %1673 = vmatprep.subr.mxu1 %v1670_v36 }
 0x10f   : > { %v1028_v42 = vsel %vm1026_vm7, %v1025_v39, %v1023_v40  ;;  %v1027_v54 = vsel %vm1026_vm7, %v1023_v40, %v1025_v39 }
 0x110   : > { %2273 = vmatmul.mubr.msk.f32.vlgmr.msra.gmra.mrb[0].mxu1 %vm363_vm2, %v322_v30  ;;  %v1041_v45 = vmul.f32 %v1037_v41, %v1028_v42  ;;  %v1040_v59 = vmul.f32 %v1033_v52, %v1027_v54 }
 0x111   : > { %1674 = vmatpush1.msra.mxu1 %v1669_v4  ;;  %1737 = vmatprep.mubr.f32.mxu1 %v2678_v0 }
 0x112   : > { %v1751_v46 = vpop.permute.xlu1 %1750  ;;  %v1749_v47 = vpop.permute.xlu0 %1748 }
 0x113   : > { %v1752_v48 = vsel %vm926_vm6, %v1749_v47, %v1751_v46  ;;  %v1753_v49 = vsel %vm926_vm6, %v1751_v46, %v1749_v47 }
 0x114   : > { %2263 = vmatmul.mubr.msk.f32.vlgmr.msra.gmra.mrb[0].mxu0 %vm363_vm2, %v323_v44  ;;  %v1755_v51 = vmul.f32 %v1753_v49, %v937_v28  ;;  %v1754_v53 = vmul.f32 %v1752_v48, %v933_v37 }
 0x115   : > { %948 = vmatpush1.msra.mxu0 %v940_v43  ;;  %1011 = vmatprep.mubr.f32.mxu0 %v2678_v0 }
 0x116   : > { %1047 = vmatprep.subr.mxu0 %v1041_v45  ;;  %v1125_v55 = vpop.permute.xlu1 %1124  ;;  %v1123_v56 = vpop.permute.xlu0 %1122  ;;  %1758 = vmatprep.subr.mxu1 %v1755_v51 }
 0x117   : > { %v1128_v58 = vsel %vm1126_vm8, %v1125_v55, %v1123_v56  ;;  %v1127_v12 = vsel %vm1126_vm8, %v1123_v56, %v1125_v55 }
 0x118   : > { %2274 = vmatmul.mubr.msk.f32.vlgmr.msra.gmra.mrb[0].mxu1 %vm363_vm2, %v323_v44  ;;  %v1141_v61 = vmul.f32 %v1137_v57, %v1128_v58  ;;  %v1140_v17 = vmul.f32 %v1133_v10, %v1127_v12 }
 0x119   : > { %1759 = vmatpush1.msra.mxu1 %v1754_v53  ;;  %1822 = vmatprep.mubr.f32.mxu1 %v2678_v0 }
 0x11a   : > { %v1836_v62 = vpop.permute.xlu1 %1835  ;;  %v1834_v63 = vpop.permute.xlu0 %1833 }
 0x11b   : > { %v1837_v5 = vsel %vm1026_vm7, %v1834_v63, %v1836_v62  ;;  %v1838_v9 = vsel %vm1026_vm7, %v1836_v62, %v1834_v63 }
 0x11c   : > { %2264 = vmatmul.mubr.msk.f32.vlgmr.msra.gmra.mrb[0].mxu0 %vm363_vm2, %v324_v60  ;;  %v1840_v6 = vmul.f32 %v1838_v9, %v1037_v41  ;;  %v1839_v11 = vmul.f32 %v1837_v5, %v1033_v52 }
 0x11d   : > { %1048 = vmatpush1.msra.mxu0 %v1040_v59  ;;  %1111 = vmatprep.mubr.f32.mxu0 %v2678_v0 }
 0x11e   : > { %1147 = vmatprep.subr.mxu0 %v1141_v61  ;;  %1843 = vmatprep.subr.mxu1 %v1840_v6  ;;  %v1921_v13 = vpop.permute.xlu1 %1920  ;;  %v1919_v14 = vpop.permute.xlu0 %1918 }
 0x11f   : > { %v1923_v15 = vsel %vm1126_vm8, %v1921_v13, %v1919_v14  ;;  %v1922_v8 = vsel %vm1126_vm8, %v1919_v14, %v1921_v13 }
 0x120   : > { %2275 = vmatmul.mubr.msk.f32.vlgmr.msra.gmra.mrb[0].mxu1 %vm363_vm2, %v324_v60  ;;  %v1925_v16 = vmul.f32 %v1923_v15, %v1137_v57  ;;  %v1924_v19 = vmul.f32 %v1922_v8, %v1133_v10 }
 0x121   : > { %1844 = vmatpush1.msra.mxu1 %v1839_v11  ;;  %1907 = vmatprep.mubr.f32.mxu1 %v2678_v0 }
 0x122   : > { %1928 = vmatprep.subr.mxu1 %v1925_v16 }
 0x124   : > { %2265 = vmatmul.mubr.msk.f32.vlgmr.msra.gmra.mrb[0].mxu0 %vm363_vm2, %v325_v18 }
 0x125   : > { %1148 = vmatpush1.msra.mxu0 %v1140_v17  ;;  %1211 = vmatprep.mubr.f32.mxu0 %v2678_v0 }
 0x128   : > { %2276 = vmatmul.mubr.msk.f32.vlgmr.msra.gmra.mrb[0].mxu1 %vm363_vm2, %v325_v18 }
 0x129   : > { %1929 = vmatpush1.msra.mxu1 %v1924_v19  ;;  %1992 = vmatprep.mubr.f32.mxu1 %v2678_v0 }
 0x12c   : > { %2266 = vmatmul.mubr.msk.f32.vlgmr.msra.gmra.mrb[0].mxu0 %vm363_vm2, %v326_v2 }
 0x130   : > { %2277 = vmatmul.mubr.msk.f32.vlgmr.msra.gmra.mrb[0].mxu1 %vm363_vm2, %v326_v2 }
 0x1ff   : > { %v1213_v7 = vpop.f32.mrb[0].mxu0 }
 0x200   : > { %1224 = vst [vmem:[%s294_s16] sm:$0xff] %v1213_v7  ;;  %v1215_v20 = vpop.f32.mrb[1].mxu0  ;;  %v1234_v21 = vmul.f32 %v1213_v7, %v1213_v7 }
 0x201   : > { %1225 = vst [vmem:[%s294_s16 + $0x8] sm:$0xff] %v1215_v20  ;;  %v1235_v22 = vmul.f32 %v1215_v20, %v1215_v20  ;;  %v1227_v23 = vadd.f32 %v1215_v20, %v1213_v7 }
 0x203   : > { %v1994_v24 = vpop.f32.mrb[0].mxu1  ;;  %1228 = vadd.xlane.f32.xlu0 %v1227_v23  ;;  %v1236_v25 = vadd.f32 %v1235_v22, %v1234_v21 }
 0x204   : > { %2278 = vst [vmem:[%s294_s16 + $0x10] sm:$0xff] %v1994_v24  ;;  %v1996_v26 = vpop.f32.mrb[1].mxu1  ;;  %v2015_v27 = vmul.f32 %v1994_v24, %v1994_v24 }
 0x205   : > { %2279 = vst [vmem:[%s294_s16 + $0x18] sm:$0xff] %v1996_v26  ;;  %v2016_v28 = vmul.f32 %v1996_v26, %v1996_v26  ;;  %1237 = vadd.xlane.f32.xlu1 %v1236_v25  ;;  %v2009_v29 = vadd.f32 %v1996_v26, %v1994_v24 }
 0x207   : > { %2010 = vadd.xlane.f32.xlu0 %v2009_v29  ;;  %v2017_v3 = vadd.f32 %v2016_v28, %v2015_v27 }
 0x20b   : > { %2018 = vadd.xlane.f32.xlu0 %v2017_v3 }
 0x20c   : > { %2533 = shalt.err (!%p2530_p9)
}
 0x20d   : > { %s2534_s16 = scalar_lea.hbm %s3120_s7, 512  ;;  %s2538_s27 = scalar_lea.hbm %s3250_s3, 2048 }
 0x20e   : > { %p2535_p13 = scmp.ne.s32.totalorder %s3120_s7, %s2534_s16  ;;  %p2539_p10 = scmp.lt.u32.totalorder %s3120_s7, %s3250_s3 }
 0x20f   : > { %p2540_p2 = scmp.lt.u32.totalorder %s2538_s27, %s2534_s16  ;;  %p2542_p11 = scmp.lt.u32.totalorder %s2534_s16, %s3120_s7 }
 0x210   : > { %p2536_p0 = pnand %p2535_p13, %p3269_p4 }
 0x211   : > { %p2541_p12 = por %p2540_p2, %p2539_p10 }
 0x212   : > { %p2537_p5 = pneg %p2536_p0 }
 0x213   : > { %p2543_p3 = por %p2542_p11, %p2541_p12 }
 0x215   : > { %p2544_p6 = pnand %p2543_p3, %p2537_p5 }
 0x217   : > { %2547 = shalt.err (!%p2544_p6)
}
 0x218   : > { %s2688_s10 = smov 256   ;;  %s2689_s12 = smov 1024   ;;  %v1226_v0 = vld [vmem:[%s3102_s26] sm:$0xff]  ;;  %v1233_v1 = vld [vmem:[%s3109_s8] sm:$0xff] }
 0x219   : > { %2333 = dma.vmem_to_hbm [thread:$0]  (%p3269_p4), %s3114_s13, 512, %s3120_s7, %s2023_s25, %s2688_s10, %s2689_s12, %s2679_s30  }
 0x21a   : > { %s2027_s16 = sand.u32 1, %s2753_s24   ;;  %s2285_s15 = sshll.u32 %s2658_s21, 7 }
 0x21b   : > { %s2065_s9 = sshll.u32 %s3102_s26, 4  ;;  %s2078_s6 = sshll.u32 %s3109_s8, 4  ;;  %s3163_s9 = int_to_ptr.vmem [resolvable:$true] %s2065_s9  ;;  %s3173_s6 = int_to_ptr.vmem [resolvable:$true] %s2078_s6 }
 0x21c   : > { %s3161_s7 = scalar_lea.hbm %s3251_s4, %s2285_s15  ;;  %s3171_s25 = scalar_lea.hbm %s3252_s5, %s2285_s15 }
 0x21d   : > { %s3175_s27 = scalar_lea.sflag [#allocation11], %s2027_s16  ;;  %s2548_s11 = scalar_lea.vmem %s3163_s9, 128 }
 0x21e   : > { %p2549_p7 = scmp.ne.s32.totalorder %s3163_s9, %s2548_s11  ;;  %s2690_s17 = smov [#allocation10]  }
 0x21f   : > { %s2552_s10 = sshll.u32 %s2690_s17, 4  ;;  %s2553_s10 = int_to_ptr.vmem [resolvable:$false] %s2552_s10 }
 0x220   : > { %p2550_p1 = pnand %p2549_p7, %p3269_p4  ;;  %s2554_s12 = scalar_lea.vmem %s2553_s10, 256 }
 0x221   : > { %p2555_p9 = scmp.lt.s32.totalorder %s3163_s9, %s2553_s10  ;;  %p2556_p13 = scmp.lt.s32.totalorder %s2554_s12, %s2548_s11 }
 0x222   : > { %p2551_p8 = pneg %p2550_p1 }
 0x223   : > { %p2557_p0 = por %p2556_p13, %p2555_p9 }
 0x225   : > { %p2558_p5 = pnand %p2557_p0, %p2551_p8 }
 0x290   : > { %v1229_v30 = vpop.xlane.xlu0 %1228 }
 0x291   : > { %v1230_v31 = vadd.f32 %v1229_v30, %v1226_v0 }
 0x292   : > { %v1238_v32 = vpop.xlane.xlu1 %1237 }
 0x293   : > { %1232 = vst.msk [vmem:[%s3102_s26] sm:$0xff] %vm315_vm9, %v1230_v31  ;;  %v1239_v33 = vadd.f32 %v1238_v32, %v1233_v1 }
 0x294   : > { %v2011_v34 = vpop.xlane.xlu0 %2010 }
 0x295   : > { %1240 = vst.msk [vmem:[%s3109_s8] sm:$0xff] %vm315_vm9, %v1239_v33 }
 0x298   : > { %v2019_v37 = vpop.xlane.xlu0 %2018 }
 0x29a   : > { %v2008_v35 = vld [vmem:[%s3102_s26] sm:$0xff] }
 0x29b   : > { %v2012_v36 = vadd.f32 %v2011_v34, %v2008_v35 }
 0x29c   : > { %v2014_v4 = vld [vmem:[%s3109_s8] sm:$0xff] }
 0x29d   : > { %2013 = vst.msk [vmem:[%s3102_s26] sm:$0xff] %vm315_vm9, %v2012_v36  ;;  %v2020_v38 = vadd.f32 %v2019_v37, %v2014_v4 }
 0x29e   : > { %2561 = shalt.err (!%p2558_p5)
}
 0x29f   : > { %s2562_s26 = scalar_lea.hbm %s3161_s7, 128  ;;  %s2566_s30 = scalar_lea.hbm %s3251_s4, 512 }
 0x2a0   : > { %p2563_p10 = scmp.ne.s32.totalorder %s3161_s7, %s2562_s26  ;;  %p2567_p11 = scmp.lt.u32.totalorder %s3161_s7, %s3251_s4 }
 0x2a1   : > { %p2568_p3 = scmp.lt.u32.totalorder %s2566_s30, %s2562_s26  ;;  %p2570_p7 = scmp.lt.u32.totalorder %s2562_s26, %s3161_s7 }
 0x2a2   : > { %p2564_p2 = pnand %p2563_p10, %p3269_p4 }
 0x2a3   : > { %p2569_p6 = por %p2568_p3, %p2567_p11 }
 0x2a4   : > { %p2565_p12 = pneg %p2564_p2 }
 0x2a5   : > { %p2571_p1 = por %p2570_p7, %p2569_p6 }
 0x2a7   : > { %p2572_p8 = pnand %p2571_p1, %p2565_p12 }
 0x2a9   : > { %2575 = shalt.err (!%p2572_p8)
}
 0x2aa   : > { %2334 = dma.vmem_to_hbm [thread:$0]  (%p3269_p4), %s3163_s9, 128, %s3161_s7, %s3175_s27   ;;  %2021 = vst.msk [vmem:[%s3109_s8] sm:$0xff] %vm315_vm9, %v2020_v38 }
 0x2ab   : > { %s2576_s24 = scalar_lea.vmem %s3173_s6, 128  ;;  %s2691_s11 = smov [#allocation12]  }
 0x2ac   : > { %p2577_p9 = scmp.ne.s32.totalorder %s3173_s6, %s2576_s24  ;;  %s2580_s17 = sshll.u32 %s2691_s11, 4  ;;  %s2581_s17 = int_to_ptr.vmem [resolvable:$false] %s2580_s17 }
 0x2ad   : > { %s2582_s10 = scalar_lea.vmem %s2581_s17, 256  ;;  %p2583_p5 = scmp.lt.s32.totalorder %s3173_s6, %s2581_s17 }
 0x2ae   : > { %p2578_p13 = pnand %p2577_p9, %p3269_p4  ;;  %p2584_p10 = scmp.lt.s32.totalorder %s2582_s10, %s2576_s24 }
 0x2b0   : > { %p2579_p0 = pneg %p2578_p13  ;;  %p2585_p2 = por %p2584_p10, %p2583_p5 }
 0x2b2   : > { %p2586_p12 = pnand %p2585_p2, %p2579_p0 }
 0x2b4   : > { %2589 = shalt.err (!%p2586_p12)
}
 0x2b5   : > { %s2590_s8 = scalar_lea.hbm %s3171_s25, 128  ;;  %s2594_s12 = scalar_lea.hbm %s3252_s5, 512 }
 0x2b6   : > { %p2591_p11 = scmp.ne.s32.totalorder %s3171_s25, %s2590_s8  ;;  %p2595_p7 = scmp.lt.u32.totalorder %s3171_s25, %s3252_s5 }
 0x2b7   : > { %p2596_p1 = scmp.lt.u32.totalorder %s2594_s12, %s2590_s8  ;;  %p2598_p9 = scmp.lt.u32.totalorder %s2590_s8, %s3171_s25 }
 0x2b8   : > { %p2592_p3 = pnand %p2591_p11, %p3269_p4 }
 0x2b9   : > { %p2597_p8 = por %p2596_p1, %p2595_p7 }
 0x2ba   : > { %p2593_p6 = pneg %p2592_p3 }
 0x2bb   : > { %p2599_p13 = por %p2598_p9, %p2597_p8 }
 0x2bd   : > { %p2600_p0 = pnand %p2599_p13, %p2593_p6 }
 0x2bf   : > { %2603 = shalt.err (!%p2600_p0)
}
 0x2c0   : > { %2335 = dma.vmem_to_hbm [thread:$0]  (%p3269_p4), %s3173_s6, 128, %s3171_s25, %s3175_s27  }
 0x2c1 PF: > { %s3270_s15 = sld [smem:[#allocation17_spill]]  ;;  %p2365_p5 = scmp.ge.s32.totalorder %s2666_s23, 2 }
 0x2c2   : > { %s2090_s30 = sand.u32 1, %s2646_s18  }
 0x2c3   : > { %s2091_s13 = scalar_lea.sflag [#allocation5], %s2090_s30 }
 0x2c7   : > { %p3271_p10 = scmp.ne.s32.totalorder %s3270_s15, 0 }
 0x2c9   : > { %p2351_p2 = pnand %p2365_p5, %p3271_p10 }
 0x2cb   : > { %2637 = dma.done.wait (!%p2351_p2), %s2091_s13, 512  }
 0x2cc   : > { %2639 = vsyncadd (!%p2351_p2), %s2091_s13, 4294966784  ;;  %s3272_s21 = sadd.s32 4294967294, %s2666_s23  }
 0x2cd   : > { %s2099_s24 = sand.u32 1, %s3272_s21  }
 0x2ce   : > { %s2100_s11 = scalar_lea.sflag [#allocation11], %s2099_s24 }
 0x2cf   : > { %2641 = dma.done.wait (!%p2351_p2), %s2100_s11, 256  }
 0x2d0   : > { %2643 = vsyncadd (!%p2351_p2), %s2100_s11, 4294967040  ;;  %s26_s23 = sadd.s32 1, %s2666_s23   ;;  %s3273_s18 = smov %s2650_s19 }
 0x2d1   : > { %p23_p4 = scmp.ge.s32.totalorder %s26_s23, 6   ;;  %s3274_s19 = smov %s2654_s20 }
 0x2d2   : > { %s3275_s20 = smov %s2876_s29  ;;  %s3276_s21 = smov %s2662_s22 }
 0x2d3   : > { %s3277_s22 = smov %s3279_s14  ;;  %25 = sbr.rel (!%p23_p4) target bundleno = 9 (0x9), region = 123 }
 0x2da   :  { %2114 = vsyncpa [#allocation4], 1 }
 0x2db   :  { %2116 = vsyncpa [#allocation4 + $0x1], 1 }
 0x2dc   :  { %2117 = vsyncpa [#allocation7], 1 }
 0x2dd   :  { %2118 = vsyncpa [#allocation5], 1 }
 0x2de   :  { %2120 = vsyncpa [#allocation5 + $0x1], 1 }
 0x2df   :  { %2121 = vsyncpa [#allocation11], 1 }
 0x2e0   :  { %2123 = vsyncpa [#allocation11 + $0x1], 1 }

</bundles_post_ra>
